<compile_context>
chip_gen: v6e
topology: v6e:2x2x1
jax: 0.10.0
libtpu: 0.0.40
codegen_flags: <defaults>
</compile_context>

<pallas_src>
import functools

import jax
import jax.numpy as jnp
from jax.experimental import pallas as pl
from jax.experimental.pallas import tpu as pltpu


# --------------------------------- kernel -----------------------------------

def _attention_kernel(x_ref, wqkv_ref, wout_ref, bout_ref, o_ref,
                      qkv_scratch, heads_scratch, *, heads, dim_head, seq):
    rows = x_ref.shape[0]              # nb * seq rows handled by this grid step
    nb = rows // seq
    inner = heads * dim_head
    dim = o_ref.shape[-1]

    # Fused QKV projection: bf16 operands on the MXU, f32 accumulation, then
    # staged once into a bf16 VMEM scratch (halves slice / re-read traffic).
    qkv_scratch[...] = jnp.dot(
        x_ref[...], wqkv_ref[...],
        preferred_element_type=jnp.float32).astype(jnp.bfloat16)

    wout = wout_ref[...]                                       # (inner, dim) bf16
    bias = jnp.broadcast_to(bout_ref[...], (seq, dim))         # hoisted once

    @pl.loop(0, nb)                    # bounded live ranges across batch elems
    def _(b):
        r0 = pl.multiple_of(b * seq, seq)

        for h in range(heads):         # short head loop, statically unrolled
            qo = h * dim_head
            ko = inner + qo
            vo = 2 * inner + qo
            q = qkv_scratch[pl.ds(r0, seq), qo:qo + dim_head]  # (seq, dh) bf16
            k = qkv_scratch[pl.ds(r0, seq), ko:ko + dim_head]  # (seq, dh) bf16
            v = qkv_scratch[pl.ds(r0, seq), vo:vo + dim_head]  # (seq, dh) bf16

            # scores: contract the head dim -> (seq, seq) f32 tile.
            # Q columns already carry the 1/sqrt(dim_head) scale.
            s = jax.lax.dot_general(q, k, (((1,), (1,)), ((), ())),
                                    preferred_element_type=jnp.float32)
            m = jnp.max(s, axis=-1, keepdims=True)             # f32 softmax math
            e = jnp.exp(s - m)
            denom = jnp.sum(e, axis=-1, keepdims=True)
            inv = pl.reciprocal(denom, approx=True)            # EUP slot
            pv = jnp.dot(e.astype(jnp.bfloat16), v,
                         preferred_element_type=jnp.float32)   # (seq, dh)
            # Assemble the head output at its lane offset (no concat, no
            # per-head K=32 projection).
            heads_scratch[:, qo:qo + dim_head] = pv * inv

        # Single K=inner output projection + bias for this batch element.
        merged = heads_scratch[...].astype(jnp.bfloat16)       # (seq, inner)
        out_b = jnp.dot(merged, wout,
                        preferred_element_type=jnp.float32) + bias
        o_ref[pl.ds(r0, seq), :] = out_b.astype(o_ref.dtype)


# -------------------------------- wrapper ------------------------------------

def _pick_block_batch(B, N, target_rows=512):
    """Pick batches-per-step: rows % 8 == 0, rows <= target, grid >= 2 if possible."""
    divisors = [d for d in range(1, B + 1) if B % d == 0]
    aligned = [d for d in divisors if (d * N) % 8 == 0]
    if not aligned:
        return B                                  # full-extent block is always legal
    limit = max(target_rows, N)
    pref = [d for d in aligned if (B // d) >= 2 and d * N <= limit]
    if pref:                                      # keep >= 2 grid steps (v7x megacore)
        return max(pref)
    small = [d for d in aligned if d * N <= limit]
    if small:
        return max(small)
    return min(aligned)


def _vmem_limit_bytes(rows, seq, dim, inner):
    bf16, f32 = 2, 4
    est = (2 * rows * dim * bf16               # x tile (double-buffered)
           + 2 * rows * dim * f32              # out tile (double-buffered)
           + 2 * dim * 3 * inner * bf16        # w_qkv
           + 2 * inner * dim * bf16            # w_out
           + rows * 3 * inner * (f32 + bf16)   # qkv matmul result + bf16 scratch
           + seq * inner * f32                 # head-output scratch
           + 6 * seq * seq * f32)              # score / exp tiles + headroom
    return int(min(max(2 * est, 32 * 1024 * 1024), 64 * 1024 * 1024))


def attention_pallas(x, w_qkv, w_out, b_out, *, heads, dim_head,
                     dropout=0.0, block_batch=None, interpret=False):
    """Forward pass of the PyTorch Attention module (mask=None path)."""
    # TODO(synk): optional boolean attention-mask path is not implemented.
    del dropout  # nn.Dropout is identity at inference (and for p=0.0)

    B, N, D = x.shape
    inner = heads * dim_head
    assert w_qkv.shape == (D, 3 * inner)
    assert w_out.shape == (inner, D)
    b_out = jnp.reshape(b_out, (1, D)).astype(jnp.float32)

    # Fold the 1/sqrt(dim_head) attention scale into the Q weight columns.
    scale = float(dim_head) ** -0.5
    w_qkv_s = w_qkv.astype(jnp.float32).at[:, :inner].multiply(scale)

    if block_batch is None:
        block_batch = _pick_block_batch(B, N)
    assert B % block_batch == 0
    rows = block_batch * N
    grid = (B // block_batch,)

    # bf16 matmul operands (MXU path); accumulation stays f32 inside the kernel.
    x2 = x.reshape(B * N, D).astype(jnp.bfloat16)
    w_qkv_bf = w_qkv_s.astype(jnp.bfloat16)
    w_out_bf = w_out.astype(jnp.bfloat16)

    kernel = functools.partial(_attention_kernel, heads=heads,
                               dim_head=dim_head, seq=N)

    out = pl.pallas_call(
        kernel,
        out_shape=jax.ShapeDtypeStruct((B * N, D), jnp.float32),
        grid=grid,
        in_specs=[
            pl.BlockSpec((rows, D), lambda i: (i, 0)),          # x tile
            pl.BlockSpec((D, 3 * inner), lambda i: (0, 0)),     # w_qkv (scaled)
            pl.BlockSpec((inner, D), lambda i: (0, 0)),         # w_out
            pl.BlockSpec((1, D), lambda i: (0, 0)),             # b_out
        ],
        out_specs=pl.BlockSpec((rows, D), lambda i: (i, 0)),
        scratch_shapes=[
            pltpu.VMEM((rows, 3 * inner), jnp.bfloat16),        # staged qkv
            pltpu.VMEM((N, inner), jnp.float32),                # assembled heads
        ],
        compiler_params=pltpu.CompilerParams(
            dimension_semantics=("parallel",),
            vmem_limit_bytes=_vmem_limit_bytes(rows, N, D, inner)),
        interpret=interpret,
    )(x2, w_qkv_bf, w_out_bf, b_out)

    return out.reshape(B, N, D)


# --------------------------- pure-JAX reference -------------------------------

def attention_reference(x, w_qkv, w_out, b_out, *, heads, dim_head):
    B, N, D = x.shape
    inner = heads * dim_head
    qkv = x @ w_qkv
    q, k, v = jnp.split(qkv, 3, axis=-1)

    def split_heads(t):
        return t.reshape(B, N, heads, dim_head).transpose(0, 2, 1, 3)

    q, k, v = split_heads(q), split_heads(k), split_heads(v)
    dots = jnp.einsum("bhid,bhjd->bhij", q, k) * (float(dim_head) ** -0.5)
    attn = jax.nn.softmax(dots, axis=-1)
    out = jnp.einsum("bhij,bhjd->bhid", attn, v)
    out = out.transpose(0, 2, 1, 3).reshape(B, N, inner)
    return out @ w_out + jnp.reshape(b_out, (D,))


# ----------------------------------- main -------------------------------------

if __name__ == "__main__":
    B, N, dim = 4, 128, 128
    heads, dim_head = 4, 32
    dropout = 0.0
    inner = heads * dim_head

    key = jax.random.PRNGKey(0)
    kx, k1, k2, k3 = jax.random.split(key, 4)
    x = jax.random.normal(kx, (B, N, dim), dtype=jnp.float32)
    w_qkv = 0.08 * jax.random.normal(k1, (dim, 3 * inner), dtype=jnp.float32)
    w_out = 0.08 * jax.random.normal(k2, (inner, dim), dtype=jnp.float32)
    b_out = 0.02 * jax.random.normal(k3, (1, dim), dtype=jnp.float32)

    out = attention_pallas(x, w_qkv, w_out, b_out,
                           heads=heads, dim_head=dim_head, dropout=dropout)
    out = jax.block_until_ready(out)
    assert out.shape == (B, N, dim)

    ref = jax.block_until_ready(
        attention_reference(x, w_qkv, w_out, b_out,
                            heads=heads, dim_head=dim_head))

    # bf16 matmul operands + approx reciprocal -> slightly looser tolerance
    # than the f32 version (review: expect ~1e-2 relative).
    max_ref = float(jnp.max(jnp.abs(ref)))
    max_diff = float(jnp.max(jnp.abs(out - ref)))
    assert max_diff <= 3e-2 * (1.0 + max_ref), (
        f"kernel/reference mismatch: max_diff={max_diff}, max|ref|={max_ref}")

    print("KERNEL_OK")
</pallas_src>

<mosaic_0001>
module attributes {stable_mosaic.version = 11 : i64} {
  func.func @_attention_kernel(%arg0: i32, %arg1: memref<256x128xbf16, #tpu.memory_space<vmem>>, %arg2: memref<128x384xbf16, #tpu.memory_space<vmem>>, %arg3: memref<128x128xbf16, #tpu.memory_space<vmem>>, %arg4: memref<1x128xf32, #tpu.memory_space<vmem>>, %arg5: memref<256x128xf32, #tpu.memory_space<vmem>>, %arg6: memref<256x384xbf16, #tpu.memory_space<vmem>>, %arg7: memref<128x128xf32, #tpu.memory_space<vmem>>) attributes {dimension_semantics = [#tpu.dimension_semantics<parallel>], iteration_bounds = array<i64: 2>, scalar_prefetch = 0 : i64, scratch_operands = 2 : i64, tpu.core_type = #tpu.core_type<tc>, window_params = [{transform_indices = @transform_0, window_bounds = array<i64: 256, 128>}, {pipeline_mode = #tpu.pipeline_mode<synchronous>, transform_indices = @transform_1, window_bounds = array<i64: 128, 384>}, {pipeline_mode = #tpu.pipeline_mode<synchronous>, transform_indices = @transform_2, window_bounds = array<i64: 128, 128>}, {pipeline_mode = #tpu.pipeline_mode<synchronous>, transform_indices = @transform_3, window_bounds = array<i64: 1, 128>}, {transform_indices = @transform_4, window_bounds = array<i64: 256, 128>}]} {
    %c0 = arith.constant 0 : index
    %c0_0 = arith.constant 0 : index
    %0 = vector.load %arg1[%c0, %c0_0] : memref<256x128xbf16, #tpu.memory_space<vmem>>, vector<256x128xbf16>
    %c0_1 = arith.constant 0 : index
    %c0_2 = arith.constant 0 : index
    %1 = vector.load %arg2[%c0_1, %c0_2] : memref<128x384xbf16, #tpu.memory_space<vmem>>, vector<128x384xbf16>
    %cst = arith.constant dense<0.000000e+00> : vector<256x384xf32>
    %2 = tpu.matmul %0, %1, %cst {dimension_numbers = #tpu.dot_dimension_numbers<[1], [0], [0], [1], [0, 0, 1, 1], [], []>} : vector<256x128xbf16>, vector<128x384xbf16>, vector<256x384xf32> -> vector<256x384xf32>
    %3 = arith.truncf %2 : vector<256x384xf32> to vector<256x384xbf16>
    %c0_3 = arith.constant 0 : index
    %c0_4 = arith.constant 0 : index
    %4 = vector.load %arg6[%c0_3, %c0_4] : memref<256x384xbf16, #tpu.memory_space<vmem>>, vector<256x384xbf16>
    tpu.vector_store %arg6[%c0_3, %c0_4], %3 {strides = array<i32>} : memref<256x384xbf16, #tpu.memory_space<vmem>>, vector<256x384xbf16>,
    %c0_5 = arith.constant 0 : index
    %c0_6 = arith.constant 0 : index
    %5 = vector.load %arg3[%c0_5, %c0_6] : memref<128x128xbf16, #tpu.memory_space<vmem>>, vector<128x128xbf16>
    %c0_7 = arith.constant 0 : index
    %c0_8 = arith.constant 0 : index
    %6 = vector.load %arg4[%c0_7, %c0_8] : memref<1x128xf32, #tpu.memory_space<vmem>>, vector<1x128xf32>
    %7 = vector.shape_cast %6 : vector<1x128xf32> to vector<1x128xf32>
    %8 = vector.broadcast %7 : vector<1x128xf32> to vector<128x128xf32>
    %c0_i32 = arith.constant 0 : i32
    %c2_i32 = arith.constant 2 : i32
    %9 = arith.addi %c0_i32, %c2_i32 : i32
    %c1_i32 = arith.constant 1 : i32
    scf.for %arg8 = %c0_i32 to %9 step %c1_i32  : i32 {
      %c1_i32_10 = arith.constant 1 : i32
      %10 = arith.muli %arg8, %c1_i32_10 : i32
      %c0_i32_11 = arith.constant 0 : i32
      %11 = arith.addi %c0_i32_11, %10 : i32
      %c128_i32 = arith.constant 128 : i32
      %12 = arith.muli %11, %c128_i32 : i32
      %13 = tpu.assume_multiple %12, 128 : i32
      %14 = arith.index_cast %13 : i32 to index
      %c0_12 = arith.constant 0 : index
      %15 = vector.load %arg6[%14, %c0_12] : memref<256x384xbf16, #tpu.memory_space<vmem>>, vector<128x32xbf16>
      %16 = arith.index_cast %13 : i32 to index
      %c128 = arith.constant 128 : index
      %17 = vector.load %arg6[%16, %c128] : memref<256x384xbf16, #tpu.memory_space<vmem>>, vector<128x32xbf16>
      %18 = arith.index_cast %13 : i32 to index
      %c256 = arith.constant 256 : index
      %19 = vector.load %arg6[%18, %c256] : memref<256x384xbf16, #tpu.memory_space<vmem>>, vector<128x32xbf16>
      %cst_13 = arith.constant dense<0.000000e+00> : vector<128x128xf32>
      %20 = tpu.matmul %15, %17, %cst_13 {dimension_numbers = #tpu.dot_dimension_numbers<[1], [1], [0], [0], [0, 0, 1, 0], [], []>} : vector<128x32xbf16>, vector<128x32xbf16>, vector<128x128xf32> -> vector<128x128xf32>
      %cst_14 = arith.constant dense<0xFF800000> : vector<128xf32>
      %21 = vector.multi_reduction <maximumf>, %20, %cst_14 [1] : vector<128x128xf32> to vector<128xf32>
      %22 = vector.shape_cast %21 : vector<128xf32> to vector<128x1xf32>
      %23 = vector.broadcast %22 : vector<128x1xf32> to vector<128x128xf32>
      %24 = arith.subf %20, %23 : vector<128x128xf32>
      %25 = math.exp %24 : vector<128x128xf32>
      %cst_15 = arith.constant dense<0.000000e+00> : vector<128xf32>
      %26 = vector.multi_reduction <add>, %25, %cst_15 [1] : vector<128x128xf32> to vector<128xf32>
      %27 = vector.shape_cast %26 : vector<128xf32> to vector<128x1xf32>
      %28 = tpu.reciprocal %27 {approx = true} : vector<128x1xf32> -> vector<128x1xf32>
      %29 = arith.truncf %25 : vector<128x128xf32> to vector<128x128xbf16>
      %cst_16 = arith.constant dense<0.000000e+00> : vector<128x32xf32>
      %30 = tpu.matmul %29, %19, %cst_16 {dimension_numbers = #tpu.dot_dimension_numbers<[1], [0], [0], [1], [0, 0, 1, 1], [], []>} : vector<128x128xbf16>, vector<128x32xbf16>, vector<128x32xf32> -> vector<128x32xf32>
      %31 = vector.broadcast %28 : vector<128x1xf32> to vector<128x32xf32>
      %32 = arith.mulf %30, %31 : vector<128x32xf32>
      %c0_17 = arith.constant 0 : index
      %c0_18 = arith.constant 0 : index
      %33 = vector.load %arg7[%c0_17, %c0_18] : memref<128x128xf32, #tpu.memory_space<vmem>>, vector<128x32xf32>
      tpu.vector_store %arg7[%c0_17, %c0_18], %32 {strides = array<i32>} : memref<128x128xf32, #tpu.memory_space<vmem>>, vector<128x32xf32>,
      %34 = arith.index_cast %13 : i32 to index
      %c32 = arith.constant 32 : index
      %35 = vector.load %arg6[%34, %c32] : memref<256x384xbf16, #tpu.memory_space<vmem>>, vector<128x32xbf16>
      %36 = arith.index_cast %13 : i32 to index
      %c160 = arith.constant 160 : index
      %37 = vector.load %arg6[%36, %c160] : memref<256x384xbf16, #tpu.memory_space<vmem>>, vector<128x32xbf16>
      %38 = arith.index_cast %13 : i32 to index
      %c288 = arith.constant 288 : index
      %39 = vector.load %arg6[%38, %c288] : memref<256x384xbf16, #tpu.memory_space<vmem>>, vector<128x32xbf16>
      %cst_19 = arith.constant dense<0.000000e+00> : vector<128x128xf32>
      %40 = tpu.matmul %35, %37, %cst_19 {dimension_numbers = #tpu.dot_dimension_numbers<[1], [1], [0], [0], [0, 0, 1, 0], [], []>} : vector<128x32xbf16>, vector<128x32xbf16>, vector<128x128xf32> -> vector<128x128xf32>
      %cst_20 = arith.constant dense<0xFF800000> : vector<128xf32>
      %41 = vector.multi_reduction <maximumf>, %40, %cst_20 [1] : vector<128x128xf32> to vector<128xf32>
      %42 = vector.shape_cast %41 : vector<128xf32> to vector<128x1xf32>
      %43 = vector.broadcast %42 : vector<128x1xf32> to vector<128x128xf32>
      %44 = arith.subf %40, %43 : vector<128x128xf32>
      %45 = math.exp %44 : vector<128x128xf32>
      %cst_21 = arith.constant dense<0.000000e+00> : vector<128xf32>
      %46 = vector.multi_reduction <add>, %45, %cst_21 [1] : vector<128x128xf32> to vector<128xf32>
      %47 = vector.shape_cast %46 : vector<128xf32> to vector<128x1xf32>
      %48 = tpu.reciprocal %47 {approx = true} : vector<128x1xf32> -> vector<128x1xf32>
      %49 = arith.truncf %45 : vector<128x128xf32> to vector<128x128xbf16>
      %cst_22 = arith.constant dense<0.000000e+00> : vector<128x32xf32>
      %50 = tpu.matmul %49, %39, %cst_22 {dimension_numbers = #tpu.dot_dimension_numbers<[1], [0], [0], [1], [0, 0, 1, 1], [], []>} : vector<128x128xbf16>, vector<128x32xbf16>, vector<128x32xf32> -> vector<128x32xf32>
      %51 = vector.broadcast %48 : vector<128x1xf32> to vector<128x32xf32>
      %52 = arith.mulf %50, %51 : vector<128x32xf32>
      %c0_23 = arith.constant 0 : index
      %c32_24 = arith.constant 32 : index
      %53 = vector.load %arg7[%c0_23, %c32_24] : memref<128x128xf32, #tpu.memory_space<vmem>>, vector<128x32xf32>
      tpu.vector_store %arg7[%c0_23, %c32_24], %52 {strides = array<i32>} : memref<128x128xf32, #tpu.memory_space<vmem>>, vector<128x32xf32>,
      %54 = arith.index_cast %13 : i32 to index
      %c64 = arith.constant 64 : index
      %55 = vector.load %arg6[%54, %c64] : memref<256x384xbf16, #tpu.memory_space<vmem>>, vector<128x32xbf16>
      %56 = arith.index_cast %13 : i32 to index
      %c192 = arith.constant 192 : index
      %57 = vector.load %arg6[%56, %c192] : memref<256x384xbf16, #tpu.memory_space<vmem>>, vector<128x32xbf16>
      %58 = arith.index_cast %13 : i32 to index
      %c320 = arith.constant 320 : index
      %59 = vector.load %arg6[%58, %c320] : memref<256x384xbf16, #tpu.memory_space<vmem>>, vector<128x32xbf16>
      %cst_25 = arith.constant dense<0.000000e+00> : vector<128x128xf32>
      %60 = tpu.matmul %55, %57, %cst_25 {dimension_numbers = #tpu.dot_dimension_numbers<[1], [1], [0], [0], [0, 0, 1, 0], [], []>} : vector<128x32xbf16>, vector<128x32xbf16>, vector<128x128xf32> -> vector<128x128xf32>
      %cst_26 = arith.constant dense<0xFF800000> : vector<128xf32>
      %61 = vector.multi_reduction <maximumf>, %60, %cst_26 [1] : vector<128x128xf32> to vector<128xf32>
      %62 = vector.shape_cast %61 : vector<128xf32> to vector<128x1xf32>
      %63 = vector.broadcast %62 : vector<128x1xf32> to vector<128x128xf32>
      %64 = arith.subf %60, %63 : vector<128x128xf32>
      %65 = math.exp %64 : vector<128x128xf32>
      %cst_27 = arith.constant dense<0.000000e+00> : vector<128xf32>
      %66 = vector.multi_reduction <add>, %65, %cst_27 [1] : vector<128x128xf32> to vector<128xf32>
      %67 = vector.shape_cast %66 : vector<128xf32> to vector<128x1xf32>
      %68 = tpu.reciprocal %67 {approx = true} : vector<128x1xf32> -> vector<128x1xf32>
      %69 = arith.truncf %65 : vector<128x128xf32> to vector<128x128xbf16>
      %cst_28 = arith.constant dense<0.000000e+00> : vector<128x32xf32>
      %70 = tpu.matmul %69, %59, %cst_28 {dimension_numbers = #tpu.dot_dimension_numbers<[1], [0], [0], [1], [0, 0, 1, 1], [], []>} : vector<128x128xbf16>, vector<128x32xbf16>, vector<128x32xf32> -> vector<128x32xf32>
      %71 = vector.broadcast %68 : vector<128x1xf32> to vector<128x32xf32>
      %72 = arith.mulf %70, %71 : vector<128x32xf32>
      %c0_29 = arith.constant 0 : index
      %c64_30 = arith.constant 64 : index
      %73 = vector.load %arg7[%c0_29, %c64_30] : memref<128x128xf32, #tpu.memory_space<vmem>>, vector<128x32xf32>
      tpu.vector_store %arg7[%c0_29, %c64_30], %72 {strides = array<i32>} : memref<128x128xf32, #tpu.memory_space<vmem>>, vector<128x32xf32>,
      %74 = arith.index_cast %13 : i32 to index
      %c96 = arith.constant 96 : index
      %75 = vector.load %arg6[%74, %c96] : memref<256x384xbf16, #tpu.memory_space<vmem>>, vector<128x32xbf16>
      %76 = arith.index_cast %13 : i32 to index
      %c224 = arith.constant 224 : index
      %77 = vector.load %arg6[%76, %c224] : memref<256x384xbf16, #tpu.memory_space<vmem>>, vector<128x32xbf16>
      %78 = arith.index_cast %13 : i32 to index
      %c352 = arith.constant 352 : index
      %79 = vector.load %arg6[%78, %c352] : memref<256x384xbf16, #tpu.memory_space<vmem>>, vector<128x32xbf16>
      %cst_31 = arith.constant dense<0.000000e+00> : vector<128x128xf32>
      %80 = tpu.matmul %75, %77, %cst_31 {dimension_numbers = #tpu.dot_dimension_numbers<[1], [1], [0], [0], [0, 0, 1, 0], [], []>} : vector<128x32xbf16>, vector<128x32xbf16>, vector<128x128xf32> -> vector<128x128xf32>
      %cst_32 = arith.constant dense<0xFF800000> : vector<128xf32>
      %81 = vector.multi_reduction <maximumf>, %80, %cst_32 [1] : vector<128x128xf32> to vector<128xf32>
      %82 = vector.shape_cast %81 : vector<128xf32> to vector<128x1xf32>
      %83 = vector.broadcast %82 : vector<128x1xf32> to vector<128x128xf32>
      %84 = arith.subf %80, %83 : vector<128x128xf32>
      %85 = math.exp %84 : vector<128x128xf32>
      %cst_33 = arith.constant dense<0.000000e+00> : vector<128xf32>
      %86 = vector.multi_reduction <add>, %85, %cst_33 [1] : vector<128x128xf32> to vector<128xf32>
      %87 = vector.shape_cast %86 : vector<128xf32> to vector<128x1xf32>
      %88 = tpu.reciprocal %87 {approx = true} : vector<128x1xf32> -> vector<128x1xf32>
      %89 = arith.truncf %85 : vector<128x128xf32> to vector<128x128xbf16>
      %cst_34 = arith.constant dense<0.000000e+00> : vector<128x32xf32>
      %90 = tpu.matmul %89, %79, %cst_34 {dimension_numbers = #tpu.dot_dimension_numbers<[1], [0], [0], [1], [0, 0, 1, 1], [], []>} : vector<128x128xbf16>, vector<128x32xbf16>, vector<128x32xf32> -> vector<128x32xf32>
      %91 = vector.broadcast %88 : vector<128x1xf32> to vector<128x32xf32>
      %92 = arith.mulf %90, %91 : vector<128x32xf32>
      %c0_35 = arith.constant 0 : index
      %c96_36 = arith.constant 96 : index
      %93 = vector.load %arg7[%c0_35, %c96_36] : memref<128x128xf32, #tpu.memory_space<vmem>>, vector<128x32xf32>
      tpu.vector_store %arg7[%c0_35, %c96_36], %92 {strides = array<i32>} : memref<128x128xf32, #tpu.memory_space<vmem>>, vector<128x32xf32>,
      %c0_37 = arith.constant 0 : index
      %c0_38 = arith.constant 0 : index
      %94 = vector.load %arg7[%c0_37, %c0_38] : memref<128x128xf32, #tpu.memory_space<vmem>>, vector<128x128xf32>
      %95 = arith.truncf %94 : vector<128x128xf32> to vector<128x128xbf16>
      %cst_39 = arith.constant dense<0.000000e+00> : vector<128x128xf32>
      %96 = tpu.matmul %95, %5, %cst_39 {dimension_numbers = #tpu.dot_dimension_numbers<[1], [0], [0], [1], [0, 0, 1, 1], [], []>} : vector<128x128xbf16>, vector<128x128xbf16>, vector<128x128xf32> -> vector<128x128xf32>
      %97 = arith.addf %96, %8 : vector<128x128xf32>
      %98 = arith.index_cast %13 : i32 to index
      %c0_40 = arith.constant 0 : index
      %99 = vector.load %arg5[%98, %c0_40] : memref<256x128xf32, #tpu.memory_space<vmem>>, vector<128x128xf32>
      tpu.vector_store %arg5[%98, %c0_40], %97 {strides = array<i32>} : memref<256x128xf32, #tpu.memory_space<vmem>>, vector<128x128xf32>,
    }
    %c2_i32_9 = arith.constant 2 : i32
    return
  }
  func.func @transform_0(%arg0: i32) -> (i32, i32) {
    %c0_i32 = arith.constant 0 : i32
    %c0_i32_0 = arith.constant 0 : i32
    return %arg0, %c0_i32 : i32, i32
  }
  func.func @transform_1(%arg0: i32) -> (i32, i32) {
    %c0_i32 = arith.constant 0 : i32
    %c0_i32_0 = arith.constant 0 : i32
    %c0_i32_1 = arith.constant 0 : i32
    return %c0_i32, %c0_i32_0 : i32, i32
  }
  func.func @transform_2(%arg0: i32) -> (i32, i32) {
    %c0_i32 = arith.constant 0 : i32
    %c0_i32_0 = arith.constant 0 : i32
    %c0_i32_1 = arith.constant 0 : i32
    return %c0_i32, %c0_i32_0 : i32, i32
  }
  func.func @transform_3(%arg0: i32) -> (i32, i32) {
    %c0_i32 = arith.constant 0 : i32
    %c0_i32_0 = arith.constant 0 : i32
    %c0_i32_1 = arith.constant 0 : i32
    return %c0_i32, %c0_i32_0 : i32, i32
  }
  func.func @transform_4(%arg0: i32) -> (i32, i32) {
    %c0_i32 = arith.constant 0 : i32
    %c0_i32_0 = arith.constant 0 : i32
    return %arg0, %c0_i32 : i32, i32
  }
}

</mosaic_0001>

<bundles_post_ra>
// kernel: tpu_custom_call.1
= control target key start
LH: loop header
LB: loop body
LE: loop exit
PB: predicated region body
PF: predicated region fallthrough
CT: control target
= control target key end

     0   :  { %9 = vsyncpa [#allocation5], 0  ;;  %s7339_s0 = inlined_call_operand.hbm [shape: bf16[512,128], index: 0, kind: input, shape index: {}]   ;;  %s7340_s1 = inlined_call_operand.hbm [shape: bf16[128,384], index: 1, kind: input, shape index: {}]   ;;  %s7341_s2 = inlined_call_operand.hbm [shape: bf16[128,128], index: 2, kind: input, shape index: {}]   ;;  %s7342_s3 = inlined_call_operand.vmem [shape: f32[1,128], index: 3, kind: input, shape index: {}]   ;;  %s7343_s4 = inlined_call_operand.hbm [shape: f32[512,128], index: 4, kind: output, shape index: {}]  }
   0x1   :  { %11 = vsyncpa [#allocation5 + $0x1], 0 }
   0x2   :  { %12 = vsyncpa [#allocation8], 0 }
   0x3   :  { %13 = vsyncpa [#allocation6], 0 }
   0x4   :  { %15 = vsyncpa [#allocation6 + $0x1], 0  ;;  %s5872_s15 = smov 0   ;;  %s5874_s16 = smov 0  }
   0x5   :  { %s5876_s17 = smov 0   ;;  %s5878_s18 = smov 0  }
   0x6 LB: > { %s5893_s19 = sadd.s32 4294967295, %s5827_s18   ;;  %s4294_s20 = sadd.s32 4294967294, %s5827_s18   ;;  %s5827_s18 = sphi %s5878_s18, %s7501_s18   ;;  %s5823_s17 = sphi %s5876_s17, %s7500_s17   ;;  %s5819_s16 = sphi %s5874_s16, %s7499_s16   ;;  %s5815_s15 = sphi %s5872_s15, %s7498_s15  }
   0x7   : > { %p41_p0 = scmp.ne.s32.totalorder %s5819_s16, %s5815_s15  ;;  %p7344_p1 = scmp.eq.s32.totalorder %s5893_s19, 0 }
   0x8   : > { %p134_p3 = scmp.eq.s32.totalorder %s4294_s20, 1  ;;  %p4295_p5 = scmp.ge.s32.totalorder %s5827_s18, 1 }
   0x9   : > { %p5902_p4 = por %p7344_p1, %p41_p0  ;;  %p141_p7 = scmp.lt.s32.totalorder %s5827_s18, 3 }
   0xa   : > { %p5907_p6 = por %p134_p3, %p41_p0  ;;  %s5833_s24 = smov [#allocation7]  }
   0xb   : > { %s7352_s21 = scalar_select %p5902_p4, 1, 0 }
   0xc   : > { %s7353_s22 = scalar_select %p5907_p6, 1, 0 }
   0xd   : > { %p5912_p8 = pnand %p4295_p5, %p141_p7  ;;  %s153_s25 = sshll.u32 %s5833_s24, 4  ;;  %s154_s25 = int_to_ptr.vmem [resolvable:$true] %s153_s25 }
   0xe   : > { %s5834_s27 = smov [#allocation9]   ;;  %s5686_s29 = scalar_lea.vmem %s154_s25, 3072 }
   0xf   : > { %s7354_s23 = scalar_select %p5912_p8, 1, 0 }
  0x10   : > { %p5202_p9 = pneg %p5912_p8  ;;  %s166_s28 = sshll.u32 %s5834_s27, 4  ;;  %s167_s28 = int_to_ptr.vmem [resolvable:$true] %s166_s28 }
  0x11   : > { %p5687_p13 = scmp.ne.s32.totalorder %s154_s25, %s5686_s29  ;;  %p5694_p5 = scmp.lt.s32.totalorder %s154_s25, %s154_s25 }
  0x12   : > { %p5921_p11 = pnand %p5202_p9, %p7344_p1  ;;  %p5695_p7 = scmp.lt.s32.totalorder %s5686_s29, %s5686_s29 }
  0x14   : > { %p5677_p12 = pneg %p5921_p11  ;;  %p5696_p10 = por %p5695_p7, %p5694_p5 }
  0x16   : > { %p5689_p0 = pnand %p5687_p13, %p5677_p12 }
  0x18   : > { %p5690_p3 = pneg %p5689_p0 }
  0x1a   : > { %p5697_p9 = pnand %p5696_p10, %p5690_p3 }
  0x1c   : > { %5700 = shalt.err (!%p5697_p9)
}
  0x1d   : > { %s5835_s30 = smov 192   ;;  %s5836_s5 = smov 12  }
  0x1e   : > { %5205 = dma.hbm_to_vmem [thread:$0]  (!%p5921_p11), %s7340_s1, 3072, %s154_s25, [#allocation8], %s5835_s30, %s5835_s30, %s5836_s5  }
  0x1f   : > { %s5712_s8 = scalar_lea.vmem %s167_s28, 1024  ;;  %p5720_p2 = scmp.lt.s32.totalorder %s167_s28, %s167_s28 }
  0x20   : > { %p5713_p1 = scmp.ne.s32.totalorder %s167_s28, %s5712_s8  ;;  %p5721_p6 = scmp.lt.s32.totalorder %s5712_s8, %s5712_s8 }
  0x22   : > { %p5715_p13 = pnand %p5713_p1, %p5677_p12  ;;  %p5722_p5 = por %p5721_p6, %p5720_p2 }
  0x24   : > { %p5716_p0 = pneg %p5715_p13 }
  0x26   : > { %p5723_p10 = pnand %p5722_p5, %p5716_p0 }
  0x28   : > { %5726 = shalt.err (!%p5723_p10)
}
  0x29   : > { %s5837_s9 = smov 64   ;;  %s5838_s10 = smov 4  }
  0x2a   : > { %5208 = dma.hbm_to_vmem [thread:$0]  (!%p5921_p11), %s7341_s2, 1024, %s167_s28, [#allocation8], %s5837_s9, %s5837_s9, %s5838_s10  }
  0x2b   : > { %s5947_s13 = sadd.s32 1, %s5827_s18   ;;  %s28_s20 = sadd.s32 1, %s5823_s17 }
  0x2c   : > { %s25_s14 = ssub.s32 %s5827_s18, %s5947_s13  ;;  %p35_p2 = scmp.ne.s32.totalorder %s5823_s17, %s5819_s16 }
  0x2d   : > { %p26_p1 = scmp.eq.s32.totalorder %s25_s14, 0  ;;  %p36_p6 = scmp.eq.s32.totalorder %s5827_s18, 0 }
  0x2e   : > { %p7356_p3 = scmp.eq.s32.totalorder %s5893_s19, 1  ;;  %p5219_p9 = scmp.lt.s32.totalorder %s5827_s18, 2 }
  0x2f   : > { %s5956_s24 = scalar_select %p26_p1, %s5823_s17, %s28_s20  }
  0x30   : > { %p37_p12 = por %p36_p6, %p35_p2  ;;  %p5960_p7 = por %p7356_p3, %p35_p2 }
  0x31   : > { %s183_s26 = sand.u32 1, %s5823_s17   ;;  %s4555_s28 = sshll.u32 %s5827_s18, 11 }
  0x32   : > { %s7357_s25 = scalar_select %p5960_p7, 1, 0 }
  0x33   : > { %s4299_s27 = sshll.u32 %s183_s26, 7  ;;  %s5970_s5 = scalar_lea.hbm %s7339_s0, %s4555_s28 }
  0x34   : > { %s187_s6 = scalar_lea.vmem [#allocation4], %s4299_s27  ;;  %p5974_p11 = pnand %p5219_p9, %p37_p12 }
  0x35   : > { %s194_s7 = sshll.u32 %s187_s6, 4  ;;  %s5978_s11 = scalar_lea.sflag [#allocation5], %s183_s26  ;;  %s5972_s7 = int_to_ptr.vmem [resolvable:$true] %s194_s7 }
  0x36   : > { %s5727_s12 = scalar_lea.hbm %s5970_s5, 2048  ;;  %p5729_p0 = pneg %p5974_p11 }
  0x37   : > { %p5728_p13 = scmp.ne.s32.totalorder %s5970_s5, %s5727_s12  ;;  %s5732_s27 = scalar_lea.hbm %s7339_s0, 4096 }
  0x38   : > { %p5733_p1 = scmp.lt.s32.totalorder %s5970_s5, %s7339_s0  ;;  %p5734_p2 = scmp.lt.s32.totalorder %s5732_s27, %s5727_s12 }
  0x39   : > { %p5730_p5 = pnand %p5729_p0, %p5728_p13 }
  0x3a   : > { %p5735_p6 = por %p5734_p2, %p5733_p1 }
  0x3b   : > { %p5731_p10 = pneg %p5730_p5 }
  0x3d   : > { %p5736_p12 = pnand %p5735_p6, %p5731_p10 }
  0x3f   : > { %5739 = shalt.err (!%p5736_p12)
}
  0x40   : > { %s5740_s26 = scalar_lea.vmem %s5972_s7, 2048  ;;  %s5839_s30 = smov [#allocation4]  }
  0x41   : > { %p5741_p3 = scmp.ne.s32.totalorder %s5972_s7, %s5740_s26  ;;  %s5745_s6 = sshll.u32 %s5839_s30, 4  ;;  %s5746_s6 = int_to_ptr.vmem [resolvable:$false] %s5745_s6 }
  0x42   : > { %s5747_s14 = scalar_lea.vmem %s5746_s6, 4096  ;;  %p5748_p5 = scmp.lt.s32.totalorder %s5972_s7, %s5746_s6 }
  0x43   : > { %p5743_p9 = pnand %p5741_p3, %p5729_p0  ;;  %p5749_p7 = scmp.lt.s32.totalorder %s5747_s14, %s5740_s26 }
  0x45   : > { %p5744_p13 = pneg %p5743_p9  ;;  %p5750_p4 = por %p5749_p7, %p5748_p5 }
  0x47   : > { %p5751_p8 = pnand %p5750_p4, %p5744_p13 }
  0x49   : > { %5754 = shalt.err (!%p5751_p8)
}
  0x4a   : > { %5212 = dma.hbm_to_vmem [thread:$0]  (!%p5974_p11), %s5970_s5, 2048, %s5972_s7, %s5978_s11, %s5837_s9, %s5837_s9, %s5838_s10  }
  0x4b   : > { %p7359_p0 = scmp.ne.s32.totalorder %s7354_s23, 0 }
  0x4d   : > { %206 = sbr.rel (%p7359_p0) target bundleno = 2851 (0xb23), region = 36 }
  0x52   : > { %s6005_s12 = sand.u32 1, %s5819_s16   ;;  %p7360_p4 = scmp.ne.s32.totalorder %s7352_s21, 0 }
  0x53   : > { %s4303_s20 = sshll.u32 %s6005_s12, 7  ;;  %s209_s27 = scalar_lea.sflag [#allocation5], %s6005_s12 }
  0x54   : > { %s6009_s28 = scalar_lea.vmem [#allocation4], %s4303_s20 }
  0x55   : > { %5802 = dma.done.wait (%p7360_p4), %s209_s27, 2048  }
  0x56   : > { %5804 = vsyncadd (%p7360_p4), %s209_s27, 4294965248  ;;  %p7361_p8 = scmp.eq.s32.totalorder %s5893_s19, 0 }
  0x58   : > { %5806 = dma.done.wait (%p7361_p8), [#allocation8], 4096   ;;  %p7362_p7 = pmov %p7361_p8 }
  0x59   : > { %s4306_s23 = sshll.u32 %s6005_s12, 8  ;;  %v5840_v0 = vmov 0   ;;  %v6022_v1 = vld [vmem:[#allocation9] sm:$0xf]  ;;  %v6024_v2 = vld [vmem:[#allocation9 + $0x4] sm:$0xf] }
  0x5a   : > { %5808 = vsyncadd (%p7362_p7), [#allocation8], 4294963200  ;;  %568 = vmatprep.mubr.bf16.mxu0 %v5840_v0  ;;  %688 = vmatprep.mubr.bf16.mxu1 %v5840_v0  ;;  %7363 = vst [vmem:[#allocation14_spill] sm:$0xff] %v6022_v1  ;;  %v6026_v3 = vld [vmem:[#allocation9 + $0x8] sm:$0xf]  ;;  %v5299_v35 = vld [vmem:[%s6009_s28] sm:$0xff]  }
  0x5b   : > { %7364 = vst [vmem:[#allocation15_spill] sm:$0xff] %v6024_v2  ;;  %7365 = vst [vmem:[#allocation16_spill] sm:$0xff] %v6026_v3  ;;  %v6028_v4 = vld [vmem:[#allocation9 + $0xc] sm:$0xf]  ;;  %v6030_v5 = vld [vmem:[#allocation9 + $0x10] sm:$0xf] }
  0x5c   : > { %7366 = vst [vmem:[#allocation17_spill] sm:$0xff] %v6028_v4  ;;  %7367 = vst [vmem:[#allocation18_spill] sm:$0xff] %v6030_v5  ;;  %v6032_v6 = vld [vmem:[#allocation9 + $0x14] sm:$0xf]  ;;  %v6034_v7 = vld [vmem:[#allocation9 + $0x18] sm:$0xf] }
  0x5d   : > { %7368 = vst [vmem:[#allocation19_spill] sm:$0xff] %v6032_v6  ;;  %7369 = vst [vmem:[#allocation20_spill] sm:$0xff] %v6034_v7  ;;  %v6036_v8 = vld [vmem:[#allocation9 + $0x1c] sm:$0xf]  ;;  %v6038_v9 = vld [vmem:[#allocation9 + $0x20] sm:$0xf] }
  0x5e   : > { %7370 = vst [vmem:[#allocation21_spill] sm:$0xff] %v6036_v8  ;;  %7371 = vst [vmem:[#allocation22_spill] sm:$0xff] %v6038_v9  ;;  %v6040_v10 = vld [vmem:[#allocation9 + $0x24] sm:$0xf]  ;;  %v6042_v11 = vld [vmem:[#allocation9 + $0x28] sm:$0xf] }
  0x5f   : > { %7372 = vst [vmem:[#allocation23_spill] sm:$0xff] %v6040_v10  ;;  %7373 = vst [vmem:[#allocation24_spill] sm:$0xff] %v6042_v11  ;;  %v6044_v12 = vld [vmem:[#allocation9 + $0x2c] sm:$0xf]  ;;  %v6046_v13 = vld [vmem:[#allocation9 + $0x30] sm:$0xf] }
  0x60   : > { %7374 = vst [vmem:[#allocation25_spill] sm:$0xff] %v6044_v12  ;;  %7375 = vst [vmem:[#allocation26_spill] sm:$0xff] %v6046_v13  ;;  %v6048_v14 = vld [vmem:[#allocation9 + $0x34] sm:$0xf]  ;;  %v6050_v15 = vld [vmem:[#allocation9 + $0x38] sm:$0xf] }
  0x61   : > { %7376 = vst [vmem:[#allocation27_spill] sm:$0xff] %v6048_v14  ;;  %7377 = vst [vmem:[#allocation28_spill] sm:$0xff] %v6050_v15  ;;  %v6052_v16 = vld [vmem:[#allocation9 + $0x3c] sm:$0xf]  ;;  %v6057_v17 = vld [vmem:[%s7342_s3] ss:$0 sm:$0xff] }
  0x62   : > { %7378 = vst [vmem:[#allocation29_spill] sm:$0xff] %v6052_v16  ;;  %7379 = vst [vmem:[#allocation30_spill] sm:$0xff] %v6057_v17  ;;  %v5275_v18 = vld [vmem:[#allocation7 + $0xac] ss:$12 sps:$4 sm:$0xff]   ;;  %v5277_v19 = vld [vmem:[#allocation7 + $0xa8] ss:$12 sps:$4 sm:$0xff]  }
  0x63   : > { %v5278_v20 = vld [vmem:[#allocation7 + $0x94] ss:$12 sps:$4 sm:$0xff]   ;;  %536 = vmatprep.subr.bf16.mxu0 %v5275_v18  ;;  %5126 = vmatprep.subr.bf16.mxu1 %v5275_v18  ;;  %v5280_v21 = vld [vmem:[#allocation7 + $0x90] ss:$12 sps:$4 sm:$0xff]   ;;  %v5283_v23 = vld [vmem:[#allocation7 + $0x78] ss:$12 sps:$4 sm:$0xff]  }
  0x64   : > { %537 = vmatpush1.bf16.msra.mxu0 %v5277_v19  ;;  %5134 = vmatpush1.bf16.msra.mxu1 %v5277_v19  ;;  %v5281_v22 = vld [vmem:[#allocation7 + $0x7c] ss:$12 sps:$4 sm:$0xff]   ;;  %v5284_v24 = vld [vmem:[#allocation7 + $0x64] ss:$12 sps:$4 sm:$0xff]   ;;  %v5286_v25 = vld [vmem:[#allocation7 + $0x60] ss:$12 sps:$4 sm:$0xff]  }
  0x65   : > { %538 = vmatprep.subr.bf16.mxu0 %v5278_v20  ;;  %5127 = vmatprep.subr.bf16.mxu1 %v5278_v20  ;;  %v5287_v26 = vld [vmem:[#allocation7 + $0x4c] ss:$12 sps:$4 sm:$0xff]   ;;  %v5289_v27 = vld [vmem:[#allocation7 + $0x48] ss:$12 sps:$4 sm:$0xff]   ;;  %v5292_v29 = vld [vmem:[#allocation7 + $0x30] ss:$12 sps:$4 sm:$0xff]  }
  0x66   : > { %v5290_v28 = vld [vmem:[#allocation7 + $0x34] ss:$12 sps:$4 sm:$0xff]   ;;  %v5293_v30 = vld [vmem:[#allocation7 + $0x1c] ss:$12 sps:$4 sm:$0xff]   ;;  %v5295_v31 = vld [vmem:[#allocation7 + $0x18] ss:$12 sps:$4 sm:$0xff]  }
  0x67   : > { %v5296_v32 = vld [vmem:[#allocation7 + $0x4] ss:$12 sps:$4 sm:$0xff]   ;;  %v5298_v33 = vld [vmem:[#allocation7] ss:$12 sps:$4 sm:$0xff]   ;;  %v5306_v41 = vld [vmem:[#allocation7 + $0x68] ss:$12 sps:$4 sm:$0xff]  }
  0x68   : > { %539 = vmatpush1.bf16.msra.mxu0 %v5280_v21  ;;  %5135 = vmatpush1.bf16.msra.mxu1 %v5280_v21  ;;  %v5301_v34 = vld [vmem:[#allocation7 + $0xb0] ss:$12 sps:$4 sm:$0xff]   ;;  %v6061_v36 = vld [vmem:[%s6009_s28 + $0x60] sm:$0xff]   ;;  %v5303_v39 = vld [vmem:[%s6009_s28 + $0x8] sm:$0xff]   ;;  %s6099_s10 = scalar_lea.vmem [#allocation10], %s4306_s23  ;;  %s6101_s5 = smov 0  }
  0x69   : > { %540 = vmatprep.subr.bf16.mxu0 %v5281_v22  ;;  %5128 = vmatprep.subr.bf16.mxu1 %v5281_v22  ;;  %v5302_v37 = vld [vmem:[#allocation7 + $0x98] ss:$12 sps:$4 sm:$0xff]   ;;  %v5305_v38 = vld [vmem:[#allocation7 + $0x80] ss:$12 sps:$4 sm:$0xff]   ;;  %v5309_v42 = vld [vmem:[#allocation7 + $0x50] ss:$12 sps:$4 sm:$0xff]  }
  0x6a   : > { %v6068_v40 = vld [vmem:[%s6009_s28 + $0x68] sm:$0xff]   ;;  %v5307_v43 = vld [vmem:[%s6009_s28 + $0x10] sm:$0xff]   ;;  %v5310_v45 = vld [vmem:[#allocation7 + $0x38] ss:$12 sps:$4 sm:$0xff]  }
  0x6b   : > { %v5308_v44 = vld [vmem:[%s6009_s28 + $0x70] sm:$0xff]   ;;  %v5313_v46 = vld [vmem:[#allocation7 + $0x20] ss:$12 sps:$4 sm:$0xff]   ;;  %v5311_v47 = vld [vmem:[%s6009_s28 + $0x18] sm:$0xff]  }
  0x6c   : > { %541 = vmatpush1.bf16.msra.mxu0 %v5283_v23  ;;  %5136 = vmatpush1.bf16.msra.mxu1 %v5283_v23  ;;  %v5312_v48 = vld [vmem:[%s6009_s28 + $0x78] sm:$0xff]   ;;  %v5314_v49 = vld [vmem:[#allocation7 + $0x8] ss:$12 sps:$4 sm:$0xff]   ;;  %v5315_v50 = vld [vmem:[%s6009_s28 + $0x20] sm:$0xff]  }
  0x6d   : > { %542 = vmatprep.subr.bf16.mxu0 %v5284_v24  ;;  %5129 = vmatprep.subr.bf16.mxu1 %v5284_v24  ;;  %v5316_v51 = vld [vmem:[%s6009_s28 + $0x28] sm:$0xff]   ;;  %v5317_v52 = vld [vmem:[%s6009_s28 + $0x30] sm:$0xff]   ;;  %v5318_v53 = vld [vmem:[%s6009_s28 + $0x38] sm:$0xff]  }
  0x6e   : > { %v5319_v54 = vld [vmem:[%s6009_s28 + $0x40] sm:$0xff]   ;;  %v5320_v55 = vld [vmem:[%s6009_s28 + $0x48] sm:$0xff]   ;;  %v5321_v56 = vld [vmem:[%s6009_s28 + $0x50] sm:$0xff]  }
  0x6f   : > { %v5322_v57 = vld [vmem:[%s6009_s28 + $0x58] sm:$0xff]  }
  0x70   : > { %543 = vmatpush1.bf16.msra.mxu0 %v5286_v25  ;;  %5137 = vmatpush1.bf16.msra.mxu1 %v5286_v25 }
  0x71   : > { %544 = vmatprep.subr.bf16.mxu0 %v5287_v26  ;;  %5130 = vmatprep.subr.bf16.mxu1 %v5287_v26 }
  0x74   : > { %545 = vmatpush1.bf16.msra.mxu0 %v5289_v27  ;;  %5138 = vmatpush1.bf16.msra.mxu1 %v5289_v27 }
  0x75   : > { %546 = vmatprep.subr.bf16.mxu0 %v5290_v28  ;;  %5131 = vmatprep.subr.bf16.mxu1 %v5290_v28 }
  0x78   : > { %547 = vmatpush1.bf16.msra.mxu0 %v5292_v29  ;;  %5139 = vmatpush1.bf16.msra.mxu1 %v5292_v29 }
  0x79   : > { %548 = vmatprep.subr.bf16.mxu0 %v5293_v30  ;;  %5132 = vmatprep.subr.bf16.mxu1 %v5293_v30 }
  0x7c   : > { %549 = vmatpush1.bf16.msra.mxu0 %v5295_v31  ;;  %5140 = vmatpush1.bf16.msra.mxu1 %v5295_v31 }
  0x7d   : > { %550 = vmatprep.subr.bf16.mxu0 %v5296_v32  ;;  %5133 = vmatprep.subr.bf16.mxu1 %v5296_v32 }
  0x80   : > { %551 = vmatpush1.bf16.msra.mxu0 %v5298_v33  ;;  %5141 = vmatpush1.bf16.msra.mxu1 %v5298_v33 }
  0x81   : > { %4790 = vmatprep.subr.bf16.mxu1 %v5301_v34 }
  0x83   : > { %569 = vmatmul.mubr.bf16.vlgmr.msra.gmra.mxu0 %v5299_v35  ;;  %689 = vmatmul.mubr.bf16.vlgmr.msra.gmra.mxu1 %v6061_v36 }
  0x84   : > { %4791 = vmatpush3.bf16.msra.mxu1 %v5301_v34  ;;  %578 = vmatprep.mubr.bf16.mxu0 %v5840_v0 }
  0x85   : > { %4792 = vmatprep.subr.bf16.mxu1 %v5302_v37  ;;  %698 = vmatprep.mubr.bf16.mxu1 %v5840_v0 }
  0x88   : > { %4793 = vmatpush3.bf16.msra.mxu1 %v5302_v37 }
  0x89   : > { %4794 = vmatprep.subr.bf16.mxu1 %v5305_v38 }
  0x8b   : > { %579 = vmatmul.mubr.bf16.gmra.mxu0 %v5303_v39  ;;  %699 = vmatmul.mubr.bf16.gmra.mxu1 %v6068_v40 }
  0x8c   : > { %4795 = vmatpush3.bf16.msra.mxu1 %v5305_v38  ;;  %588 = vmatprep.mubr.bf16.mxu0 %v5840_v0 }
  0x8d   : > { %4796 = vmatprep.subr.bf16.mxu1 %v5306_v41  ;;  %708 = vmatprep.mubr.bf16.mxu1 %v5840_v0 }
  0x90   : > { %4797 = vmatpush3.bf16.msra.mxu1 %v5306_v41 }
  0x91   : > { %4798 = vmatprep.subr.bf16.mxu1 %v5309_v42 }
  0x93   : > { %589 = vmatmul.mubr.bf16.gmra.mxu0 %v5307_v43  ;;  %709 = vmatmul.mubr.bf16.gmra.mxu1 %v5308_v44 }
  0x94   : > { %4799 = vmatpush3.bf16.msra.mxu1 %v5309_v42  ;;  %598 = vmatprep.mubr.bf16.mxu0 %v5840_v0 }
  0x95   : > { %4800 = vmatprep.subr.bf16.mxu1 %v5310_v45  ;;  %718 = vmatprep.mubr.bf16.mxu1 %v5840_v0 }
  0x98   : > { %4801 = vmatpush3.bf16.msra.mxu1 %v5310_v45 }
  0x99   : > { %4802 = vmatprep.subr.bf16.mxu1 %v5313_v46 }
  0x9b   : > { %599 = vmatmul.mubr.bf16.gmra.mxu0 %v5311_v47  ;;  %719 = vmatmul.mubr.bf16.gmra.mxu1 %v5312_v48 }
  0x9c   : > { %4803 = vmatpush3.bf16.msra.mxu1 %v5313_v46  ;;  %608 = vmatprep.mubr.bf16.mxu0 %v5840_v0 }
  0x9d   : > { %4804 = vmatprep.subr.bf16.mxu1 %v5314_v49  ;;  %4806 = vmatprep.mubr.bf16.mxu1 %v5299_v35 }
  0xa0   : > { %4805 = vmatpush3.bf16.msra.mxu1 %v5314_v49 }
  0xa3   : > { %609 = vmatmul.mubr.bf16.gmra.mxu0 %v5315_v50  ;;  %4807 = vmatmul.mubr.bf16.vlgmr.msra.gmra.mxu1 %v5303_v39 }
  0xa4   : > { %618 = vmatprep.mubr.bf16.mxu0 %v5840_v0  ;;  %4810 = vmatprep.mubr.bf16.mxu1 %v5307_v43 }
  0xab   : > { %619 = vmatmul.mubr.bf16.gmra.mxu0 %v5316_v51  ;;  %4811 = vmatmul.mubr.bf16.gmra.mxu1 %v5311_v47 }
  0xac   : > { %628 = vmatprep.mubr.bf16.mxu0 %v5840_v0  ;;  %4814 = vmatprep.mubr.bf16.mxu1 %v5315_v50 }
  0xb3   : > { %629 = vmatmul.mubr.bf16.gmra.mxu0 %v5317_v52  ;;  %4815 = vmatmul.mubr.bf16.gmra.mxu1 %v5316_v51 }
  0xb4   : > { %638 = vmatprep.mubr.bf16.mxu0 %v5840_v0  ;;  %4818 = vmatprep.mubr.bf16.mxu1 %v5317_v52 }
  0xbb   : > { %639 = vmatmul.mubr.bf16.gmra.mxu0 %v5318_v53  ;;  %4819 = vmatmul.mubr.bf16.gmra.mxu1 %v5318_v53 }
  0xbc   : > { %648 = vmatprep.mubr.bf16.mxu0 %v5840_v0  ;;  %4822 = vmatprep.mubr.bf16.mxu1 %v5319_v54 }
  0xc3   : > { %649 = vmatmul.mubr.bf16.gmra.mxu0 %v5319_v54  ;;  %4823 = vmatmul.mubr.bf16.gmra.mxu1 %v5320_v55 }
  0xc4   : > { %658 = vmatprep.mubr.bf16.mxu0 %v5840_v0  ;;  %4826 = vmatprep.mubr.bf16.mxu1 %v5321_v56 }
  0xcb   : > { %659 = vmatmul.mubr.bf16.gmra.mxu0 %v5320_v55  ;;  %4827 = vmatmul.mubr.bf16.gmra.mxu1 %v5322_v57 }
  0xcc   : > { %668 = vmatprep.mubr.bf16.mxu0 %v5840_v0  ;;  %4830 = vmatprep.mubr.bf16.mxu1 %v6061_v36 }
  0xd3   : > { %669 = vmatmul.mubr.bf16.gmra.mxu0 %v5321_v56  ;;  %4831 = vmatmul.mubr.bf16.gmra.mxu1 %v6068_v40 }
  0xd4   : > { %678 = vmatprep.mubr.bf16.mxu0 %v5840_v0  ;;  %4834 = vmatprep.mubr.bf16.mxu1 %v5308_v44 }
  0xdb   : > { %679 = vmatmul.mubr.bf16.gmra.mxu0 %v5322_v57  ;;  %4835 = vmatmul.mubr.bf16.gmra.mxu1 %v5312_v48 }
 0x143   : > { %v570_v58 = vpop.f32.mrf.mxu0  ;;  %v690_v59 = vpop.f32.mrf.mxu1 }
 0x145   : > { %v572_v60 = vpop.f32.mrf.mxu0  ;;  %v692_v61 = vpop.f32.mrf.mxu1 }
 0x146   : > { %v4556_v62 = vpack.c.bf16 %v572_v60, %v570_v58  ;;  %v4604_v63 = vpack.c.bf16 %v692_v61, %v690_v59 }
 0x147   : > { %v574_v18 = vpop.f32.mrf.mxu0  ;;  %v694_v19 = vpop.f32.mrf.mxu1 }
 0x148   : > { %1210 = vst [vmem:[#allocation2] sm:$0xff] %v4556_v62  ;;  %1258 = vst [vmem:[#allocation2 + $0x120] sm:$0xff] %v4604_v63 }
 0x149   : > { %v576_v20 = vpop.f32.mrf.mxu0  ;;  %v696_v21 = vpop.f32.mrf.mxu1 }
 0x14a   : > { %v4558_v22 = vpack.c.bf16 %v576_v20, %v574_v18  ;;  %v4606_v23 = vpack.c.bf16 %v696_v21, %v694_v19 }
 0x14b   : > { %v580_v24 = vpop.f32.mrf.mxu0  ;;  %v700_v25 = vpop.f32.mrf.mxu1 }
 0x14c   : > { %1212 = vst [vmem:[#allocation2 + $0xc] sm:$0xff] %v4558_v22  ;;  %1260 = vst [vmem:[#allocation2 + $0x12c] sm:$0xff] %v4606_v23 }
 0x14d   : > { %v582_v0 = vpop.f32.mrf.mxu0  ;;  %v702_v26 = vpop.f32.mrf.mxu1 }
 0x14e   : > { %v4560_v27 = vpack.c.bf16 %v582_v0, %v580_v24  ;;  %v4608_v28 = vpack.c.bf16 %v702_v26, %v700_v25 }
 0x14f   : > { %v584_v29 = vpop.f32.mrf.mxu0  ;;  %v704_v30 = vpop.f32.mrf.mxu1 }
 0x150   : > { %1214 = vst [vmem:[#allocation2 + $0x18] sm:$0xff] %v4560_v27  ;;  %1262 = vst [vmem:[#allocation2 + $0x138] sm:$0xff] %v4608_v28 }
 0x151   : > { %v586_v31 = vpop.f32.mrf.mxu0  ;;  %v706_v32 = vpop.f32.mrf.mxu1 }
 0x152   : > { %v4562_v33 = vpack.c.bf16 %v586_v31, %v584_v29  ;;  %v4610_v34 = vpack.c.bf16 %v706_v32, %v704_v30 }
 0x153   : > { %v590_v35 = vpop.f32.mrf.mxu0  ;;  %v710_v36 = vpop.f32.mrf.mxu1 }
 0x154   : > { %1216 = vst [vmem:[#allocation2 + $0x24] sm:$0xff] %v4562_v33  ;;  %1264 = vst [vmem:[#allocation2 + $0x144] sm:$0xff] %v4610_v34 }
 0x155   : > { %v592_v37 = vpop.f32.mrf.mxu0  ;;  %v712_v38 = vpop.f32.mrf.mxu1 }
 0x156   : > { %v4564_v39 = vpack.c.bf16 %v592_v37, %v590_v35  ;;  %v4612_v40 = vpack.c.bf16 %v712_v38, %v710_v36 }
 0x157   : > { %v594_v41 = vpop.f32.mrf.mxu0  ;;  %v714_v42 = vpop.f32.mrf.mxu1 }
 0x158   : > { %1218 = vst [vmem:[#allocation2 + $0x30] sm:$0xff] %v4564_v39  ;;  %1266 = vst [vmem:[#allocation2 + $0x150] sm:$0xff] %v4612_v40 }
 0x159   : > { %v596_v43 = vpop.f32.mrf.mxu0  ;;  %v716_v44 = vpop.f32.mrf.mxu1 }
 0x15a   : > { %v4566_v45 = vpack.c.bf16 %v596_v43, %v594_v41  ;;  %v4614_v46 = vpack.c.bf16 %v716_v44, %v714_v42 }
 0x15b   : > { %v600_v47 = vpop.f32.mrf.mxu0  ;;  %v720_v48 = vpop.f32.mrf.mxu1 }
 0x15c   : > { %1220 = vst [vmem:[#allocation2 + $0x3c] sm:$0xff] %v4566_v45  ;;  %1268 = vst [vmem:[#allocation2 + $0x15c] sm:$0xff] %v4614_v46 }
 0x15d   : > { %v602_v49 = vpop.f32.mrf.mxu0  ;;  %v722_v50 = vpop.f32.mrf.mxu1 }
 0x15e   : > { %v4568_v51 = vpack.c.bf16 %v602_v49, %v600_v47  ;;  %v4616_v52 = vpack.c.bf16 %v722_v50, %v720_v48 }
 0x15f   : > { %v604_v53 = vpop.f32.mrf.mxu0  ;;  %v724_v54 = vpop.f32.mrf.mxu1 }
 0x160   : > { %1222 = vst [vmem:[#allocation2 + $0x48] sm:$0xff] %v4568_v51  ;;  %1270 = vst [vmem:[#allocation2 + $0x168] sm:$0xff] %v4616_v52 }
 0x161   : > { %v606_v55 = vpop.f32.mrf.mxu0  ;;  %v726_v56 = vpop.f32.mrf.mxu1 }
 0x162   : > { %v4570_v57 = vpack.c.bf16 %v606_v55, %v604_v53  ;;  %v4618_v58 = vpack.c.bf16 %v726_v56, %v724_v54 }
 0x163   : > { %v610_v59 = vpop.f32.mrf.mxu0  ;;  %v4808_v60 = vpop.f32.mrf.mxu1 }
 0x164   : > { %1224 = vst [vmem:[#allocation2 + $0x54] sm:$0xff] %v4570_v57  ;;  %1272 = vst [vmem:[#allocation2 + $0x174] sm:$0xff] %v4618_v58  ;;  %v4561_v61 = vpack.c.bf16 %v4808_v60, %v4808_v60 }
 0x165   : > { %v612_v62 = vpop.f32.mrf.mxu0  ;;  %v763_v63 = vpop.f32.mrf.mxu1 }
 0x166   : > { %1215 = vst [vmem:[#allocation2 + $0x20] sm:$0xf] %v4561_v61  ;;  %v4572_v18 = vpack.c.bf16 %v612_v62, %v610_v59  ;;  %v4557_v19 = vpack.c.bf16 %v763_v63, %v763_v63 }
 0x167   : > { %v614_v20 = vpop.f32.mrf.mxu0  ;;  %v4809_v21 = vpop.f32.mrf.mxu1 }
 0x168   : > { %1226 = vst [vmem:[#allocation2 + $0x60] sm:$0xff] %v4572_v18  ;;  %1211 = vst [vmem:[#allocation2 + $0x8] sm:$0xf] %v4557_v19  ;;  %v4563_v22 = vpack.c.bf16 %v4809_v21, %v4809_v21 }
 0x169   : > { %v616_v23 = vpop.f32.mrf.mxu0  ;;  %v766_v24 = vpop.f32.mrf.mxu1 }
 0x16a   : > { %1217 = vst [vmem:[#allocation2 + $0x2c] sm:$0xf] %v4563_v22  ;;  %v4574_v25 = vpack.c.bf16 %v616_v23, %v614_v20  ;;  %v4559_v0 = vpack.c.bf16 %v766_v24, %v766_v24 }
 0x16b   : > { %v620_v26 = vpop.f32.mrf.mxu0  ;;  %v4812_v27 = vpop.f32.mrf.mxu1 }
 0x16c   : > { %1228 = vst [vmem:[#allocation2 + $0x6c] sm:$0xff] %v4574_v25  ;;  %1213 = vst [vmem:[#allocation2 + $0x14] sm:$0xf] %v4559_v0  ;;  %v4569_v28 = vpack.c.bf16 %v4812_v27, %v4812_v27 }
 0x16d   : > { %v622_v29 = vpop.f32.mrf.mxu0  ;;  %v779_v30 = vpop.f32.mrf.mxu1 }
 0x16e   : > { %1223 = vst [vmem:[#allocation2 + $0x50] sm:$0xf] %v4569_v28  ;;  %v4576_v31 = vpack.c.bf16 %v622_v29, %v620_v26  ;;  %v4565_v32 = vpack.c.bf16 %v779_v30, %v779_v30 }
 0x16f   : > { %v624_v33 = vpop.f32.mrf.mxu0  ;;  %v4813_v34 = vpop.f32.mrf.mxu1 }
 0x170   : > { %1230 = vst [vmem:[#allocation2 + $0x78] sm:$0xff] %v4576_v31  ;;  %1219 = vst [vmem:[#allocation2 + $0x38] sm:$0xf] %v4565_v32  ;;  %v4571_v35 = vpack.c.bf16 %v4813_v34, %v4813_v34 }
 0x171   : > { %v626_v36 = vpop.f32.mrf.mxu0  ;;  %v782_v37 = vpop.f32.mrf.mxu1 }
 0x172   : > { %1225 = vst [vmem:[#allocation2 + $0x5c] sm:$0xf] %v4571_v35  ;;  %v4578_v38 = vpack.c.bf16 %v626_v36, %v624_v33  ;;  %v4567_v39 = vpack.c.bf16 %v782_v37, %v782_v37 }
 0x173   : > { %v630_v40 = vpop.f32.mrf.mxu0  ;;  %v4816_v41 = vpop.f32.mrf.mxu1 }
 0x174   : > { %1232 = vst [vmem:[#allocation2 + $0x84] sm:$0xff] %v4578_v38  ;;  %1221 = vst [vmem:[#allocation2 + $0x44] sm:$0xf] %v4567_v39  ;;  %v4577_v42 = vpack.c.bf16 %v4816_v41, %v4816_v41 }
 0x175   : > { %v632_v43 = vpop.f32.mrf.mxu0  ;;  %v795_v44 = vpop.f32.mrf.mxu1 }
 0x176   : > { %1231 = vst [vmem:[#allocation2 + $0x80] sm:$0xf] %v4577_v42  ;;  %v4580_v45 = vpack.c.bf16 %v632_v43, %v630_v40  ;;  %v4573_v46 = vpack.c.bf16 %v795_v44, %v795_v44 }
 0x177   : > { %v634_v47 = vpop.f32.mrf.mxu0  ;;  %v4817_v48 = vpop.f32.mrf.mxu1 }
 0x178   : > { %1234 = vst [vmem:[#allocation2 + $0x90] sm:$0xff] %v4580_v45  ;;  %1227 = vst [vmem:[#allocation2 + $0x68] sm:$0xf] %v4573_v46  ;;  %v4579_v49 = vpack.c.bf16 %v4817_v48, %v4817_v48 }
 0x179   : > { %v636_v50 = vpop.f32.mrf.mxu0  ;;  %v798_v51 = vpop.f32.mrf.mxu1 }
 0x17a   : > { %1233 = vst [vmem:[#allocation2 + $0x8c] sm:$0xf] %v4579_v49  ;;  %v4582_v52 = vpack.c.bf16 %v636_v50, %v634_v47  ;;  %v4575_v53 = vpack.c.bf16 %v798_v51, %v798_v51 }
 0x17b   : > { %v640_v54 = vpop.f32.mrf.mxu0  ;;  %v4820_v55 = vpop.f32.mrf.mxu1 }
 0x17c   : > { %1236 = vst [vmem:[#allocation2 + $0x9c] sm:$0xff] %v4582_v52  ;;  %1229 = vst [vmem:[#allocation2 + $0x74] sm:$0xf] %v4575_v53  ;;  %v4585_v56 = vpack.c.bf16 %v4820_v55, %v4820_v55 }
 0x17d   : > { %v642_v57 = vpop.f32.mrf.mxu0  ;;  %v811_v58 = vpop.f32.mrf.mxu1 }
 0x17e   : > { %1239 = vst [vmem:[#allocation2 + $0xb0] sm:$0xf] %v4585_v56  ;;  %v4584_v59 = vpack.c.bf16 %v642_v57, %v640_v54  ;;  %v4581_v60 = vpack.c.bf16 %v811_v58, %v811_v58 }
 0x17f   : > { %v644_v61 = vpop.f32.mrf.mxu0  ;;  %v4821_v62 = vpop.f32.mrf.mxu1 }
 0x180   : > { %1238 = vst [vmem:[#allocation2 + $0xa8] sm:$0xff] %v4584_v59  ;;  %1235 = vst [vmem:[#allocation2 + $0x98] sm:$0xf] %v4581_v60  ;;  %v4587_v63 = vpack.c.bf16 %v4821_v62, %v4821_v62 }
 0x181   : > { %v646_v18 = vpop.f32.mrf.mxu0  ;;  %v814_v19 = vpop.f32.mrf.mxu1 }
 0x182   : > { %1241 = vst [vmem:[#allocation2 + $0xbc] sm:$0xf] %v4587_v63  ;;  %v4586_v20 = vpack.c.bf16 %v646_v18, %v644_v61  ;;  %v4583_v21 = vpack.c.bf16 %v814_v19, %v814_v19 }
 0x183   : > { %v650_v22 = vpop.f32.mrf.mxu0  ;;  %v4824_v23 = vpop.f32.mrf.mxu1 }
 0x184   : > { %1240 = vst [vmem:[#allocation2 + $0xb4] sm:$0xff] %v4586_v20  ;;  %1237 = vst [vmem:[#allocation2 + $0xa4] sm:$0xf] %v4583_v21  ;;  %v4593_v24 = vpack.c.bf16 %v4824_v23, %v4824_v23 }
 0x185   : > { %v652_v25 = vpop.f32.mrf.mxu0  ;;  %v827_v0 = vpop.f32.mrf.mxu1 }
 0x186   : > { %1247 = vst [vmem:[#allocation2 + $0xe0] sm:$0xf] %v4593_v24  ;;  %v4588_v26 = vpack.c.bf16 %v652_v25, %v650_v22  ;;  %v4589_v27 = vpack.c.bf16 %v827_v0, %v827_v0 }
 0x187   : > { %v654_v28 = vpop.f32.mrf.mxu0  ;;  %v4825_v29 = vpop.f32.mrf.mxu1 }
 0x188   : > { %1242 = vst [vmem:[#allocation2 + $0xc0] sm:$0xff] %v4588_v26  ;;  %1243 = vst [vmem:[#allocation2 + $0xc8] sm:$0xf] %v4589_v27  ;;  %v4595_v30 = vpack.c.bf16 %v4825_v29, %v4825_v29 }
 0x189   : > { %v656_v31 = vpop.f32.mrf.mxu0  ;;  %v830_v32 = vpop.f32.mrf.mxu1 }
 0x18a   : > { %1249 = vst [vmem:[#allocation2 + $0xec] sm:$0xf] %v4595_v30  ;;  %v4590_v33 = vpack.c.bf16 %v656_v31, %v654_v28  ;;  %v4591_v34 = vpack.c.bf16 %v830_v32, %v830_v32 }
 0x18b   : > { %v660_v35 = vpop.f32.mrf.mxu0  ;;  %v4828_v36 = vpop.f32.mrf.mxu1 }
 0x18c   : > { %1244 = vst [vmem:[#allocation2 + $0xcc] sm:$0xff] %v4590_v33  ;;  %1245 = vst [vmem:[#allocation2 + $0xd4] sm:$0xf] %v4591_v34  ;;  %v4601_v37 = vpack.c.bf16 %v4828_v36, %v4828_v36 }
 0x18d   : > { %v662_v38 = vpop.f32.mrf.mxu0  ;;  %v843_v39 = vpop.f32.mrf.mxu1 }
 0x18e   : > { %1255 = vst [vmem:[#allocation2 + $0x110] sm:$0xf] %v4601_v37  ;;  %v4592_v40 = vpack.c.bf16 %v662_v38, %v660_v35  ;;  %v4597_v41 = vpack.c.bf16 %v843_v39, %v843_v39 }
 0x18f   : > { %v664_v42 = vpop.f32.mrf.mxu0  ;;  %v4829_v43 = vpop.f32.mrf.mxu1 }
 0x190   : > { %1246 = vst [vmem:[#allocation2 + $0xd8] sm:$0xff] %v4592_v40  ;;  %1251 = vst [vmem:[#allocation2 + $0xf8] sm:$0xf] %v4597_v41  ;;  %v4603_v44 = vpack.c.bf16 %v4829_v43, %v4829_v43 }
 0x191   : > { %v666_v45 = vpop.f32.mrf.mxu0  ;;  %v846_v46 = vpop.f32.mrf.mxu1 }
 0x192   : > { %1257 = vst [vmem:[#allocation2 + $0x11c] sm:$0xf] %v4603_v44  ;;  %v4594_v47 = vpack.c.bf16 %v666_v45, %v664_v42  ;;  %v4599_v48 = vpack.c.bf16 %v846_v46, %v846_v46 }
 0x193   : > { %v670_v49 = vpop.f32.mrf.mxu0  ;;  %v4832_v50 = vpop.f32.mrf.mxu1 }
 0x194   : > { %1248 = vst [vmem:[#allocation2 + $0xe4] sm:$0xff] %v4594_v47  ;;  %1253 = vst [vmem:[#allocation2 + $0x104] sm:$0xf] %v4599_v48  ;;  %v4609_v51 = vpack.c.bf16 %v4832_v50, %v4832_v50 }
 0x195   : > { %v672_v52 = vpop.f32.mrf.mxu0  ;;  %v859_v53 = vpop.f32.mrf.mxu1 }
 0x196   : > { %1263 = vst [vmem:[#allocation2 + $0x140] sm:$0xf] %v4609_v51  ;;  %v4596_v54 = vpack.c.bf16 %v672_v52, %v670_v49  ;;  %v4605_v55 = vpack.c.bf16 %v859_v53, %v859_v53 }
 0x197   : > { %v674_v56 = vpop.f32.mrf.mxu0  ;;  %v4833_v57 = vpop.f32.mrf.mxu1 }
 0x198   : > { %1250 = vst [vmem:[#allocation2 + $0xf0] sm:$0xff] %v4596_v54  ;;  %1259 = vst [vmem:[#allocation2 + $0x128] sm:$0xf] %v4605_v55  ;;  %v4611_v58 = vpack.c.bf16 %v4833_v57, %v4833_v57 }
 0x199   : > { %v676_v59 = vpop.f32.mrf.mxu0  ;;  %v862_v60 = vpop.f32.mrf.mxu1 }
 0x19a   : > { %1265 = vst [vmem:[#allocation2 + $0x14c] sm:$0xf] %v4611_v58  ;;  %v4598_v61 = vpack.c.bf16 %v676_v59, %v674_v56  ;;  %v4607_v62 = vpack.c.bf16 %v862_v60, %v862_v60 }
 0x19b   : > { %v680_v63 = vpop.f32.mrf.mxu0  ;;  %v4836_v18 = vpop.f32.mrf.mxu1 }
 0x19c   : > { %1252 = vst [vmem:[#allocation2 + $0xfc] sm:$0xff] %v4598_v61  ;;  %1261 = vst [vmem:[#allocation2 + $0x134] sm:$0xf] %v4607_v62  ;;  %v4617_v19 = vpack.c.bf16 %v4836_v18, %v4836_v18 }
 0x19d   : > { %v682_v20 = vpop.f32.mrf.mxu0  ;;  %v875_v21 = vpop.f32.mrf.mxu1 }
 0x19e   : > { %1271 = vst [vmem:[#allocation2 + $0x170] sm:$0xf] %v4617_v19  ;;  %v4600_v22 = vpack.c.bf16 %v682_v20, %v680_v63  ;;  %v4613_v23 = vpack.c.bf16 %v875_v21, %v875_v21 }
 0x19f   : > { %v684_v24 = vpop.f32.mrf.mxu0  ;;  %v4837_v25 = vpop.f32.mrf.mxu1 }
 0x1a0   : > { %1254 = vst [vmem:[#allocation2 + $0x108] sm:$0xff] %v4600_v22  ;;  %1267 = vst [vmem:[#allocation2 + $0x158] sm:$0xf] %v4613_v23  ;;  %v4619_v0 = vpack.c.bf16 %v4837_v25, %v4837_v25 }
 0x1a1   : > { %v686_v26 = vpop.f32.mrf.mxu0  ;;  %v878_v27 = vpop.f32.mrf.mxu1 }
 0x1a2   : > { %1273 = vst [vmem:[#allocation2 + $0x17c] sm:$0xf] %v4619_v0  ;;  %v4602_v28 = vpack.c.bf16 %v686_v26, %v684_v24  ;;  %v4615_v29 = vpack.c.bf16 %v878_v27, %v878_v27 }
 0x1a4   : > { %1256 = vst [vmem:[#allocation2 + $0x114] sm:$0xff] %v4602_v28  ;;  %1269 = vst [vmem:[#allocation2 + $0x164] sm:$0xf] %v4615_v29 }
 0x1a5 LB: >> { %s4412_s7 = sshll.u32 %s5831_s5, 7  ;;  %vm1437_vm0 = vcmask 261120   ;;  %s5841_s26 = smov 96   ;;  %vm2578_vm1 = vcmask 523520   ;;  %vm3277_vm2 = vcmask 785920   ;;  %vm3976_vm3 = vcmask 1048320   ;;  %s5831_s5 = sphi %s6101_s5, %s1302_s5  }
 0x1a6   : >> { %s1304_s8 = sshra.s32 %s4412_s7, 3  ;;  %s5842_s30 = smov 64  }
 0x1a7   : >> { %s4620_s11 = smul.u32 12, %s1304_s8  ;;  %s5843_s6 = smov 32  }
 0x1a8   : >> { %s7252_s14 = scalar_lea.vmem %s6099_s10, %s4412_s7 [#allocation10]  ;;  %s1302_s5 = sadd.s32 1, %s5831_s5  }
 0x1a9   : >> { %s6109_s29 = scalar_lea.vmem [#allocation2], %s4620_s11  ;;  %p1299_p11 = scmp.ge.s32.totalorder %s1302_s5, 2  }
 0x1aa   : > { %s4621_s20 = sshll.u32 (%p1299_p11), %s5893_s19, 12  ;;  %s4193_s21 = sshll.u32 (%p1299_p11), %s6099_s10, 4  ;;  %s7296_s21 = int_to_ptr.vmem [resolvable:$true] %s4193_s21 }
 0x1ab   : >> { %v5323_v30 = vld [vmem:[%s6109_s29 + $0xac] ss:$12 sps:$4 sm:$0xff]   ;;  %v5324_v31 = vld [vmem:[%s6109_s29 + $0x94] ss:$12 sps:$4 sm:$0xff]   ;;  %v5325_v34 = vld [vmem:[%s6109_s29 + $0x7c] ss:$12 sps:$4 sm:$0xff]   ;;  %s7293_s23 = scalar_lea.hbm (%p1299_p11), %s7343_s4, %s4621_s20 }
 0x1ac   : >> { %5158 = vmatprep.subr.msk.bf16.mxu0 %vm1437_vm0, %v5323_v30  ;;  %v1484_v32 = vsel %vm1437_vm0, %v5323_v30, 0  ;;  %v1481_v33 = vsel %vm1437_vm0, %v5324_v31, 0  ;;  %v5326_v35 = vld [vmem:[%s6109_s29 + $0x64] ss:$12 sps:$4 sm:$0xff]   ;;  %v5327_v36 = vld [vmem:[%s6109_s29 + $0x4c] ss:$12 sps:$4 sm:$0xff]  }
 0x1ad   : >> { %4839 = vmatpush3.bf16.xpose.msra.mxu0 %v1484_v32  ;;  %v5331_v37 = vld [vmem:[%s6109_s29] ss:$12 sps:$4 sm:$0xff]   ;;  %v5329_v39 = vld [vmem:[%s6109_s29 + $0x1c] ss:$12 sps:$4 sm:$0xff]   ;;  %v5330_v40 = vld [vmem:[%s6109_s29 + $0x4] ss:$12 sps:$4 sm:$0xff]  }
 0x1ae   : >> { %5159 = vmatprep.subr.msk.bf16.mxu0 %vm1437_vm0, %v5324_v31  ;;  %v5328_v38 = vld [vmem:[%s6109_s29 + $0x34] ss:$12 sps:$4 sm:$0xff]   ;;  %4854 = vmatprep.mubr.msk.bf16.mxu0 %vm1437_vm0, %v5331_v37  ;;  %v1478_v41 = vsel %vm1437_vm0, %v5325_v34, 0  ;;  %v1475_v42 = vsel %vm1437_vm0, %v5326_v35, 0  ;;  %v1472_v43 = vsel %vm1437_vm0, %v5327_v36, 0  ;;  %v1466_v45 = vsel %vm1437_vm0, %v5329_v39, 0 }
 0x1af   : >> { %v1469_v44 = vsel %vm1437_vm0, %v5328_v38, 0  ;;  %v1463_v46 = vsel %vm1437_vm0, %v5330_v40, 0  ;;  %v5339_v47 = vld [vmem:[%s6109_s29 + $0x94] ss:$12 sps:$4 sm:$0xff]   ;;  %v5340_v48 = vld [vmem:[%s6109_s29 + $0xac] ss:$12 sps:$4 sm:$0xff]  }
 0x1b0   : >> { %2052 = vrot.lane.b32.xlu1 %v5339_v47, %s5841_s26  ;;  %v5341_v49 = vld [vmem:[%s6109_s29 + $0x7c] ss:$12 sps:$4 sm:$0xff]   ;;  %2054 = vrot.lane.b32.xlu0 %v5340_v48, %s5841_s26  ;;  %v5332_v50 = vld [vmem:[%s6109_s29 + $0x18] ss:$12 sps:$4 sm:$0xff]   ;;  %s4180_s9 = scalar_lea.sflag (%p1299_p11), [#allocation6], %s6005_s12  ;;  %s5755_s7 = scalar_lea.vmem (%p1299_p11), %s7296_s21, 4096 }
 0x1b1   : >> { %v5333_v51 = vld [vmem:[%s6109_s29 + $0x30] ss:$12 sps:$4 sm:$0xff]   ;;  %v5334_v52 = vld [vmem:[%s6109_s29 + $0x48] ss:$12 sps:$4 sm:$0xff]   ;;  %v5335_v53 = vld [vmem:[%s6109_s29 + $0x60] ss:$12 sps:$4 sm:$0xff]   ;;  %p5756_p10 = scmp.ne.s32.totalorder (%p1299_p11), %s7296_s21, %s5755_s7 }
 0x1b2   : >> { %v5336_v54 = vld [vmem:[%s6109_s29 + $0x78] ss:$12 sps:$4 sm:$0xff]   ;;  %v5337_v55 = vld [vmem:[%s6109_s29 + $0x90] ss:$12 sps:$4 sm:$0xff]   ;;  %v5338_v56 = vld [vmem:[%s6109_s29 + $0xa8] ss:$12 sps:$4 sm:$0xff]  }
 0x1b3   : >> { %v5343_v57 = vld [vmem:[%s6109_s29 + $0xb0] ss:$12 sps:$4 sm:$0xff]   ;;  %v5344_v58 = vld [vmem:[%s6109_s29 + $0x98] ss:$12 sps:$4 sm:$0xff]   ;;  %v5345_v59 = vld [vmem:[%s6109_s29 + $0x80] ss:$12 sps:$4 sm:$0xff]  }
 0x1b4   : >> { %2050 = vrot.lane.b32.xlu0 %v5341_v49, %s5841_s26  ;;  %4870 = vmatprep.subr.bf16.mxu1 %v5343_v57  ;;  %v5346_v60 = vld [vmem:[%s6109_s29 + $0x68] ss:$12 sps:$4 sm:$0xff]   ;;  %v5347_v61 = vld [vmem:[%s6109_s29 + $0x50] ss:$12 sps:$4 sm:$0xff]   ;;  %v5348_v62 = vld [vmem:[%s6109_s29 + $0x38] ss:$12 sps:$4 sm:$0xff]  }
 0x1b5   : >> { %4841 = vmatpush3.bf16.xpose.msra.mxu0 %v1481_v33  ;;  %4871 = vmatpush3.bf16.msra.mxu1 %v5343_v57  ;;  %v5349_v63 = vld [vmem:[%s6109_s29 + $0x20] ss:$12 sps:$4 sm:$0xff]   ;;  %v5350_v18 = vld [vmem:[%s6109_s29 + $0x8] ss:$12 sps:$4 sm:$0xff]   ;;  %v5342_v31 = vld [vmem:[%s6109_s29 + $0x64] ss:$12 sps:$4 sm:$0xff]  }
 0x1b6   : >> { %5160 = vmatprep.subr.msk.bf16.mxu0 %vm1437_vm0, %v5325_v34  ;;  %4872 = vmatprep.subr.bf16.mxu1 %v5344_v58  ;;  %v5356_v37 = vld [vmem:[%s6109_s29 + $0x18] ss:$12 sps:$4 sm:$0xff]   ;;  %v5361_v47 = vld [vmem:[%s6109_s29 + $0x90] ss:$12 sps:$4 sm:$0xff]   ;;  %v5376_v2 = vld [vmem:[%s6109_s29 + $0x34] ss:$12 sps:$4 sm:$0xff]  }
 0x1b7   : >> { %v5382_v3 = vld [vmem:[%s6109_s29 + $0x48] ss:$12 sps:$4 sm:$0xff]   ;;  %v5384_v4 = vld [vmem:[%s6109_s29 + $0x78] ss:$12 sps:$4 sm:$0xff]   ;;  %v5385_v10 = vld [vmem:[%s6109_s29 + $0x90] ss:$12 sps:$4 sm:$0xff]  }
 0x1b8   : >> { %v5386_v5 = vld [vmem:[%s6109_s29 + $0xa8] ss:$12 sps:$4 sm:$0xff]   ;;  %v5378_v6 = vld [vmem:[%s6109_s29 + $0x4] ss:$12 sps:$4 sm:$0xff]   ;;  %p7495_p1 = scmp.ne.s32.totalorder (%p1299_p11), %s7357_s25, 0  ;;  %s5844_s5 = smov (%p1299_p11), [#allocation10]  }
 0x1b9   : >> { %4873 = vmatpush3.bf16.msra.mxu1 %v5344_v58  ;;  %v5380_v7 = vld [vmem:[%s6109_s29 + $0x18] ss:$12 sps:$4 sm:$0xff]   ;;  %s5759_s8 = sshll.u32 (%p1299_p11), %s5844_s5, 4  ;;  %s5760_s8 = int_to_ptr.vmem [resolvable:$false] %s5759_s8 }
 0x1ba   : >> { %4874 = vmatprep.subr.bf16.mxu1 %v5345_v59  ;;  %p5757_p2 = pnand (%p1299_p11), %p5756_p10, %p7495_p1  ;;  %s5761_s19 = scalar_lea.vmem (%p1299_p11), %s5760_s8, 8192 }
 0x1bb   : > { %p5762_p12 = scmp.lt.s32.totalorder (%p1299_p11), %s7296_s21, %s5760_s8  ;;  %p5763_p3 = scmp.lt.s32.totalorder (%p1299_p11), %s5761_s19, %s5755_s7 }
 0x1bc   : > { %p5758_p6 = pneg (%p1299_p11), %p5757_p2 }
 0x1bd   : >> { %4843 = vmatpush3.bf16.xpose.msra.mxu0 %v1478_v41  ;;  %4875 = vmatpush3.bf16.msra.mxu1 %v5345_v59  ;;  %v5352_v41 = vld [vmem:[%s6109_s29 + $0x34] ss:$12 sps:$4 sm:$0xff]   ;;  %p5764_p9 = por (%p1299_p11), %p5763_p3, %p5762_p12 }
 0x1be   : >> { %5161 = vmatprep.subr.msk.bf16.mxu0 %vm1437_vm0, %v5326_v35  ;;  %4876 = vmatprep.subr.bf16.mxu1 %v5346_v60 }
 0x1bf   : > { %p5765_p13 = pnand (%p1299_p11), %p5764_p9, %p5758_p6 }
 0x1c1   : >> { %4877 = vmatpush3.bf16.msra.mxu1 %v5346_v60 }
 0x1c2   : >> { %4878 = vmatprep.subr.bf16.mxu1 %v5347_v61 }
 0x1c5   : >> { %4845 = vmatpush3.bf16.xpose.msra.mxu0 %v1475_v42  ;;  %4879 = vmatpush3.bf16.msra.mxu1 %v5347_v61  ;;  %v5353_v42 = vld [vmem:[%s6109_s29 + $0x1c] ss:$12 sps:$4 sm:$0xff]  }
 0x1c6   : >> { %5162 = vmatprep.subr.msk.bf16.mxu0 %vm1437_vm0, %v5327_v36  ;;  %4880 = vmatprep.subr.bf16.mxu1 %v5348_v62  ;;  %v5351_v36 = vld [vmem:[%s6109_s29 + $0x4c] ss:$12 sps:$4 sm:$0xff]  }
 0x1c9   : >> { %4881 = vmatpush3.bf16.msra.mxu1 %v5348_v62 }
 0x1ca   : >> { %4882 = vmatprep.subr.bf16.mxu1 %v5349_v63 }
 0x1cd   : >> { %4847 = vmatpush3.bf16.xpose.msra.mxu0 %v1472_v43  ;;  %4883 = vmatpush3.bf16.msra.mxu1 %v5349_v63  ;;  %v5354_v43 = vld [vmem:[%s6109_s29 + $0x4] ss:$12 sps:$4 sm:$0xff]  }
 0x1ce   : >> { %5163 = vmatprep.subr.msk.bf16.mxu0 %vm1437_vm0, %v5328_v38  ;;  %4884 = vmatprep.subr.bf16.mxu1 %v5350_v18  ;;  %v5358_v38 = vld [vmem:[%s6109_s29 + $0x48] ss:$12 sps:$4 sm:$0xff]  }
 0x1d1   : >> { %4885 = vmatpush3.bf16.msra.mxu1 %v5350_v18 }
 0x1d5   : >> { %4849 = vmatpush3.bf16.xpose.msra.mxu0 %v1469_v44  ;;  %v5355_v44 = vld [vmem:[%s6109_s29] ss:$12 sps:$4 sm:$0xff]  }
 0x1d6   : >> { %5164 = vmatprep.subr.msk.bf16.mxu0 %vm1437_vm0, %v5329_v39  ;;  %v5360_v39 = vld [vmem:[%s6109_s29 + $0x78] ss:$12 sps:$4 sm:$0xff]  }
 0x1dd   : >> { %4851 = vmatpush3.bf16.xpose.msra.mxu0 %v1466_v45  ;;  %v5357_v45 = vld [vmem:[%s6109_s29 + $0x30] ss:$12 sps:$4 sm:$0xff]  }
 0x1de   : >> { %5165 = vmatprep.subr.msk.bf16.mxu0 %vm1437_vm0, %v5330_v40  ;;  %v5362_v40 = vld [vmem:[%s6109_s29 + $0xa8] ss:$12 sps:$4 sm:$0xff]  }
 0x1e5   : >> { %4853 = vmatpush3.bf16.xpose.msra.mxu0 %v1463_v46  ;;  %v5359_v46 = vld [vmem:[%s6109_s29 + $0x60] ss:$12 sps:$4 sm:$0xff]  }
 0x1ec   : >> { %4855 = vmatmul.mubr.msk.bf16.vlgmr.msra.gmra.mxu0 %vm1437_vm0, %v5332_v50 }
 0x1ed   : >> { %4858 = vmatprep.mubr.msk.bf16.mxu0 %vm1437_vm0, %v5333_v51 }
 0x1f4   : >> { %4859 = vmatmul.mubr.msk.bf16.gmra.mxu0 %vm1437_vm0, %v5334_v52 }
 0x1f5   : >> { %4862 = vmatprep.mubr.msk.bf16.mxu0 %vm1437_vm0, %v5335_v53 }
 0x1fc   : >> { %4863 = vmatmul.mubr.msk.bf16.gmra.mxu0 %vm1437_vm0, %v5336_v54 }
 0x1fd   : >> { %4866 = vmatprep.mubr.msk.bf16.mxu0 %vm1437_vm0, %v5337_v55 }
 0x204   : >> { %4867 = vmatmul.mubr.msk.bf16.gmra.mxu0 %vm1437_vm0, %v5338_v56 }
 0x222   : >> { %v6165_v19 = vpop.permute.xlu0 %2054  ;;  %v2053_v48 = vpop.permute.xlu1 %2052 }
 0x223   : >> { %5166 = vmatprep.subr.msk.bf16.mxu1 %vm1437_vm0, %v6165_v19 }
 0x226   : >> { %v2051_v49 = vpop.permute.xlu0 %2050 }
 0x2ac   : >> { %v6169_v20 = vpop.f32.mrf.mxu0 }
 0x2ad   : >> { %1587 = vmax.xlane.f32.xlu1 %v6169_v20 }
 0x2ae   : >> { %v6172_v21 = vpop.f32.mrf.mxu0 }
 0x2af   : >> { %1583 = vmax.xlane.f32.xlu0 %v6172_v21 }
 0x2b0   : >> { %v6175_v22 = vpop.f32.mrf.mxu0 }
 0x2b1   : >> { %1589 = vmax.xlane.f32.xlu1 %v6175_v22 }
 0x2b2   : >> { %v6178_v23 = vpop.f32.mrf.mxu0 }
 0x2b3   : >> { %1585 = vmax.xlane.f32.xlu0 %v6178_v23 }
 0x2b4   : >> { %v6181_v24 = vpop.f32.mrf.mxu0 }
 0x2b5   : >> { %1595 = vmax.xlane.f32.xlu1 %v6181_v24 }
 0x2b6   : >> { %v6184_v25 = vpop.f32.mrf.mxu0 }
 0x2b8   : >> { %v6186_v0 = vpop.f32.mrf.mxu0 }
 0x2b9   : >> { %1591 = vmax.xlane.f32.xlu1 %v6184_v25 }
 0x2ba   : >> { %v6189_v26 = vpop.f32.mrf.mxu0 }
 0x2bc   : >> { %v6191_v27 = vpop.f32.mrf.mxu0 }
 0x2bd   : >> { %1597 = vmax.xlane.f32.xlu1 %v6186_v0 }
 0x2be   : >> { %v6194_v28 = vpop.f32.mrf.mxu0 }
 0x2c0   : >> { %v6196_v29 = vpop.f32.mrf.mxu0 }
 0x2c1   : >> { %1593 = vmax.xlane.f32.xlu1 %v6189_v26 }
 0x2c2   : >> { %v6199_v30 = vpop.f32.mrf.mxu0 }
 0x2c4   : >> { %v6203_v32 = vpop.f32.mrf.mxu0 }
 0x2c5   : >> { %1601 = vmax.xlane.f32.xlu1 %v6199_v30 }
 0x2c6   : >> { %v6207_v33 = vpop.f32.mrf.mxu0 }
 0x2c8   : >> { %v6210_v34 = vpop.f32.mrf.mxu0 }
 0x2c9   : >> { %2048 = vrot.lane.b32.xlu0 %v5342_v31, %s5841_s26  ;;  %1611 = vmax.xlane.f32.xlu1 %v6203_v32 }
 0x2ca   : >> { %v6213_v35 = vpop.f32.mrf.mxu0 }
 0x2cd   : >> { %1607 = vmax.xlane.f32.xlu1 %v6207_v33 }
 0x2d1   : >> { %1613 = vmax.xlane.f32.xlu1 %v6210_v34 }
 0x2d5   : >> { %1609 = vmax.xlane.f32.xlu1 %v6213_v35 }
 0x2e6   : >> { %2046 = vrot.lane.b32.xlu1 %v5351_v36, %s5841_s26 }
 0x2e8   : >> { %1603 = vmax.xlane.f32.xlu0 %v6191_v27 }
 0x2ea   : >> { %1986 = vrot.lane.b32.xlu1 %v5356_v37, %s5841_s26 }
 0x2ec   : >> { %1599 = vmax.xlane.f32.xlu0 %v6194_v28 }
 0x2ee   : >> { %1990 = vrot.lane.b32.xlu1 %v5358_v38, %s5841_s26 }
 0x2f0   : >> { %1605 = vmax.xlane.f32.xlu0 %v6196_v29 }
 0x2f2   : >> { %1994 = vrot.lane.b32.xlu1 %v5360_v39, %s5841_s26 }
 0x2f6   : >> { %1998 = vrot.lane.b32.xlu1 %v5362_v40, %s5841_s26 }
 0x306   : >> { %2044 = vrot.lane.b32.xlu0 %v5352_v41, %s5841_s26 }
 0x30a   : >> { %2042 = vrot.lane.b32.xlu0 %v5353_v42, %s5841_s26 }
 0x30e   : >> { %2040 = vrot.lane.b32.xlu0 %v5354_v43, %s5841_s26 }
 0x312   : >> { %1984 = vrot.lane.b32.xlu0 %v5355_v44, %s5841_s26 }
 0x316   : >> { %1988 = vrot.lane.b32.xlu0 %v5357_v45, %s5841_s26 }
 0x31a   : >> { %1992 = vrot.lane.b32.xlu0 %v5359_v46, %s5841_s26 }
 0x31e   : >> { %1996 = vrot.lane.b32.xlu0 %v5361_v47, %s5841_s26  ;;  %v2099_v47 = vsel %vm1437_vm0, %v2053_v48, 0 }
 0x336   : >> { %v1588_v50 = vpop.xlane.xlu1 %1587 }
 0x337   : >> { %v1617_v53 = vsub.f32 %v6169_v20, %v1588_v50 }
 0x338   : >> { %v1584_v51 = vpop.xlane.xlu0 %1583 }
 0x339   : >> { %v1615_v52 = vsub.f32 %v6172_v21, %v1584_v51  ;;  %v1635_v60 = vmul.f32 1.442695, %v1617_v53 }
 0x33a   : >> { %v1590_v54 = vpop.xlane.xlu1 %1589 }
 0x33b   : >> { %v1631_v55 = vmul.f32 1.442695, %v1615_v52  ;;  %v1618_v56 = vsub.f32 %v6175_v22, %v1590_v54 }
 0x33c   : >> { %v1586_v57 = vpop.xlane.xlu0 %1585 }
 0x33d   : >> { %v1637_v58 = vmul.f32 1.442695, %v1618_v56  ;;  %v1616_v59 = vsub.f32 %v6178_v23, %v1586_v57  ;;  %5419 = vpow2.f32 %v1631_v55 }
 0x33e   : >> { %v1596_v61 = vpop.xlane.xlu1 %1595 }
 0x33f   : >> { %v1633_v62 = vmul.f32 1.442695, %v1616_v59  ;;  %5421 = vpow2.f32 %v1637_v58  ;;  %v1621_v31 = vsub.f32 %v6181_v24, %v1596_v61 }
 0x340   : >> { %v2049_v55 = vpop.permute.xlu0 %2048 }
 0x341   : >> { %5423 = vpow2.f32 %v1633_v62  ;;  %v1643_v39 = vmul.f32 1.442695, %v1621_v31  ;;  %v2093_v58 = vsel %vm1437_vm0, %v2049_v55, 0 }
 0x342   : >> { %5425 = vpow2.f32 %v1635_v60  ;;  %v1592_v63 = vpop.xlane.xlu1 %1591 }
 0x343   : >> { %v1619_v18 = vsub.f32 %v6184_v25, %v1592_v63 }
 0x345   : >> { %v1639_v22 = vmul.f32 1.442695, %v1619_v18 }
 0x346   : >> { %v1598_v21 = vpop.xlane.xlu1 %1597 }
 0x347   : >> { %v1622_v20 = vsub.f32 %v6186_v0, %v1598_v21  ;;  %5427 = vpow2.f32 %v1639_v22 }
 0x349   : >> { %v1645_v36 = vmul.f32 1.442695, %v1622_v20 }
 0x34a   : >> { %v1594_v37 = vpop.xlane.xlu1 %1593  ;;  %v6251_v38 = vpop.eup %5419 }
 0x34b   : >> { %v1620_v23 = vsub.f32 %v6189_v26, %v1594_v37  ;;  %5429 = vpow2.f32 %v1645_v36  ;;  %v2102_v26 = vsel %vm1437_vm0, %v6165_v19, 0 }
 0x34c   : >> { %v6253_v40 = vpop.eup %5421 }
 0x34d   : >> { %v1641_v41 = vmul.f32 1.442695, %v1620_v23 }
 0x34e   : >> { %v6255_v42 = vpop.eup %5423  ;;  %v1602_v25 = vpop.xlane.xlu1 %1601 }
 0x34f   : >> { %v6257_v43 = vpop.eup %5425  ;;  %5431 = vpow2.f32 %v1641_v41  ;;  %v1711_v24 = vpack.c.bf16 %v6255_v42, %v6251_v38  ;;  %v1624_v60 = vsub.f32 %v6199_v30, %v1602_v25 }
 0x350   : >> { %5433 = vpow2.f32 %v1643_v39  ;;  %v1712_v0 = vpack.c.bf16 %v6253_v40, %v6257_v43 }
 0x351   : >> { %4886 = vmatprep.mubr.bf16.mxu1 %v1711_v24 }
 0x352   : >> { %4887 = vmatmul.mubr.bf16.vlgmr.msra.gmra.mxu1 %v1712_v0  ;;  %v1612_v44 = vpop.xlane.xlu1 %1611 }
 0x353   : >> { %4903 = vmatpush3.bf16.xpose.msra.mxu1 %v2102_v26  ;;  %v1629_v41 = vsub.f32 %v6203_v32, %v1612_v44 }
 0x354   : >> { %5167 = vmatprep.subr.msk.bf16.mxu1 %vm1437_vm0, %v2053_v48  ;;  %v6266_v46 = vpop.eup %5427  ;;  %v2096_v48 = vsel %vm1437_vm0, %v2051_v49, 0 }
 0x355   : >> { %v1659_v24 = vmul.f32 1.442695, %v1629_v41 }
 0x356   : >> { %v1608_v45 = vpop.xlane.xlu1 %1607 }
 0x357   : >> { %v1627_v20 = vsub.f32 %v6207_v33, %v1608_v45 }
 0x358   : >> { %v6269_v50 = vpop.eup %5429 }
 0x359   : >> { %7380 = vst [vmem:[#allocation31_spill] sm:$0xff] %v6269_v50  ;;  %v1655_v23 = vmul.f32 1.442695, %v1627_v20  ;;  %v5366_v20 = vld [vmem:[%s6109_s29 + $0x68] ss:$12 sps:$4 sm:$0xff]  }
 0x35a   : >> { %v1614_v54 = vpop.xlane.xlu1 %1613 }
 0x35b   : >> { %4905 = vmatpush3.bf16.xpose.msra.mxu1 %v2099_v47  ;;  %v1630_v39 = vsub.f32 %v6210_v34, %v1614_v54 }
 0x35c   : >> { %v6271_v51 = vpop.eup %5431  ;;  %5168 = vmatprep.subr.msk.bf16.mxu1 %vm1437_vm0, %v2051_v49  ;;  %v1649_v49 = vmul.f32 1.442695, %v1624_v60 }
 0x35d   : >> { %v6274_v52 = vpop.eup %5433  ;;  %v1713_v19 = vpack.c.bf16 %v6271_v51, %v6266_v46  ;;  %v1661_v33 = vmul.f32 1.442695, %v1630_v39 }
 0x35e   : >> { %v1714_v53 = vpack.c.bf16 %v6269_v50, %v6274_v52  ;;  %v1610_v56 = vpop.xlane.xlu1 %1609  ;;  %5435 = vpow2.f32 %v1649_v49 }
 0x35f   : >> { %4890 = vmatprep.mubr.bf16.mxu1 %v1713_v19  ;;  %v1628_v62 = vsub.f32 %v6213_v35, %v1610_v56 }
 0x360   : >> { %4891 = vmatmul.mubr.bf16.gmra.mxu1 %v1714_v53 }
 0x361   : >> { %v1657_v31 = vmul.f32 1.442695, %v1628_v62  ;;  %v5363_v62 = vld [vmem:[%s6109_s29 + $0xb0] ss:$12 sps:$4 sm:$0xff]  }
 0x362   : >> { %v2047_v57 = vpop.permute.xlu1 %2046  ;;  %2391 = vrot.lane.b32.xlu0 %v5363_v62, %s5841_s26 }
 0x363   : >> { %4907 = vmatpush3.bf16.xpose.msra.mxu1 %v2096_v48  ;;  %v2090_v59 = vsel %vm1437_vm0, %v2047_v57, 0 }
 0x364   : >> { %5169 = vmatprep.subr.msk.bf16.mxu1 %vm1437_vm0, %v2049_v55 }
 0x36b   : >> { %4909 = vmatpush3.bf16.xpose.msra.mxu1 %v2093_v58  ;;  %v6297_v0 = vpop.eup %5435 }
 0x36c   : >> { %5170 = vmatprep.subr.msk.bf16.mxu1 %vm1437_vm0, %v2047_v57 }
 0x371   : >> { %v1604_v61 = vpop.xlane.xlu0 %1603 }
 0x372   : >> { %v1625_v63 = vsub.f32 %v6191_v27, %v1604_v61 }
 0x373   : >> { %4911 = vmatpush3.bf16.xpose.msra.mxu1 %v2090_v59  ;;  %v1987_v59 = vpop.permute.xlu1 %1986 }
 0x374   : >> { %v1651_v36 = vmul.f32 1.442695, %v1625_v63  ;;  %v5364_v63 = vld [vmem:[%s6109_s29 + $0x98] ss:$12 sps:$4 sm:$0xff]  }
 0x375   : >> { %v1600_v18 = vpop.xlane.xlu0 %1599  ;;  %2389 = vrot.lane.b32.xlu1 %v5364_v63, %s5841_s26 }
 0x376   : >> { %v1623_v21 = vsub.f32 %v6194_v28, %v1600_v18  ;;  %v5365_v18 = vld [vmem:[%s6109_s29 + $0x80] ss:$12 sps:$4 sm:$0xff]  }
 0x377   : >> { %v1991_v61 = vpop.permute.xlu1 %1990  ;;  %2387 = vrot.lane.b32.xlu0 %v5365_v18, %s5841_s26 }
 0x378   : >> { %v1647_v22 = vmul.f32 1.442695, %v1623_v21  ;;  %v5367_v21 = vld [vmem:[%s6109_s29 + $0x38] ss:$12 sps:$4 sm:$0xff]  }
 0x379   : >> { %v1606_v37 = vpop.xlane.xlu0 %1605  ;;  %2381 = vrot.lane.b32.xlu1 %v5367_v21, %s5841_s26 }
 0x37a   : >> { %5437 = vpow2.f32 %v1647_v22  ;;  %v1626_v30 = vsub.f32 %v6196_v29, %v1606_v37  ;;  %v5368_v37 = vld [vmem:[%s6109_s29 + $0x50] ss:$12 sps:$4 sm:$0xff]  }
 0x37b   : >> { %5439 = vpow2.f32 %v1657_v31  ;;  %v1995_v31 = vpop.permute.xlu1 %1994  ;;  %2385 = vrot.lane.b32.xlu0 %v5366_v20, %s5841_s26 }
 0x37c   : >> { %v1653_v35 = vmul.f32 1.442695, %v1626_v30  ;;  %5441 = vpow2.f32 %v1651_v36  ;;  %v5369_v36 = vld [vmem:[%s6109_s29 + $0x8] ss:$12 sps:$4 sm:$0xff]  }
 0x37d   : >> { %v2045_v27 = vpop.permute.xlu0 %2044  ;;  %2377 = vrot.lane.b32.xlu1 %v5369_v36, %s5841_s26  ;;  %v5370_v30 = vld [vmem:[%s6109_s29 + $0x94] ss:$12 sps:$4 sm:$0xff]  }
 0x37e   : >> { %5443 = vpow2.f32 %v1653_v35  ;;  %5171 = vmatprep.subr.msk.bf16.mxu1 %vm1437_vm0, %v2045_v27  ;;  %v2087_v28 = vsel %vm1437_vm0, %v2045_v27, 0  ;;  %v5372_v35 = vld [vmem:[%s6109_s29 + $0xac] ss:$12 sps:$4 sm:$0xff]  }
 0x37f   : >> { %5445 = vpow2.f32 %v1655_v23  ;;  %4913 = vmatpush3.bf16.xpose.msra.mxu1 %v2087_v28  ;;  %2383 = vrot.lane.b32.xlu0 %v5368_v37, %s5841_s26  ;;  %v5371_v23 = vld [vmem:[%s6109_s29 + $0x20] ss:$12 sps:$4 sm:$0xff]   ;;  %v1999_v39 = vpop.permute.xlu1 %1998 }
 0x380   : >> { %5447 = vpow2.f32 %v1661_v33 }
 0x381   : >> { %v2043_v25 = vpop.permute.xlu0 %2042  ;;  %5449 = vpow2.f32 %v1659_v24  ;;  %2751 = vrot.lane.b32.xlu1 %v5370_v30, %s5842_s30 }
 0x382   : >> { %5172 = vmatprep.subr.msk.bf16.mxu1 %vm1437_vm0, %v2043_v25  ;;  %v2084_v29 = vsel %vm1437_vm0, %v2043_v25, 0 }
 0x383   : >> { %2379 = vrot.lane.b32.xlu0 %v5371_v23, %s5841_s26 }
 0x385   : >> { %v2041_v34 = vpop.permute.xlu0 %2040 }
 0x386   : >> { %v2081_v54 = vsel %vm1437_vm0, %v2041_v34, 0 }
 0x387   : >> { %v6299_v32 = vpop.eup %5437  ;;  %4915 = vmatpush3.bf16.xpose.msra.mxu1 %v2084_v29  ;;  %2753 = vrot.lane.b32.xlu0 %v5372_v35, %s5842_s30  ;;  %v5373_v35 = vld [vmem:[%s6109_s29 + $0x64] ss:$12 sps:$4 sm:$0xff]  }
 0x388   : >> { %v1715_v26 = vpack.c.bf16 %v6297_v0, %v6299_v32  ;;  %5173 = vmatprep.subr.msk.bf16.mxu1 %vm1437_vm0, %v2041_v34  ;;  %v6304_v44 = vpop.eup %5439 }
 0x389   : >> { %7381 = vst [vmem:[#allocation32_spill] sm:$0xff] %v6304_v44  ;;  %v6306_v45 = vpop.eup %5441  ;;  %v1985_v58 = vpop.permute.xlu0 %1984 }
 0x38a   : >> { %4894 = vmatprep.mubr.bf16.mxu1 %v1715_v26 }
 0x38b   : >> { %v6308_v47 = vpop.eup %5443 }
 0x38c   : >> { %v6310_v19 = vpop.eup %5445  ;;  %v1716_v53 = vpack.c.bf16 %v6308_v47, %v6306_v45 }
 0x38d   : >> { %v1717_v48 = vpack.c.bf16 %v6304_v44, %v6310_v19  ;;  %v6317_v55 = vpop.eup %5447  ;;  %v1989_v60 = vpop.permute.xlu0 %1988 }
 0x38e   : >> { %4895 = vmatmul.mubr.bf16.gmra.mxu1 %v1716_v53  ;;  %7382 = vst [vmem:[#allocation33_spill] sm:$0xff] %v6317_v55  ;;  %v6319_v56 = vpop.eup %5449 }
 0x38f   : >> { %4898 = vmatprep.mubr.bf16.mxu1 %v1717_v48  ;;  %4917 = vmatpush3.bf16.xpose.msra.mxu1 %v2081_v54  ;;  %v1718_v57 = vpack.c.bf16 %v6317_v55, %v6319_v56 }
 0x391   : >> { %v1993_v49 = vpop.permute.xlu0 %1992 }
 0x395   : >> { %v1997_v22 = vpop.permute.xlu0 %1996 }
 0x396   : >> { %4899 = vmatmul.mubr.bf16.gmra.mxu1 %v1718_v57 }
 0x397   : >> { %4918 = vmatprep.mubr.msk.bf16.mxu1 %vm1437_vm0, %v1985_v58 }
 0x39e   : >> { %4919 = vmatmul.mubr.msk.bf16.vlgmr.msra.gmra.mxu1 %vm1437_vm0, %v1987_v59 }
 0x39f   : >> { %4922 = vmatprep.mubr.msk.bf16.mxu1 %vm1437_vm0, %v1989_v60 }
 0x3a6   : >> { %4923 = vmatmul.mubr.msk.bf16.gmra.mxu1 %vm1437_vm0, %v1991_v61 }
 0x3a7   : >> { %4926 = vmatprep.mubr.msk.bf16.mxu1 %vm1437_vm0, %v1993_v49 }
 0x3ae   : >> { %4927 = vmatmul.mubr.msk.bf16.gmra.mxu1 %vm1437_vm0, %v1995_v31 }
 0x3af   : >> { %4930 = vmatprep.mubr.msk.bf16.mxu1 %vm1437_vm0, %v1997_v22 }
 0x3b6   : >> { %4931 = vmatmul.mubr.msk.bf16.gmra.mxu1 %vm1437_vm0, %v1999_v39 }
 0x3d4   : >> { %v2392_v27 = vpop.permute.xlu0 %2391 }
 0x3d5   : >> { %4934 = vmatprep.subr.bf16.mxu0 %v2392_v27 }
 0x3d6   : >> { %4935 = vmatpush3.bf16.msra.mxu0 %v2392_v27  ;;  %v5374_v27 = vld [vmem:[%s6109_s29 + $0x7c] ss:$12 sps:$4 sm:$0xff]  }
 0x3e7   : >> { %v2390_v41 = vpop.permute.xlu1 %2389 }
 0x3e8   : >> { %4936 = vmatprep.subr.bf16.mxu0 %v2390_v41 }
 0x3e9   : >> { %v2388_v28 = vpop.permute.xlu0 %2387  ;;  %4937 = vmatpush3.bf16.msra.mxu0 %v2390_v41 }
 0x3ea   : >> { %4938 = vmatprep.subr.bf16.mxu0 %v2388_v28 }
 0x3eb   : >> { %v2382_v24 = vpop.permute.xlu1 %2381 }
 0x3ed   : >> { %v2386_v33 = vpop.permute.xlu0 %2385  ;;  %4939 = vmatpush3.bf16.msra.mxu0 %v2388_v28  ;;  %v5375_v28 = vld [vmem:[%s6109_s29 + $0x4c] ss:$12 sps:$4 sm:$0xff]  }
 0x3ee   : >> { %4940 = vmatprep.subr.bf16.mxu0 %v2386_v33 }
 0x3ef   : >> { %v2378_v26 = vpop.permute.xlu1 %2377 }
 0x3f1   : >> { %v2384_v25 = vpop.permute.xlu0 %2383  ;;  %4941 = vmatpush3.bf16.msra.mxu0 %v2386_v33 }
 0x3f2   : >> { %4942 = vmatprep.subr.bf16.mxu0 %v2384_v25 }
 0x3f3   : >> { %v2752_v8 = vpop.permute.xlu1 %2751 }
 0x3f5   : >> { %4943 = vmatpush3.bf16.msra.mxu0 %v2384_v25  ;;  %v2380_v29 = vpop.permute.xlu0 %2379 }
 0x3f6   : >> { %4944 = vmatprep.subr.bf16.mxu0 %v2382_v24 }
 0x3f9   : >> { %4945 = vmatpush3.bf16.msra.mxu0 %v2382_v24  ;;  %v6353_v53 = vpop.permute.xlu0 %2753 }
 0x3fa   : >> { %4946 = vmatprep.subr.bf16.mxu0 %v2380_v29 }
 0x3fd   : >> { %4947 = vmatpush3.bf16.msra.mxu0 %v2380_v29 }
 0x3fe   : >> { %4948 = vmatprep.subr.bf16.mxu0 %v2378_v26 }
 0x401   : >> { %4949 = vmatpush3.bf16.msra.mxu0 %v2378_v26 }
 0x402   : >> { %5174 = vmatprep.subr.msk.bf16.mxu0 %vm1437_vm0, %v6353_v53 }
 0x412   : >> { %v6351_v34 = vpop.f32.mrf.mxu1 }
 0x413   : >> { %7383 = vst [vmem:[#allocation34_spill] sm:$0xff] %v6351_v34  ;;  %v5404_v34 = vld [vmem:[%s6109_s29 + $0x18] ss:$12 sps:$4 sm:$0xff]  }
 0x414   : >> { %v6355_v54 = vpop.f32.mrf.mxu1 }
 0x415   : >> { %7384 = vst [vmem:[#allocation35_spill] sm:$0xff] %v6355_v54  ;;  %v5406_v54 = vld [vmem:[%s6109_s29 + $0x48] ss:$12 sps:$4 sm:$0xff]  }
 0x416   : >> { %v6359_v48 = vpop.f32.mrf.mxu1 }
 0x417   : >> { %7385 = vst [vmem:[#allocation36_spill] sm:$0xff] %v6359_v48 }
 0x418   : >> { %v6361_v57 = vpop.f32.mrf.mxu1 }
 0x419   : >> { %7386 = vst [vmem:[#allocation37_spill] sm:$0xff] %v6361_v57  ;;  %v5399_v57 = vld [vmem:[%s6109_s29 + $0x34] ss:$12 sps:$4 sm:$0xff]  }
 0x420   : >> { %v6363_v58 = vpop.f32.mrf.mxu1 }
 0x421   : >> { %7387 = vst [vmem:[#allocation38_spill] sm:$0xff] %v6363_v58 }
 0x422   : >> { %v6365_v59 = vpop.f32.mrf.mxu1 }
 0x423   : >> { %7388 = vst [vmem:[#allocation39_spill] sm:$0xff] %v6365_v59  ;;  %v5403_v59 = vld [vmem:[%s6109_s29] ss:$12 sps:$4 sm:$0xff]  }
 0x424   : >> { %v6367_v60 = vpop.f32.mrf.mxu1 }
 0x425   : >> { %7389 = vst [vmem:[#allocation40_spill] sm:$0xff] %v6367_v60 }
 0x426   : >> { %v6369_v61 = vpop.f32.mrf.mxu1 }
 0x427   : >> { %7390 = vst [vmem:[#allocation41_spill] sm:$0xff] %v6369_v61 }
 0x44e   : >> { %v6371_v62 = vpop.f32.mrf.mxu1 }
 0x44f   : >> { %7391 = vst [vmem:[#allocation42_spill] sm:$0xff] %v6371_v62  ;;  %v5405_v62 = vld [vmem:[%s6109_s29 + $0x30] ss:$12 sps:$4 sm:$0xff]  }
 0x450   : >> { %v6373_v49 = vpop.f32.mrf.mxu1 }
 0x451   : >> { %7392 = vst [vmem:[#allocation43_spill] sm:$0xff] %v6373_v49  ;;  %v5407_v49 = vld [vmem:[%s6109_s29 + $0x60] ss:$12 sps:$4 sm:$0xff]  }
 0x452   : >> { %v6375_v63 = vpop.f32.mrf.mxu1 }
 0x453   : >> { %7393 = vst [vmem:[#allocation44_spill] sm:$0xff] %v6375_v63 }
 0x454   : >> { %v6377_v18 = vpop.f32.mrf.mxu1 }
 0x455   : >> { %7394 = vst [vmem:[#allocation45_spill] sm:$0xff] %v6377_v18 }
 0x456   : >> { %v6379_v21 = vpop.f32.mrf.mxu1 }
 0x457   : >> { %7395 = vst [vmem:[#allocation46_spill] sm:$0xff] %v6379_v21  ;;  %v5400_v21 = vld [vmem:[%s6109_s29 + $0x4c] ss:$12 sps:$4 sm:$0xff]  }
 0x458   : >> { %v6381_v20 = vpop.f32.mrf.mxu1 }
 0x459   : >> { %7396 = vst [vmem:[#allocation47_spill] sm:$0xff] %v6381_v20 }
 0x45a   : >> { %v6383_v31 = vpop.f32.mrf.mxu1 }
 0x45b   : >> { %7397 = vst [vmem:[#allocation48_spill] sm:$0xff] %v6383_v31 }
 0x45c   : >> { %v6385_v22 = vpop.f32.mrf.mxu1 }
 0x45d   : >> { %7398 = vst [vmem:[#allocation49_spill] sm:$0xff] %v6385_v22 }
 0x45e   : >> { %v6387_v36 = vpop.f32.mrf.mxu1 }
 0x45f   : >> { %2205 = vmax.xlane.f32.xlu1 %v6387_v36 }
 0x460   : >> { %v6390_v37 = vpop.f32.mrf.mxu1 }
 0x461   : >> { %2201 = vmax.xlane.f32.xlu0 %v6390_v37 }
 0x462   : >> { %v6393_v30 = vpop.f32.mrf.mxu1 }
 0x463   : >> { %2207 = vmax.xlane.f32.xlu1 %v6393_v30 }
 0x464   : >> { %v6396_v23 = vpop.f32.mrf.mxu1 }
 0x466   : >> { %v6399_v39 = vpop.f32.mrf.mxu1 }
 0x467   : >> { %2203 = vmax.xlane.f32.xlu1 %v6396_v23 }
 0x468   : >> { %v6403_v41 = vpop.f32.mrf.mxu1 }
 0x46a   : >> { %v6408_v33 = vpop.f32.mrf.mxu1 }
 0x46c   : >> { %v6411_v25 = vpop.f32.mrf.mxu1 }
 0x46e   : >> { %v6413_v24 = vpop.f32.mrf.mxu1 }
 0x470   : >> { %v6415_v29 = vpop.f32.mrf.mxu1 }
 0x472   : >> { %v6417_v26 = vpop.f32.mrf.mxu1 }
 0x474   : >> { %v6419_v17 = vpop.f32.mrf.mxu1 }
 0x477   : >> { %2747 = vrot.lane.b32.xlu0 %v5373_v35, %s5842_s30  ;;  %v6421_v35 = vpop.f32.mrf.mxu1 }
 0x478   : >> { %2749 = vrot.lane.b32.xlu1 %v5374_v27, %s5842_s30 }
 0x479   : >> { %v6423_v1 = vpop.f32.mrf.mxu1 }
 0x47b   : >> { %2745 = vrot.lane.b32.xlu0 %v5375_v28, %s5842_s30  ;;  %v6425_v27 = vpop.f32.mrf.mxu1 }
 0x47d   : >> { %v6429_v28 = vpop.f32.mrf.mxu1 }
 0x49a   : >> { %2213 = vmax.xlane.f32.xlu0 %v6399_v39 }
 0x49c   : >> { %2209 = vmax.xlane.f32.xlu1 %v6403_v41 }
 0x49e   : >> { %2215 = vmax.xlane.f32.xlu0 %v6408_v33 }
 0x4a0   : >> { %2227 = vmax.xlane.f32.xlu1 %v6429_v28 }
 0x4a2   : >> { %2211 = vmax.xlane.f32.xlu0 %v6411_v25 }
 0x4a6   : >> { %2221 = vmax.xlane.f32.xlu0 %v6413_v24 }
 0x4aa   : >> { %2217 = vmax.xlane.f32.xlu0 %v6415_v29 }
 0x4ae   : >> { %2223 = vmax.xlane.f32.xlu0 %v6417_v26 }
 0x4b1   : >> { %2743 = vrot.lane.b32.xlu1 %v5376_v2, %s5842_s30  ;;  %v5377_v2 = vld [vmem:[%s6109_s29 + $0x1c] ss:$12 sps:$4 sm:$0xff]  }
 0x4b2   : >> { %2219 = vmax.xlane.f32.xlu0 %v6419_v17 }
 0x4b5   : >> { %2689 = vrot.lane.b32.xlu1 %v5382_v3, %s5842_s30  ;;  %v5379_v3 = vld [vmem:[%s6109_s29] ss:$12 sps:$4 sm:$0xff]  }
 0x4b6   : >> { %2229 = vmax.xlane.f32.xlu0 %v6421_v35 }
 0x4b9   : >> { %2693 = vrot.lane.b32.xlu1 %v5384_v4, %s5842_s30  ;;  %v5381_v4 = vld [vmem:[%s6109_s29 + $0x30] ss:$12 sps:$4 sm:$0xff]  }
 0x4ba   : >> { %2225 = vmax.xlane.f32.xlu0 %v6423_v1 }
 0x4bd   : >> { %2697 = vrot.lane.b32.xlu1 %v5386_v5, %s5842_s30  ;;  %v5383_v5 = vld [vmem:[%s6109_s29 + $0x60] ss:$12 sps:$4 sm:$0xff]  }
 0x4be   : >> { %2231 = vmax.xlane.f32.xlu0 %v6425_v27 }
 0x4d4   : >> { %2741 = vrot.lane.b32.xlu0 %v5377_v2, %s5842_s30 }
 0x4d8   : >> { %2739 = vrot.lane.b32.xlu0 %v5378_v6, %s5842_s30 }
 0x4dc   : >> { %2683 = vrot.lane.b32.xlu0 %v5379_v3, %s5842_s30 }
 0x4e0   : >> { %2685 = vrot.lane.b32.xlu0 %v5380_v7, %s5842_s30 }
 0x4e4   : >> { %2687 = vrot.lane.b32.xlu0 %v5381_v4, %s5842_s30 }
 0x4e8   : >> { %v2206_v9 = vpop.xlane.xlu1 %2205  ;;  %2691 = vrot.lane.b32.xlu0 %v5383_v5, %s5842_s30 }
 0x4e9   : >> { %v2235_v3 = vsub.f32 %v6387_v36, %v2206_v9 }
 0x4ea   : >> { %v2202_v11 = vpop.xlane.xlu0 %2201 }
 0x4eb   : >> { %v2233_v2 = vsub.f32 %v6390_v37, %v2202_v11  ;;  %v2253_v15 = vmul.f32 1.442695, %v2235_v3 }
 0x4ec   : >> { %v2208_v12 = vpop.xlane.xlu1 %2207  ;;  %2695 = vrot.lane.b32.xlu0 %v5385_v10, %s5842_s30 }
 0x4ed   : >> { %v2236_v6 = vsub.f32 %v6393_v30, %v2208_v12  ;;  %v2249_v7 = vmul.f32 1.442695, %v2233_v2 }
 0x4ee   : >> { %v2748_v37 = vpop.permute.xlu0 %2747 }
 0x4ef   : >> { %v2255_v13 = vmul.f32 1.442695, %v2236_v6  ;;  %5451 = vpow2.f32 %v2249_v7  ;;  %v2792_v30 = vsel %vm1437_vm0, %v2748_v37, 0 }
 0x4f0   : >> { %v2204_v14 = vpop.xlane.xlu1 %2203 }
 0x4f1   : >> { %v2234_v4 = vsub.f32 %v6396_v23, %v2204_v14  ;;  %5453 = vpow2.f32 %v2255_v13  ;;  %v2801_v13 = vsel %vm1437_vm0, %v6353_v53, 0 }
 0x4f2   : >> { %v2746_v23 = vpop.permute.xlu0 %2745 }
 0x4f3   : >> { %v2251_v16 = vmul.f32 1.442695, %v2234_v4  ;;  %v2789_v6 = vsel %vm1437_vm0, %v2746_v23, 0 }
 0x4f5   : >> { %5455 = vpow2.f32 %v2251_v16  ;;  %v2750_v16 = vpop.permute.xlu1 %2749 }
 0x4f6   : >> { %5457 = vpow2.f32 %v2253_v15  ;;  %v2798_v15 = vsel %vm1437_vm0, %v2752_v8, 0  ;;  %v2795_v36 = vsel %vm1437_vm0, %v2750_v16, 0 }
 0x4fc   : >> { %v6467_v5 = vpop.eup %5451 }
 0x4fe   : >> { %v6469_v11 = vpop.eup %5453 }
 0x502   : >> { %v6471_v10 = vpop.eup %5455 }
 0x503   : >> { %v6473_v12 = vpop.eup %5457  ;;  %v2329_v9 = vpack.c.bf16 %v6471_v10, %v6467_v5 }
 0x504   : >> { %v2330_v14 = vpack.c.bf16 %v6469_v11, %v6473_v12 }
 0x505   : >> { %4950 = vmatprep.mubr.bf16.mxu0 %v2329_v9 }
 0x506   : >> { %4951 = vmatmul.mubr.bf16.vlgmr.msra.gmra.mxu0 %v2330_v14 }
 0x507   : >> { %4967 = vmatpush3.bf16.xpose.msra.mxu0 %v2801_v13 }
 0x508   : >> { %5175 = vmatprep.subr.msk.bf16.mxu0 %vm1437_vm0, %v2752_v8 }
 0x50f   : >> { %4969 = vmatpush3.bf16.xpose.msra.mxu0 %v2798_v15 }
 0x510   : >> { %5176 = vmatprep.subr.msk.bf16.mxu0 %vm1437_vm0, %v2750_v16 }
 0x517   : >> { %4971 = vmatpush3.bf16.xpose.msra.mxu0 %v2795_v36 }
 0x518   : >> { %5177 = vmatprep.subr.msk.bf16.mxu0 %vm1437_vm0, %v2748_v37 }
 0x51f   : >> { %4973 = vmatpush3.bf16.xpose.msra.mxu0 %v2792_v30 }
 0x520   : >> { %5178 = vmatprep.subr.msk.bf16.mxu0 %vm1437_vm0, %v2746_v23 }
 0x523   : >> { %v2214_v53 = vpop.xlane.xlu0 %2213 }
 0x524   : >> { %v2239_v4 = vsub.f32 %v6399_v39, %v2214_v53 }
 0x525   : >> { %v2210_v2 = vpop.xlane.xlu1 %2209 }
 0x526   : >> { %v2237_v8 = vsub.f32 %v6403_v41, %v2210_v2  ;;  %v2261_v36 = vmul.f32 1.442695, %v2239_v4 }
 0x527   : >> { %4975 = vmatpush3.bf16.xpose.msra.mxu0 %v2789_v6  ;;  %v2216_v3 = vpop.xlane.xlu0 %2215 }
 0x528   : >> { %v2240_v7 = vsub.f32 %v6408_v33, %v2216_v3  ;;  %v2257_v14 = vmul.f32 1.442695, %v2237_v8 }
 0x529   : >> { %v2228_v9 = vpop.xlane.xlu1 %2227 }
 0x52a   : >> { %v2263_v13 = vmul.f32 1.442695, %v2240_v7  ;;  %5459 = vpow2.f32 %v2257_v14 }
 0x52b   : >> { %v2212_v15 = vpop.xlane.xlu0 %2211 }
 0x52c   : >> { %v2238_v16 = vsub.f32 %v6411_v25, %v2212_v15  ;;  %5461 = vpow2.f32 %v2263_v13 }
 0x52d   : >> { %v2744_v37 = vpop.permute.xlu1 %2743 }
 0x52e   : >> { %v2259_v30 = vmul.f32 1.442695, %v2238_v16  ;;  %5179 = vmatprep.subr.msk.bf16.mxu0 %vm1437_vm0, %v2744_v37  ;;  %v2786_v41 = vsel %vm1437_vm0, %v2744_v37, 0 }
 0x52f   : >> { %v2222_v23 = vpop.xlane.xlu0 %2221  ;;  %4977 = vmatpush3.bf16.xpose.msra.mxu0 %v2786_v41 }
 0x530   : >> { %5463 = vpow2.f32 %v2259_v30  ;;  %v2243_v25 = vsub.f32 %v6413_v24, %v2222_v23  ;;  %v2246_v24 = vsub.f32 %v6429_v28, %v2228_v9 }
 0x531   : >> { %5465 = vpow2.f32 %v2261_v36 }
 0x532   : >> { %v2269_v15 = vmul.f32 1.442695, %v2243_v25 }
 0x533   : >> { %v2218_v39 = vpop.xlane.xlu0 %2217 }
 0x534   : >> { %v2241_v33 = vsub.f32 %v6415_v29, %v2218_v39 }
 0x536   : >> { %v2265_v8 = vmul.f32 1.442695, %v2241_v33 }
 0x537   : >> { %v2224_v53 = vpop.xlane.xlu0 %2223  ;;  %v6498_v6 = vpop.eup %5459 }
 0x538   : >> { %v2244_v2 = vsub.f32 %v6417_v26, %v2224_v53  ;;  %5467 = vpow2.f32 %v2265_v8  ;;  %v5387_v8 = vld [vmem:[%s6109_s29 + $0xb0] ss:$12 sps:$4 sm:$0xff]  }
 0x539   : >> { %v6500_v4 = vpop.eup %5461  ;;  %3090 = vrot.lane.b32.xlu0 %v5387_v8, %s5842_s30 }
 0x53a   : >> { %v2271_v3 = vmul.f32 1.442695, %v2244_v2 }
 0x53b   : >> { %v2220_v7 = vpop.xlane.xlu0 %2219 }
 0x53c   : >> { %v2242_v14 = vsub.f32 %v6419_v17, %v2220_v7  ;;  %5469 = vpow2.f32 %v2271_v3  ;;  %v2275_v17 = vmul.f32 1.442695, %v2246_v24  ;;  %v5388_v3 = vld [vmem:[%s6109_s29 + $0x98] ss:$12 sps:$4 sm:$0xff]  }
 0x53d   : >> { %v6503_v13 = vpop.eup %5463  ;;  %3088 = vrot.lane.b32.xlu1 %v5388_v3, %s5842_s30  ;;  %v5395_v3 = vld [vmem:[%s6109_s29 + $0xac] ss:$12 sps:$4 sm:$0xff]  }
 0x53e   : >> { %v6505_v16 = vpop.eup %5465  ;;  %v2267_v29 = vmul.f32 1.442695, %v2242_v14  ;;  %v2331_v26 = vpack.c.bf16 %v6503_v13, %v6498_v6 }
 0x53f   : >> { %v2230_v36 = vpop.xlane.xlu0 %2229  ;;  %v2332_v37 = vpack.c.bf16 %v6500_v4, %v6505_v16 }
 0x540   : >> { %5471 = vpow2.f32 %v2267_v29  ;;  %4954 = vmatprep.mubr.bf16.mxu0 %v2331_v26  ;;  %v2247_v30 = vsub.f32 %v6421_v35, %v2230_v36  ;;  %v5392_v29 = vld [vmem:[%s6109_s29 + $0x38] ss:$12 sps:$4 sm:$0xff]  }
 0x541   : >> { %5473 = vpow2.f32 %v2269_v15  ;;  %4955 = vmatmul.mubr.bf16.gmra.mxu0 %v2332_v37  ;;  %v5389_v15 = vld [vmem:[%s6109_s29 + $0x80] ss:$12 sps:$4 sm:$0xff]   ;;  %v5390_v37 = vld [vmem:[%s6109_s29 + $0x68] ss:$12 sps:$4 sm:$0xff]   ;;  %3080 = vrot.lane.b32.xlu1 %v5392_v29, %s5842_s30 }
 0x542   : >> { %5475 = vpow2.f32 %v2275_v17  ;;  %v2277_v28 = vmul.f32 1.442695, %v2247_v30  ;;  %3086 = vrot.lane.b32.xlu0 %v5389_v15, %s5842_s30  ;;  %v5394_v17 = vld [vmem:[%s6109_s29 + $0x8] ss:$12 sps:$4 sm:$0xff]   ;;  %v2690_v15 = vpop.permute.xlu1 %2689 }
 0x543   : >> { %v2226_v41 = vpop.xlane.xlu0 %2225 }
 0x544   : >> { %v2245_v23 = vsub.f32 %v6423_v1, %v2226_v41 }
 0x545   : >> { %v6515_v2 = vpop.eup %5467  ;;  %3076 = vrot.lane.b32.xlu1 %v5394_v17, %s5842_s30  ;;  %v5398_v17 = vld [vmem:[%s6109_s29 + $0x64] ss:$12 sps:$4 sm:$0xff]  }
 0x546   : >> { %v2273_v39 = vmul.f32 1.442695, %v2245_v23  ;;  %3084 = vrot.lane.b32.xlu0 %v5390_v37, %s5842_s30  ;;  %v5397_v37 = vld [vmem:[%s6109_s29 + $0x94] ss:$12 sps:$4 sm:$0xff]  }
 0x547   : >> { %v2232_v9 = vpop.xlane.xlu0 %2231 }
 0x548   : >> { %5477 = vpow2.f32 %v2273_v39  ;;  %v2248_v33 = vsub.f32 %v6425_v27, %v2232_v9  ;;  %v5391_v39 = vld [vmem:[%s6109_s29 + $0x50] ss:$12 sps:$4 sm:$0xff]  }
 0x549   : >> { %5479 = vpow2.f32 %v2277_v28  ;;  %v6517_v35 = vpop.eup %5469  ;;  %v5396_v28 = vld [vmem:[%s6109_s29 + $0x7c] ss:$12 sps:$4 sm:$0xff]  }
 0x54a   : >> { %v2279_v53 = vmul.f32 1.442695, %v2248_v33  ;;  %3082 = vrot.lane.b32.xlu0 %v5391_v39, %s5842_s30  ;;  %3448 = vrot.lane.b32.xlu1 %v5396_v28, %s5843_s6 }
 0x54b   : >> { %v2742_v25 = vpop.permute.xlu0 %2741 }
 0x54c   : >> { %5481 = vpow2.f32 %v2279_v53  ;;  %5180 = vmatprep.subr.msk.bf16.mxu0 %vm1437_vm0, %v2742_v25  ;;  %v2783_v1 = vsel %vm1437_vm0, %v2742_v25, 0 }
 0x54d   : >> { %v6523_v7 = vpop.eup %5471  ;;  %4979 = vmatpush3.bf16.xpose.msra.mxu0 %v2783_v1  ;;  %v5393_v1 = vld [vmem:[%s6109_s29 + $0x20] ss:$12 sps:$4 sm:$0xff]  }
 0x54e   : >> { %v6525_v27 = vpop.eup %5473  ;;  %v2333_v14 = vpack.c.bf16 %v6523_v7, %v6515_v2  ;;  %3078 = vrot.lane.b32.xlu0 %v5393_v1, %s5842_s30 }
 0x54f   : >> { %v2334_v26 = vpack.c.bf16 %v6517_v35, %v6525_v27  ;;  %v2740_v24 = vpop.permute.xlu0 %2739  ;;  %v6541_v30 = vpop.eup %5475 }
 0x550   : >> { %4958 = vmatprep.mubr.bf16.mxu0 %v2333_v14  ;;  %5181 = vmatprep.subr.msk.bf16.mxu0 %vm1437_vm0, %v2740_v24  ;;  %v2780_v36 = vsel %vm1437_vm0, %v2740_v24, 0 }
 0x551   : >> { %4959 = vmatmul.mubr.bf16.gmra.mxu0 %v2334_v26  ;;  %v2694_v26 = vpop.permute.xlu1 %2693 }
 0x552   : >> { %3452 = vrot.lane.b32.xlu0 %v5395_v3, %s5843_s6 }
 0x553   : >> { %v2684_v33 = vpop.permute.xlu0 %2683 }
 0x555   : >> { %v6543_v41 = vpop.eup %5477  ;;  %4981 = vmatpush3.bf16.xpose.msra.mxu0 %v2780_v36  ;;  %v2698_v36 = vpop.permute.xlu1 %2697 }
 0x556   : >> { %v2335_v23 = vpack.c.bf16 %v6541_v30, %v6543_v41  ;;  %v6551_v9 = vpop.eup %5479  ;;  %3450 = vrot.lane.b32.xlu0 %v5397_v37, %s5843_s6 }
 0x557   : >> { %v2686_v8 = vpop.permute.xlu0 %2685 }
 0x558   : >> { %4962 = vmatprep.mubr.bf16.mxu0 %v2335_v23 }
 0x559   : >> { %v6553_v53 = vpop.eup %5481 }
 0x55a   : >> { %v2336_v25 = vpack.c.bf16 %v6553_v53, %v6551_v9  ;;  %3446 = vrot.lane.b32.xlu0 %v5398_v17, %s5843_s6 }
 0x55b   : >> { %v2688_v14 = vpop.permute.xlu0 %2687 }
 0x55c   : >> { %4963 = vmatmul.mubr.bf16.gmra.mxu0 %v2336_v25 }
 0x55d   : >> { %4982 = vmatprep.mubr.msk.bf16.mxu0 %vm1437_vm0, %v2684_v33 }
 0x55f   : >> { %v2692_v29 = vpop.permute.xlu0 %2691 }
 0x563   : >> { %v2696_v24 = vpop.permute.xlu0 %2695 }
 0x564   : >> { %4983 = vmatmul.mubr.msk.bf16.vlgmr.msra.gmra.mxu0 %vm1437_vm0, %v2686_v8 }
 0x565   : >> { %4986 = vmatprep.mubr.msk.bf16.mxu0 %vm1437_vm0, %v2688_v14 }
 0x56c   : >> { %4987 = vmatmul.mubr.msk.bf16.gmra.mxu0 %vm1437_vm0, %v2690_v15 }
 0x56d   : >> { %4990 = vmatprep.mubr.msk.bf16.mxu0 %vm1437_vm0, %v2692_v29 }
 0x574   : >> { %4991 = vmatmul.mubr.msk.bf16.gmra.mxu0 %vm1437_vm0, %v2694_v26 }
 0x575   : >> { %4994 = vmatprep.mubr.msk.bf16.mxu0 %vm1437_vm0, %v2696_v24 }
 0x57c   : >> { %4995 = vmatmul.mubr.msk.bf16.gmra.mxu0 %vm1437_vm0, %v2698_v36 }
 0x5ab   : >> { %v3091_v23 = vpop.permute.xlu0 %3090 }
 0x5ac   : >> { %4998 = vmatprep.subr.bf16.mxu1 %v3091_v23 }
 0x5ad   : >> { %4999 = vmatpush3.bf16.msra.mxu1 %v3091_v23 }
 0x5af   : >> { %v3089_v39 = vpop.permute.xlu1 %3088 }
 0x5b0   : >> { %5000 = vmatprep.subr.bf16.mxu1 %v3089_v39 }
 0x5b1   : >> { %5001 = vmatpush3.bf16.msra.mxu1 %v3089_v39 }
 0x5b3   : >> { %v3081_v1 = vpop.permute.xlu1 %3080 }
 0x5b4   : >> { %v3087_v28 = vpop.permute.xlu0 %3086 }
 0x5b5   : >> { %5002 = vmatprep.subr.bf16.mxu1 %v3087_v28 }
 0x5b6   : >> { %5003 = vmatpush3.bf16.msra.mxu1 %v3087_v28 }
 0x5b7   : >> { %v3077_v3 = vpop.permute.xlu1 %3076 }
 0x5b8   : >> { %v3085_v33 = vpop.permute.xlu0 %3084 }
 0x5b9   : >> { %5004 = vmatprep.subr.bf16.mxu1 %v3085_v33 }
 0x5ba   : >> { %5005 = vmatpush3.bf16.msra.mxu1 %v3085_v33 }
 0x5bc   : >> { %v3083_v25 = vpop.permute.xlu0 %3082 }
 0x5bd   : >> { %5006 = vmatprep.subr.bf16.mxu1 %v3083_v25 }
 0x5be   : >> { %5007 = vmatpush3.bf16.msra.mxu1 %v3083_v25 }
 0x5bf   : >> { %5008 = vmatprep.subr.bf16.mxu1 %v3081_v1 }
 0x5c0   : >> { %v3079_v8 = vpop.permute.xlu0 %3078 }
 0x5c2   : >> { %5009 = vmatpush3.bf16.msra.mxu1 %v3081_v1 }
 0x5c3   : >> { %5010 = vmatprep.subr.bf16.mxu1 %v3079_v8 }
 0x5c4   : >> { %v6579_v29 = vpop.permute.xlu0 %3452 }
 0x5c6   : >> { %5011 = vmatpush3.bf16.msra.mxu1 %v3079_v8  ;;  %v6575_v14 = vpop.f32.mrf.mxu0 }
 0x5c7   : >> { %5012 = vmatprep.subr.bf16.mxu1 %v3077_v3  ;;  %7399 = vst [vmem:[#allocation50_spill] sm:$0xff] %v6575_v14 }
 0x5c8   : >> { %v6577_v15 = vpop.f32.mrf.mxu0 }
 0x5c9   : >> { %7400 = vst [vmem:[#allocation51_spill] sm:$0xff] %v6577_v15 }
 0x5ca   : >> { %5013 = vmatpush3.bf16.msra.mxu1 %v3077_v3  ;;  %v6583_v26 = vpop.f32.mrf.mxu0 }
 0x5cb   : >> { %5182 = vmatprep.subr.msk.bf16.mxu1 %vm1437_vm0, %v6579_v29  ;;  %7401 = vst [vmem:[#allocation52_spill] sm:$0xff] %v6583_v26 }
 0x5cc   : >> { %v6585_v24 = vpop.f32.mrf.mxu0 }
 0x5cd   : >> { %7402 = vst [vmem:[#allocation53_spill] sm:$0xff] %v6585_v24 }
 0x601   : >> { %v6587_v36 = vpop.f32.mrf.mxu0 }
 0x602   : >> { %7403 = vst [vmem:[#allocation54_spill] sm:$0xff] %v6587_v36 }
 0x603   : >> { %v6589_v37 = vpop.f32.mrf.mxu0 }
 0x604   : >> { %7404 = vst [vmem:[#allocation55_spill] sm:$0xff] %v6589_v37  ;;  %v5402_v37 = vld [vmem:[%s6109_s29 + $0x4] ss:$12 sps:$4 sm:$0xff]  }
 0x605   : >> { %v6591_v17 = vpop.f32.mrf.mxu0 }
 0x606   : >> { %7405 = vst [vmem:[#allocation56_spill] sm:$0xff] %v6591_v17 }
 0x607   : >> { %v6593_v23 = vpop.f32.mrf.mxu0 }
 0x608   : >> { %7406 = vst [vmem:[#allocation57_spill] sm:$0xff] %v6593_v23 }
 0x611   : >> { %v6595_v39 = vpop.f32.mrf.mxu0 }
 0x612   : >> { %7407 = vst [vmem:[#allocation58_spill] sm:$0xff] %v6595_v39 }
 0x613   : >> { %v6597_v28 = vpop.f32.mrf.mxu0 }
 0x614   : >> { %7408 = vst [vmem:[#allocation59_spill] sm:$0xff] %v6597_v28 }
 0x615   : >> { %v6599_v33 = vpop.f32.mrf.mxu0 }
 0x616   : >> { %7409 = vst [vmem:[#allocation60_spill] sm:$0xff] %v6599_v33  ;;  %v5409_v33 = vld [vmem:[%s6109_s29 + $0x90] ss:$12 sps:$4 sm:$0xff]  }
 0x617   : >> { %v6601_v25 = vpop.f32.mrf.mxu0 }
 0x618   : >> { %7410 = vst [vmem:[#allocation61_spill] sm:$0xff] %v6601_v25 }
 0x61c   : >> { %v6603_v1 = vpop.f32.mrf.mxu0 }
 0x61d   : >> { %7411 = vst [vmem:[#allocation62_spill] sm:$0xff] %v6603_v1 }
 0x61e   : >> { %v6605_v8 = vpop.f32.mrf.mxu0 }
 0x61f   : >> { %7412 = vst [vmem:[#allocation63_spill] sm:$0xff] %v6605_v8 }
 0x620   : >> { %v6607_v3 = vpop.f32.mrf.mxu0 }
 0x621   : >> { %7413 = vst [vmem:[#allocation64_spill] sm:$0xff] %v6607_v3 }
 0x622   : >> { %v6609_v36 = vpop.f32.mrf.mxu0 }
 0x623   : >> { %7414 = vst [vmem:[#allocation65_spill] sm:$0xff] %v6609_v36 }
 0x624   : >> { %v6611_v31 = vpop.f32.mrf.mxu0 }
 0x625   : >> { %2904 = vmax.xlane.f32.xlu1 %v6611_v31 }
 0x626   : >> { %v6614_v17 = vpop.f32.mrf.mxu0 }
 0x627   : >> { %2900 = vmax.xlane.f32.xlu0 %v6614_v17 }
 0x628   : >> { %v6617_v60 = vpop.f32.mrf.mxu0 }
 0x629   : >> { %2906 = vmax.xlane.f32.xlu1 %v6617_v60 }
 0x62a   : >> { %v6620_v22 = vpop.f32.mrf.mxu0 }
 0x62c   : >> { %v6622_v1 = vpop.f32.mrf.mxu0 }
 0x62d   : >> { %2902 = vmax.xlane.f32.xlu1 %v6620_v22  ;;  %2912 = vmax.xlane.f32.xlu0 %v6622_v1 }
 0x62e   : >> { %v6626_v3 = vpop.f32.mrf.mxu0 }
 0x630   : >> { %v6628_v36 = vpop.f32.mrf.mxu0 }
 0x631   : >> { %2908 = vmax.xlane.f32.xlu1 %v6626_v3 }
 0x632   : >> { %v6631_v8 = vpop.f32.mrf.mxu0 }
 0x633   : >> { %2910 = vmax.xlane.f32.xlu0 %v6631_v8 }
 0x634   : >> { %v6635_v61 = vpop.f32.mrf.mxu0 }
 0x635   : >> { %2914 = vmax.xlane.f32.xlu1 %v6628_v36 }
 0x636   : >> { %v6638_v63 = vpop.f32.mrf.mxu0 }
 0x638   : >> { %v6641_v48 = vpop.f32.mrf.mxu0 }
 0x639   : >> { %2920 = vmax.xlane.f32.xlu1 %v6635_v61 }
 0x63a   : >> { %v6644_v18 = vpop.f32.mrf.mxu0 }
 0x63c   : >> { %v6651_v58 = vpop.f32.mrf.mxu0 }
 0x63d   : >> { %2916 = vmax.xlane.f32.xlu1 %v6638_v63 }
 0x63e   : >> { %v6654_v20 = vpop.f32.mrf.mxu0 }
 0x640   : >> { %v6657_v23 = vpop.f32.mrf.mxu0 }
 0x641   : >> { %2922 = vmax.xlane.f32.xlu1 %v6641_v48 }
 0x645   : >> { %2918 = vmax.xlane.f32.xlu1 %v6644_v18 }
 0x649   : >> { %3442 = vrot.lane.b32.xlu0 %v5399_v57, %s5843_s6  ;;  %v6660_v57 = vpop.f32.mrf.mxu0 }
 0x656   : >> { %3444 = vrot.lane.b32.xlu1 %v5400_v21, %s5843_s6  ;;  %v5401_v21 = vld [vmem:[%s6109_s29 + $0x1c] ss:$12 sps:$4 sm:$0xff]  }
 0x668   : >> { %2928 = vmax.xlane.f32.xlu0 %v6651_v58 }
 0x66c   : >> { %2924 = vmax.xlane.f32.xlu0 %v6654_v20 }
 0x670   : >> { %2930 = vmax.xlane.f32.xlu0 %v6657_v23 }
 0x67a   : >> { %2926 = vmax.xlane.f32.xlu1 %v6660_v57 }
 0x686   : >> { %3440 = vrot.lane.b32.xlu0 %v5401_v21, %s5843_s6  ;;  %v5408_v21 = vld [vmem:[%s6109_s29 + $0x78] ss:$12 sps:$4 sm:$0xff]  }
 0x68a   : >> { %3382 = vrot.lane.b32.xlu0 %v5403_v59, %s5843_s6  ;;  %v5410_v59 = vld [vmem:[%s6109_s29 + $0xa8] ss:$12 sps:$4 sm:$0xff]  }
 0x68b   : >> { %3438 = vrot.lane.b32.xlu1 %v5402_v37, %s5843_s6  ;;  %v6683_v37 = vpop.permute.xlu0 %3450 }
 0x68e   : >> { %3386 = vrot.lane.b32.xlu0 %v5405_v62, %s5843_s6  ;;  %v6685_v62 = vpop.permute.xlu1 %3448 }
 0x68f   : >> { %3384 = vrot.lane.b32.xlu1 %v5404_v34, %s5843_s6  ;;  %v6687_v39 = vpop.permute.xlu0 %3446 }
 0x692   : >> { %3390 = vrot.lane.b32.xlu0 %v5407_v49, %s5843_s6 }
 0x693   : >> { %3388 = vrot.lane.b32.xlu1 %v5406_v54, %s5843_s6 }
 0x696   : >> { %3394 = vrot.lane.b32.xlu0 %v5409_v33, %s5843_s6 }
 0x697   : >> { %3392 = vrot.lane.b32.xlu1 %v5408_v21, %s5843_s6 }
 0x69b   : >> { %3396 = vrot.lane.b32.xlu1 %v5410_v59, %s5843_s6 }
 0x6ae   : >> { %v2905_v34 = vpop.xlane.xlu1 %2904 }
 0x6af   : >> { %v2934_v33 = vsub.f32 %v6611_v31, %v2905_v34 }
 0x6b0   : >> { %v2901_v26 = vpop.xlane.xlu0 %2900 }
 0x6b1   : >> { %v2932_v49 = vsub.f32 %v6614_v17, %v2901_v26  ;;  %v2952_v15 = vmul.f32 1.442695, %v2934_v33 }
 0x6b2   : >> { %v2907_v14 = vpop.xlane.xlu1 %2906 }
 0x6b3   : >> { %v2935_v54 = vsub.f32 %v6617_v60, %v2907_v14  ;;  %v2948_v25 = vmul.f32 1.442695, %v2932_v49 }
 0x6b5   : >> { %v2954_v24 = vmul.f32 1.442695, %v2935_v54  ;;  %5483 = vpow2.f32 %v2948_v25 }
 0x6b6   : >> { %v2903_v21 = vpop.xlane.xlu1 %2902  ;;  %v2913_v28 = vpop.xlane.xlu0 %2912 }
 0x6b7   : >> { %v2933_v59 = vsub.f32 %v6620_v22, %v2903_v21  ;;  %v2938_v50 = vsub.f32 %v6622_v1, %v2913_v28  ;;  %5485 = vpow2.f32 %v2954_v24 }
 0x6b9   : >> { %v2950_v55 = vmul.f32 1.442695, %v2933_v59  ;;  %v2960_v14 = vmul.f32 1.442695, %v2938_v50 }
 0x6ba   : >> { %v2909_v44 = vpop.xlane.xlu1 %2908 }
 0x6bb   : >> { %v2936_v26 = vsub.f32 %v6626_v3, %v2909_v44  ;;  %5487 = vpow2.f32 %v2950_v55 }
 0x6bc   : >> { %v2911_v17 = vpop.xlane.xlu0 %2910  ;;  %5489 = vpow2.f32 %v2952_v15 }
 0x6bd   : >> { %v2956_v60 = vmul.f32 1.442695, %v2936_v26  ;;  %v2937_v31 = vsub.f32 %v6631_v8, %v2911_v17 }
 0x6be   : >> { %v2915_v34 = vpop.xlane.xlu1 %2914 }
 0x6bf   : >> { %v2958_v49 = vmul.f32 1.442695, %v2937_v31  ;;  %v2939_v22 = vsub.f32 %v6628_v36, %v2915_v34  ;;  %5491 = vpow2.f32 %v2956_v60 }
 0x6c1   : >> { %5493 = vpow2.f32 %v2958_v49  ;;  %v2962_v25 = vmul.f32 1.442695, %v2939_v22  ;;  %v3497_v22 = vsel %vm1437_vm0, %v6683_v37, 0 }
 0x6c2   : >> { %5495 = vpow2.f32 %v2960_v14  ;;  %v2921_v28 = vpop.xlane.xlu1 %2920  ;;  %v6697_v1 = vpop.eup %5483 }
 0x6c3   : >> { %5497 = vpow2.f32 %v2962_v25  ;;  %v2942_v33 = vsub.f32 %v6635_v61, %v2921_v28 }
 0x6c4   : >> { %v6699_v44 = vpop.eup %5485 }
 0x6c5   : >> { %v2968_v34 = vmul.f32 1.442695, %v2942_v33 }
 0x6c6   : >> { %v2917_v24 = vpop.xlane.xlu1 %2916 }
 0x6c7   : >> { %v2940_v15 = vsub.f32 %v6638_v63, %v2917_v24  ;;  %v3500_v63 = vsel %vm1437_vm0, %v6579_v29, 0 }
 0x6c8   : >> { %v6701_v55 = vpop.eup %5487 }
 0x6c9   : >> { %v6704_v50 = vpop.eup %5489  ;;  %v3028_v36 = vpack.c.bf16 %v6701_v55, %v6697_v1  ;;  %v2964_v59 = vmul.f32 1.442695, %v2940_v15 }
 0x6ca   : >> { %v2923_v8 = vpop.xlane.xlu1 %2922  ;;  %v3029_v54 = vpack.c.bf16 %v6699_v44, %v6704_v50 }
 0x6cb   : >> { %v2943_v3 = vsub.f32 %v6641_v48, %v2923_v8  ;;  %5014 = vmatprep.mubr.bf16.mxu1 %v3028_v36  ;;  %5499 = vpow2.f32 %v2964_v59 }
 0x6cc   : >> { %v6712_v21 = vpop.eup %5491  ;;  %5015 = vmatmul.mubr.bf16.vlgmr.msra.gmra.mxu1 %v3029_v54 }
 0x6cd   : >> { %v2970_v17 = vmul.f32 1.442695, %v2943_v3  ;;  %5031 = vmatpush3.bf16.xpose.msra.mxu1 %v3500_v63  ;;  %v3443_v3 = vpop.permute.xlu0 %3442 }
 0x6ce   : >> { %v6716_v26 = vpop.eup %5493  ;;  %v2919_v60 = vpop.xlane.xlu1 %2918  ;;  %5183 = vmatprep.subr.msk.bf16.mxu1 %vm1437_vm0, %v6683_v37  ;;  %v3485_v59 = vsel %vm1437_vm0, %v3443_v3, 0 }
 0x6cf   : >> { %v6718_v31 = vpop.eup %5495  ;;  %v2941_v48 = vsub.f32 %v6644_v18, %v2919_v60  ;;  %v3030_v61 = vpack.c.bf16 %v6716_v26, %v6712_v21  ;;  %5501 = vpow2.f32 %v2970_v17  ;;  %v3494_v18 = vsel %vm1437_vm0, %v6685_v62, 0 }
 0x6d0   : >> { %v6725_v14 = vpop.eup %5497 }
 0x6d1   : >> { %v2966_v29 = vmul.f32 1.442695, %v2941_v48  ;;  %5018 = vmatprep.mubr.bf16.mxu1 %v3030_v61  ;;  %v3031_v49 = vpack.c.bf16 %v6725_v14, %v6718_v31 }
 0x6d2   : >> { %v3445_v36 = vpop.permute.xlu1 %3444 }
 0x6d3   : >> { %5503 = vpow2.f32 %v2966_v29  ;;  %v3488_v54 = vsel %vm1437_vm0, %v3445_v36, 0 }
 0x6d4   : >> { %5505 = vpow2.f32 %v2968_v34  ;;  %5019 = vmatmul.mubr.bf16.gmra.mxu1 %v3031_v49 }
 0x6d5   : >> { %5033 = vmatpush3.bf16.xpose.msra.mxu1 %v3497_v22 }
 0x6d6   : >> { %5184 = vmatprep.subr.msk.bf16.mxu1 %vm1437_vm0, %v6685_v62  ;;  %v3491_v62 = vsel %vm1437_vm0, %v6687_v39, 0 }
 0x6d8   : >> { %v6735_v25 = vpop.eup %5499 }
 0x6dc   : >> { %v6737_v28 = vpop.eup %5501 }
 0x6dd   : >> { %5035 = vmatpush3.bf16.xpose.msra.mxu1 %v3494_v18 }
 0x6de   : >> { %5185 = vmatprep.subr.msk.bf16.mxu1 %vm1437_vm0, %v6687_v39 }
 0x6e0   : >> { %v6741_v24 = vpop.eup %5503 }
 0x6e1   : >> { %v6743_v15 = vpop.eup %5505  ;;  %v3032_v37 = vpack.c.bf16 %v6741_v24, %v6735_v25 }
 0x6e2   : >> { %v3033_v8 = vpack.c.bf16 %v6737_v28, %v6743_v15 }
 0x6e3   : >> { %5022 = vmatprep.mubr.bf16.mxu1 %v3032_v37 }
 0x6e4   : >> { %5023 = vmatmul.mubr.bf16.gmra.mxu1 %v3033_v8 }
 0x6e5   : >> { %5037 = vmatpush3.bf16.xpose.msra.mxu1 %v3491_v62 }
 0x6e6   : >> { %5186 = vmatprep.subr.msk.bf16.mxu1 %vm1437_vm0, %v3445_v36 }
 0x6ed   : >> { %5039 = vmatpush3.bf16.xpose.msra.mxu1 %v3488_v54 }
 0x6ee   : >> { %5187 = vmatprep.subr.msk.bf16.mxu1 %vm1437_vm0, %v3443_v3 }
 0x6f1   : >> { %v2929_v33 = vpop.xlane.xlu0 %2928 }
 0x6f2   : >> { %v2946_v34 = vsub.f32 %v6651_v58, %v2929_v33 }
 0x6f4   : >> { %v2976_v37 = vmul.f32 1.442695, %v2946_v34  ;;  %v5414_v34 = vld [vmem:[%s6109_s29 + $0x68] ss:$12 sps:$4 sm:$0xff]  }
 0x6f5   : >> { %v2925_v63 = vpop.xlane.xlu0 %2924  ;;  %5041 = vmatpush3.bf16.xpose.msra.mxu1 %v3485_v59 }
 0x6f6   : >> { %v2944_v48 = vsub.f32 %v6654_v20, %v2925_v63 }
 0x6f8   : >> { %v2972_v29 = vmul.f32 1.442695, %v2944_v48  ;;  %v5411_v48 = vld [vmem:[%s6109_s29 + $0xb0] ss:$12 sps:$4 sm:$0xff]  }
 0x6f9   : >> { %v2931_v17 = vpop.xlane.xlu0 %2930  ;;  %3789 = vrot.lane.b32.xlu1 %v5411_v48, %s5843_s6 }
 0x6fa   : >> { %v2947_v61 = vsub.f32 %v6657_v23, %v2931_v17  ;;  %5507 = vpow2.f32 %v2972_v29 }
 0x6fc   : >> { %v2978_v49 = vmul.f32 1.442695, %v2947_v61  ;;  %v5413_v61 = vld [vmem:[%s6109_s29 + $0x80] ss:$12 sps:$4 sm:$0xff]  }
 0x6fd   : >> { %v3441_v60 = vpop.permute.xlu0 %3440  ;;  %3785 = vrot.lane.b32.xlu1 %v5413_v61, %s5843_s6 }
 0x6fe   : >> { %5188 = vmatprep.subr.msk.bf16.mxu1 %vm1437_vm0, %v3441_v60  ;;  %v3482_v39 = vsel %vm1437_vm0, %v3441_v60, 0  ;;  %5509 = vpow2.f32 %v2978_v49 }
 0x6ff   : >> { %5043 = vmatpush3.bf16.xpose.msra.mxu1 %v3482_v39  ;;  %v5412_v39 = vld [vmem:[%s6109_s29 + $0x98] ss:$12 sps:$4 sm:$0xff]  }
 0x700   : >> { %3787 = vrot.lane.b32.xlu0 %v5412_v39, %s5843_s6 }
 0x701   : >> { %v3383_v33 = vpop.permute.xlu0 %3382 }
 0x703   : >> { %v2927_v22 = vpop.xlane.xlu1 %2926 }
 0x704   : >> { %v2945_v18 = vsub.f32 %v6660_v57, %v2927_v22  ;;  %3783 = vrot.lane.b32.xlu0 %v5414_v34, %s5843_s6  ;;  %v5415_v22 = vld [vmem:[%s6109_s29 + $0x50] ss:$12 sps:$4 sm:$0xff]  }
 0x705   : >> { %v3387_v63 = vpop.permute.xlu0 %3386  ;;  %3781 = vrot.lane.b32.xlu1 %v5415_v22, %s5843_s6 }
 0x706   : >> { %v2974_v8 = vmul.f32 1.442695, %v2945_v18  ;;  %v5416_v18 = vld [vmem:[%s6109_s29 + $0x38] ss:$12 sps:$4 sm:$0xff]  }
 0x707   : >> { %v3439_v62 = vpop.permute.xlu1 %3438  ;;  %v6763_v23 = vpop.eup %5507 }
 0x708   : >> { %5511 = vpow2.f32 %v2974_v8  ;;  %5189 = vmatprep.subr.msk.bf16.mxu1 %vm1437_vm0, %v3439_v62  ;;  %v3479_v20 = vsel %vm1437_vm0, %v3439_v62, 0  ;;  %3779 = vrot.lane.b32.xlu0 %v5416_v18, %s5843_s6 }
 0x709   : >> { %5513 = vpow2.f32 %v2976_v37  ;;  %5045 = vmatpush3.bf16.xpose.msra.mxu1 %v3479_v20  ;;  %v3391_v60 = vpop.permute.xlu0 %3390  ;;  %v5417_v37 = vld [vmem:[%s6109_s29 + $0x20] ss:$12 sps:$4 sm:$0xff]  }
 0x70a   : >> { %3777 = vrot.lane.b32.xlu1 %v5417_v37, %s5843_s6 }
 0x70b   : >> { %v6765_v58 = vpop.eup %5509  ;;  %v3385_v59 = vpop.permute.xlu1 %3384 }
 0x70d   : >> { %v3395_v49 = vpop.permute.xlu0 %3394 }
 0x70f   : >> { %v3389_v17 = vpop.permute.xlu1 %3388 }
 0x713   : >> { %v3393_v29 = vpop.permute.xlu1 %3392 }
 0x715   : >> { %v6767_v36 = vpop.eup %5511 }
 0x716   : >> { %v6769_v57 = vpop.eup %5513  ;;  %v3034_v3 = vpack.c.bf16 %v6767_v36, %v6763_v23 }
 0x717   : >> { %v3035_v54 = vpack.c.bf16 %v6765_v58, %v6769_v57  ;;  %v3397_v8 = vpop.permute.xlu1 %3396 }
 0x718   : >> { %5026 = vmatprep.mubr.bf16.mxu1 %v3034_v3 }
 0x719   : >> { %5027 = vmatmul.mubr.bf16.gmra.mxu1 %v3035_v54 }
 0x71a   : >> { %5046 = vmatprep.mubr.msk.bf16.mxu1 %vm1437_vm0, %v3383_v33 }
 0x721   : >> { %5047 = vmatmul.mubr.msk.bf16.vlgmr.msra.gmra.mxu1 %vm1437_vm0, %v3385_v59 }
 0x722   : >> { %5050 = vmatprep.mubr.msk.bf16.mxu1 %vm1437_vm0, %v3387_v63 }
 0x729   : >> { %5051 = vmatmul.mubr.msk.bf16.gmra.mxu1 %vm1437_vm0, %v3389_v17 }
 0x72a   : >> { %5054 = vmatprep.mubr.msk.bf16.mxu1 %vm1437_vm0, %v3391_v60 }
 0x731   : >> { %5055 = vmatmul.mubr.msk.bf16.gmra.mxu1 %vm1437_vm0, %v3393_v29 }
 0x732   : >> { %5058 = vmatprep.mubr.msk.bf16.mxu1 %vm1437_vm0, %v3395_v49 }
 0x739   : >> { %5059 = vmatmul.mubr.msk.bf16.gmra.mxu1 %vm1437_vm0, %v3397_v8 }
 0x76b   : >> { %v3790_v62 = vpop.permute.xlu1 %3789 }
 0x76c   : >> { %5062 = vmatprep.subr.bf16.mxu0 %v3790_v62 }
 0x76d   : >> { %5063 = vmatpush3.bf16.msra.mxu0 %v3790_v62 }
 0x76f   : >> { %v3786_v3 = vpop.permute.xlu1 %3785 }
 0x772   : >> { %v3788_v20 = vpop.permute.xlu0 %3787 }
 0x773   : >> { %5064 = vmatprep.subr.bf16.mxu0 %v3788_v20 }
 0x774   : >> { %5065 = vmatpush3.bf16.msra.mxu0 %v3788_v20 }
 0x775   : >> { %5066 = vmatprep.subr.bf16.mxu0 %v3786_v3 }
 0x776   : >> { %v3784_v54 = vpop.permute.xlu0 %3783 }
 0x777   : >> { %v3782_v59 = vpop.permute.xlu1 %3781 }
 0x778   : >> { %5067 = vmatpush3.bf16.msra.mxu0 %v3786_v3 }
 0x779   : >> { %5068 = vmatprep.subr.bf16.mxu0 %v3784_v54 }
 0x77a   : >> { %v3780_v63 = vpop.permute.xlu0 %3779 }
 0x77c   : >> { %5069 = vmatpush3.bf16.msra.mxu0 %v3784_v54 }
 0x77d   : >> { %5070 = vmatprep.subr.bf16.mxu0 %v3782_v59 }
 0x780   : >> { %5071 = vmatpush3.bf16.msra.mxu0 %v3782_v59 }
 0x781   : >> { %5072 = vmatprep.subr.bf16.mxu0 %v3780_v63 }
 0x784   : >> { %5073 = vmatpush3.bf16.msra.mxu0 %v3780_v63  ;;  %v3778_v63 = vpop.permute.xlu1 %3777 }
 0x785   : >> { %5074 = vmatprep.subr.bf16.mxu0 %v3778_v63 }
 0x788   : >> { %5075 = vmatpush3.bf16.msra.mxu0 %v3778_v63 }
 0x78c   : >> { %v6797_v33 = vpop.f32.mrf.mxu1 }
 0x78d   : >> { %7415 = vst [vmem:[#allocation66_spill] sm:$0xff] %v6797_v33 }
 0x78e   : >> { %v6799_v17 = vpop.f32.mrf.mxu1 }
 0x790   : >> { %v6801_v60 = vpop.f32.mrf.mxu1 }
 0x791   : >> { %7416 = vst [vmem:[#allocation67_spill] sm:$0xff] %v6801_v60 }
 0x792   : >> { %v6803_v48 = vpop.f32.mrf.mxu1 }
 0x794   : >> { %v6805_v39 = vpop.f32.mrf.mxu1 }
 0x795   : >> { %7417 = vst [vmem:[#allocation68_spill] sm:$0xff] %v6805_v39 }
 0x796   : >> { %v6807_v61 = vpop.f32.mrf.mxu1 }
 0x797   : >> { %7418 = vst [vmem:[#allocation69_spill] sm:$0xff] %v6807_v61 }
 0x798   : >> { %v6809_v34 = vpop.f32.mrf.mxu1 }
 0x799   : >> { %7419 = vst [vmem:[#allocation70_spill] sm:$0xff] %v6809_v34 }
 0x79a   : >> { %v6811_v29 = vpop.f32.mrf.mxu1 }
 0x79b   : >> { %7420 = vst [vmem:[#allocation71_spill] sm:$0xff] %v6811_v29 }
 0x7a4   : >> { %v6813_v49 = vpop.f32.mrf.mxu1 }
 0x7a5   : >> { %7421 = vst [vmem:[#allocation72_spill] sm:$0xff] %v6813_v49 }
 0x7a6   : >> { %v6815_v22 = vpop.f32.mrf.mxu1 }
 0x7a7   : >> { %7422 = vst [vmem:[#allocation73_spill] sm:$0xff] %v6815_v22  ;;  %v5418_v22 = vld [vmem:[%s6109_s29 + $0x8] ss:$12 sps:$4 sm:$0xff]  }
 0x7a8   : >> { %v6817_v18 = vpop.f32.mrf.mxu1 }
 0x7a9   : >> { %7423 = vst [vmem:[#allocation74_spill] sm:$0xff] %v6817_v18 }
 0x7aa   : >> { %v6819_v37 = vpop.f32.mrf.mxu1 }
 0x7ab   : >> { %7424 = vst [vmem:[#allocation75_spill] sm:$0xff] %v6819_v37 }
 0x7d9   : >> { %v6821_v8 = vpop.f32.mrf.mxu1 }
 0x7da   : >> { %7425 = vst [vmem:[#allocation76_spill] sm:$0xff] %v6821_v8 }
 0x7db   : >> { %v6823_v62 = vpop.f32.mrf.mxu1 }
 0x7dc   : >> { %7426 = vst [vmem:[#allocation77_spill] sm:$0xff] %v6823_v62 }
 0x7dd   : >> { %v6825_v20 = vpop.f32.mrf.mxu1 }
 0x7de   : >> { %7427 = vst [vmem:[#allocation78_spill] sm:$0xff] %v6825_v20 }
 0x7df   : >> { %v6827_v3 = vpop.f32.mrf.mxu1 }
 0x7e0   : >> { %7428 = vst [vmem:[#allocation79_spill] sm:$0xff] %v6827_v3 }
 0x7e1   : >> { %v6829_v54 = vpop.f32.mrf.mxu1 }
 0x7e2   : >> { %3603 = vmax.xlane.f32.xlu0 %v6829_v54 }
 0x7e3   : >> { %v6832_v59 = vpop.f32.mrf.mxu1 }
 0x7e5   : >> { %v6834_v34 = vpop.f32.mrf.mxu1 }
 0x7e6   : >> { %3599 = vmax.xlane.f32.xlu0 %v6832_v59 }
 0x7e7   : >> { %v6837_v8 = vpop.f32.mrf.mxu1 }
 0x7e8   : >> { %3601 = vmax.xlane.f32.xlu1 %v6837_v8 }
 0x7e9   : >> { %v6840_v20 = vpop.f32.mrf.mxu1 }
 0x7ea   : >> { %3605 = vmax.xlane.f32.xlu0 %v6834_v34 }
 0x7eb   : >> { %v6843_v39 = vpop.f32.mrf.mxu1 }
 0x7ec   : >> { %3611 = vmax.xlane.f32.xlu1 %v6840_v20 }
 0x7ed   : >> { %v6846_v3 = vpop.f32.mrf.mxu1 }
 0x7ee   : >> { %3613 = vmax.xlane.f32.xlu0 %v6846_v3 }
 0x7ef   : >> { %v6849_v62 = vpop.f32.mrf.mxu1 }
 0x7f0   : >> { %3607 = vmax.xlane.f32.xlu1 %v6843_v39 }
 0x7f1   : >> { %v6852_v63 = vpop.f32.mrf.mxu1 }
 0x7f2   : >> { %3609 = vmax.xlane.f32.xlu0 %v6849_v62 }
 0x7f3   : >> { %v6855_v29 = vpop.f32.mrf.mxu1 }
 0x7f4   : >> { %3619 = vmax.xlane.f32.xlu1 %v6852_v63 }
 0x7f5   : >> { %v6858_v61 = vpop.f32.mrf.mxu1 }
 0x7f6   : >> { %3621 = vmax.xlane.f32.xlu0 %v6858_v61 }
 0x7f7   : >> { %v6861_v18 = vpop.f32.mrf.mxu1 }
 0x7f8   : >> { %3615 = vmax.xlane.f32.xlu1 %v6855_v29 }
 0x7f9   : >> { %v6864_v49 = vpop.f32.mrf.mxu1 }
 0x7fa   : >> { %3617 = vmax.xlane.f32.xlu0 %v6861_v18 }
 0x7fb   : >> { %v6867_v60 = vpop.f32.mrf.mxu1 }
 0x7fc   : >> { %3627 = vmax.xlane.f32.xlu1 %v6864_v49 }
 0x7fd   : >> { %v6870_v33 = vpop.f32.mrf.mxu1 }
 0x7fe   : >> { %3629 = vmax.xlane.f32.xlu0 %v6870_v33 }
 0x7ff   : >> { %v6874_v37 = vpop.f32.mrf.mxu1 }
 0x800   : >> { %3623 = vmax.xlane.f32.xlu1 %v6867_v60 }
 0x802   : >> { %3625 = vmax.xlane.f32.xlu0 %v6874_v37 }
 0x804   : >> { %2281 = vadd.xlane.f32.xlu1 %v6467_v5 }
 0x808   : >> { %2297 = vadd.xlane.f32.xlu1 %v6515_v2 }
 0x80c   : >> { %2285 = vadd.xlane.f32.xlu1 %v6473_v12 }
 0x810   : >> { %2301 = vadd.xlane.f32.xlu1 %v6525_v27 }
 0x814   : >> { %2980 = vadd.xlane.f32.xlu1 %v6697_v1 }
 0x818   : >> { %2996 = vadd.xlane.f32.xlu1 %v6735_v25  ;;  %3775 = vrot.lane.b32.xlu0 %v5418_v22, %s5843_s6 }
 0x81c   : >> { %2984 = vadd.xlane.f32.xlu1 %v6704_v50 }
 0x820   : >> { %3000 = vadd.xlane.f32.xlu1 %v6743_v15  ;;  %v7429_v15 = vld [vmem:[#allocation32_spill] sm:$0xff] }
 0x824   : >> { %2289 = vadd.xlane.f32.xlu1 %v6498_v6 }
 0x828   : >> { %2305 = vadd.xlane.f32.xlu1 %v6543_v41 }
 0x82c   : >> { %2293 = vadd.xlane.f32.xlu1 %v6505_v16 }
 0x830   : >> { %2309 = vadd.xlane.f32.xlu1 %v6551_v9 }
 0x834   : >> { %2988 = vadd.xlane.f32.xlu1 %v6712_v21 }
 0x837   : >> { %2283 = vadd.xlane.f32.xlu0 %v6471_v10 }
 0x838   : >> { %3004 = vadd.xlane.f32.xlu1 %v6763_v23 }
 0x83b   : >> { %2299 = vadd.xlane.f32.xlu0 %v6523_v7 }
 0x83c   : >> { %2992 = vadd.xlane.f32.xlu1 %v6718_v31 }
 0x83f   : >> { %2287 = vadd.xlane.f32.xlu0 %v6469_v11 }
 0x840   : >> { %3008 = vadd.xlane.f32.xlu1 %v6769_v57 }
 0x843   : >> { %2303 = vadd.xlane.f32.xlu0 %v6517_v35 }
 0x844   : >> { %1663 = vadd.xlane.f32.xlu1 %v6251_v38 }
 0x847   : >> { %2982 = vadd.xlane.f32.xlu0 %v6701_v55 }
 0x848   : >> { %1679 = vadd.xlane.f32.xlu1 %v6299_v32 }
 0x84b   : >> { %2998 = vadd.xlane.f32.xlu0 %v6741_v24 }
 0x84c   : >> { %1667 = vadd.xlane.f32.xlu1 %v6257_v43 }
 0x84f   : >> { %2986 = vadd.xlane.f32.xlu0 %v6699_v44 }
 0x850   : >> { %1683 = vadd.xlane.f32.xlu1 %v6306_v45 }
 0x853   : >> { %3002 = vadd.xlane.f32.xlu0 %v6737_v28 }
 0x854   : >> { %1671 = vadd.xlane.f32.xlu1 %v6266_v46 }
 0x857   : >> { %2291 = vadd.xlane.f32.xlu0 %v6503_v13 }
 0x858   : >> { %1687 = vadd.xlane.f32.xlu1 %v6310_v19 }
 0x85b   : >> { %2307 = vadd.xlane.f32.xlu0 %v6541_v30 }
 0x85c   : >> { %1675 = vadd.xlane.f32.xlu1 %v6274_v52 }
 0x85f   : >> { %2295 = vadd.xlane.f32.xlu0 %v6500_v4 }
 0x860   : >> { %1691 = vadd.xlane.f32.xlu1 %v6319_v56 }
 0x863   : >> { %2311 = vadd.xlane.f32.xlu0 %v6553_v53 }
 0x867   : >> { %2990 = vadd.xlane.f32.xlu0 %v6716_v26 }
 0x86b   : >> { %v3604_v38 = vpop.xlane.xlu0 %3603  ;;  %3006 = vadd.xlane.f32.xlu0 %v6767_v36 }
 0x86c   : >> { %v3633_v4 = vsub.f32 %v6829_v54, %v3604_v38 }
 0x86e   : >> { %v3651_v30 = vmul.f32 1.442695, %v3633_v4 }
 0x86f   : >> { %v3600_v43 = vpop.xlane.xlu0 %3599  ;;  %2994 = vadd.xlane.f32.xlu0 %v6725_v14 }
 0x870   : >> { %v3631_v46 = vsub.f32 %v6832_v59, %v3600_v43  ;;  %v7431_v59 = vld [vmem:[#allocation33_spill] sm:$0xff] }
 0x871   : >> { %v3602_v32 = vpop.xlane.xlu1 %3601 }
 0x872   : >> { %v3647_v45 = vmul.f32 1.442695, %v3631_v46  ;;  %v3632_v52 = vsub.f32 %v6837_v8, %v3602_v32 }
 0x873   : >> { %v3606_v19 = vpop.xlane.xlu0 %3605  ;;  %3010 = vadd.xlane.f32.xlu0 %v6765_v58 }
 0x874   : >> { %v3649_v56 = vmul.f32 1.442695, %v3632_v52  ;;  %5515 = vpow2.f32 %v3647_v45  ;;  %v3634_v12 = vsub.f32 %v6834_v34, %v3606_v19 }
 0x875   : >> { %v3612_v5 = vpop.xlane.xlu1 %3611 }
 0x876   : >> { %5517 = vpow2.f32 %v3649_v56  ;;  %v3653_v35 = vmul.f32 1.442695, %v3634_v12  ;;  %v3637_v44 = vsub.f32 %v6840_v20, %v3612_v5  ;;  %v7432_v12 = vld [vmem:[#allocation51_spill] sm:$0xff] }
 0x877   : >> { %v3614_v11 = vpop.xlane.xlu0 %3613  ;;  %1665 = vadd.xlane.f32.xlu0 %v6255_v42 }
 0x878   : >> { %5519 = vpow2.f32 %v3653_v35  ;;  %v3659_v25 = vmul.f32 1.442695, %v3637_v44 }
 0x879   : >> { %v3608_v10 = vpop.xlane.xlu1 %3607 }
 0x87a   : >> { %v3635_v16 = vsub.f32 %v6843_v39, %v3608_v10 }
 0x87b   : >> { %v3610_v6 = vpop.xlane.xlu0 %3609  ;;  %1681 = vadd.xlane.f32.xlu0 %v6297_v0  ;;  %v3638_v0 = vsub.f32 %v6846_v3, %v3614_v11 }
 0x87c   : >> { %v3636_v13 = vsub.f32 %v6849_v62, %v3610_v6  ;;  %v3655_v42 = vmul.f32 1.442695, %v3635_v16 }
 0x87d   : >> { %v3620_v2 = vpop.xlane.xlu1 %3619  ;;  %v3661_v26 = vmul.f32 1.442695, %v3638_v0 }
 0x87e   : >> { %v3657_v7 = vmul.f32 1.442695, %v3636_v13  ;;  %v3641_v58 = vsub.f32 %v6852_v63, %v3620_v2  ;;  %v7433_v2 = vld [vmem:[#allocation59_spill] sm:$0xff] }
 0x87f   : >> { %v3622_v27 = vpop.xlane.xlu0 %3621  ;;  %1669 = vadd.xlane.f32.xlu0 %v6253_v40 }
 0x880   : >> { %5521 = vpow2.f32 %v3657_v7  ;;  %v3667_v8 = vmul.f32 1.442695, %v3641_v58 }
 0x881   : >> { %v3616_v41 = vpop.xlane.xlu1 %3615  ;;  %v6928_v9 = vpop.eup %5515  ;;  %5523 = vpow2.f32 %v3651_v30 }
 0x882   : >> { %5525 = vpow2.f32 %v3655_v42  ;;  %v3639_v50 = vsub.f32 %v6855_v29, %v3616_v41  ;;  %v7430_v29 = vld [vmem:[#allocation31_spill] sm:$0xff] }
 0x883   : >> { %v6931_v53 = vpop.eup %5517  ;;  %v3618_v1 = vpop.xlane.xlu0 %3617  ;;  %1685 = vadd.xlane.f32.xlu0 %v6308_v47  ;;  %v3642_v47 = vsub.f32 %v6858_v61, %v3622_v27  ;;  %5527 = vpow2.f32 %v3661_v26 }
 0x884   : >> { %v3640_v55 = vsub.f32 %v6861_v18, %v3618_v1  ;;  %v3727_v40 = vpack.c.bf16 %v6931_v53, %v6928_v9  ;;  %v3663_v28 = vmul.f32 1.442695, %v3639_v50 }
 0x885   : >> { %v3628_v21 = vpop.xlane.xlu1 %3627  ;;  %v3669_v57 = vmul.f32 1.442695, %v3642_v47  ;;  %v6945_v34 = vpop.eup %5519 }
 0x886   : >> { %5078 = vmatprep.mubr.bf16.mxu0 %v3727_v40  ;;  %v3665_v31 = vmul.f32 1.442695, %v3640_v55  ;;  %v3645_v38 = vsub.f32 %v6864_v49, %v3628_v21 }
 0x887   : >> { %v3630_v14 = vpop.xlane.xlu0 %3629  ;;  %1673 = vadd.xlane.f32.xlu0 %v6271_v51 }
 0x888   : >> { %5529 = vpow2.f32 %v3665_v31  ;;  %v3675_v45 = vmul.f32 1.442695, %v3645_v38 }
 0x889   : >> { %v3624_v24 = vpop.xlane.xlu1 %3623  ;;  %5531 = vpow2.f32 %v3659_v25 }
 0x88a   : >> { %5533 = vpow2.f32 %v3663_v28  ;;  %v3643_v39 = vsub.f32 %v6867_v60, %v3624_v24  ;;  %v3646_v60 = vsub.f32 %v6870_v33, %v3630_v14 }
 0x88b   : >> { %1689 = vadd.xlane.f32.xlu0 %v7429_v15  ;;  %v3626_v23 = vpop.xlane.xlu0 %3625 }
 0x88c   : >> { %v3644_v36 = vsub.f32 %v6874_v37, %v3626_v23  ;;  %v3671_v37 = vmul.f32 1.442695, %v3643_v39  ;;  %v3677_v46 = vmul.f32 1.442695, %v3646_v60  ;;  %v7434_v39 = vld [vmem:[#allocation53_spill] sm:$0xff]  ;;  %v7436_v60 = vld [vmem:[#allocation50_spill] sm:$0xff] }
 0x88d   : >> { %v2282_v51 = vpop.xlane.xlu1 %2281  ;;  %v6948_v18 = vpop.eup %5521 }
 0x88e   : >> { %v3673_v61 = vmul.f32 1.442695, %v3644_v36  ;;  %5535 = vrcp.f32 %v2282_v51  ;;  %v6950_v62 = vpop.eup %5523 }
 0x88f   : >> { %1677 = vadd.xlane.f32.xlu0 %v7430_v29  ;;  %v3776_v22 = vpop.permute.xlu0 %3775  ;;  %5537 = vpow2.f32 %v3669_v57  ;;  %v6952_v3 = vpop.eup %5525  ;;  %v3728_v54 = vpack.c.bf16 %v6945_v34, %v6950_v62 }
 0x890   : >> { %5076 = vmatprep.subr.bf16.mxu0 %v3776_v22  ;;  %v3729_v63 = vpack.c.bf16 %v6948_v18, %v6952_v3  ;;  %v6961_v32 = vpop.eup %5527 }
 0x891   : >> { %5077 = vmatpush3.bf16.msra.mxu0 %v3776_v22  ;;  %v2298_v20 = vpop.xlane.xlu1 %2297 }
 0x892   : >> { %5539 = vrcp.f32 %v2298_v20 }
 0x893   : >> { %5541 = vpow2.f32 %v3673_v61  ;;  %1693 = vadd.xlane.f32.xlu0 %v7431_v59 }
 0x894   : >> { %5543 = vpow2.f32 %v3667_v8  ;;  %5079 = vmatmul.mubr.bf16.vlgmr.msra.gmra.mxu0 %v3728_v54 }
 0x895   : >> { %5545 = vpow2.f32 %v3671_v37  ;;  %5082 = vmatprep.mubr.bf16.mxu0 %v3729_v63  ;;  %v2286_v43 = vpop.xlane.xlu1 %2285  ;;  %v6963_v33 = vpop.eup %5529  ;;  %v7435_v37 = vld [vmem:[#allocation61_spill] sm:$0xff] }
 0x896   : >> { %v6965_v52 = vpop.eup %5531  ;;  %5547 = vpow2.f32 %v3677_v46  ;;  %v7437_v46 = vld [vmem:[#allocation52_spill] sm:$0xff] }
 0x897   : >> { %v6967_v56 = vpop.eup %5533  ;;  %v3730_v5 = vpack.c.bf16 %v6961_v32, %v6965_v52  ;;  %5549 = vpow2.f32 %v3675_v45 }
 0x898   : >> { %v3731_v49 = vpack.c.bf16 %v6963_v33, %v6967_v56 }
 0x899   : >> { %v2302_v19 = vpop.xlane.xlu1 %2301 }
 0x89b   : >> { %v5536_v11 = vpop.eup %5535 }
 0x89c   : >> { %5083 = vmatmul.mubr.bf16.gmra.mxu0 %v3730_v5  ;;  %v2498_v6 = vmul.f32 %v5536_v11, %v7432_v12  ;;  %v6974_v4 = vpop.eup %5537 }
 0x89d   : >> { %5086 = vmatprep.mubr.bf16.mxu0 %v3731_v49  ;;  %v2981_v10 = vpop.xlane.xlu1 %2980 }
 0x89e   : >> { %2530 = vrot.lane.b32.xlu1 %v2498_v6, %s5843_s6 }
 0x89f   : >> { %v5540_v13 = vpop.eup %5539 }
 0x8a0   : >> { %v6977_v16 = vpop.eup %5541  ;;  %v2506_v35 = vmul.f32 %v5540_v13, %v7433_v2  ;;  %v7439_v13 = vld [vmem:[#allocation60_spill] sm:$0xff] }
 0x8a1   : >> { %v6980_v7 = vpop.eup %5543  ;;  %v2997_v27 = vpop.xlane.xlu1 %2996 }
 0x8a2   : >> { %v6982_v30 = vpop.eup %5545  ;;  %v3732_v42 = vpack.c.bf16 %v6974_v4, %v6980_v7  ;;  %2546 = vrot.lane.b32.xlu1 %v2506_v35, %s5843_s6 }
 0x8a3   : >> { %v3733_v41 = vpack.c.bf16 %v6977_v16, %v6982_v30  ;;  %v6989_v1 = vpop.eup %5547 }
 0x8a4   : >> { %5087 = vmatmul.mubr.bf16.gmra.mxu0 %v3732_v42  ;;  %v6991_v44 = vpop.eup %5549 }
 0x8a5   : >> { %5090 = vmatprep.mubr.bf16.mxu0 %v3733_v41  ;;  %v2985_v0 = vpop.xlane.xlu1 %2984  ;;  %v3734_v40 = vpack.c.bf16 %v6989_v1, %v6991_v44  ;;  %v7440_v41 = vld [vmem:[#allocation35_spill] sm:$0xff] }
 0x8a9   : >> { %v3001_v55 = vpop.xlane.xlu1 %3000 }
 0x8ac   : >> { %5091 = vmatmul.mubr.bf16.gmra.mxu0 %v3734_v40 }
 0x8ad   : >> { %v2290_v50 = vpop.xlane.xlu1 %2289 }
 0x8b1   : >> { %v6995_v21 = vpop.xlane.xlu1 %2305 }
 0x8b5   : >> { %v6997_v26 = vpop.xlane.xlu1 %2293 }
 0x8b9   : >> { %v6999_v31 = vpop.xlane.xlu1 %2309 }
 0x8bd   : >> { %v7001_v14 = vpop.xlane.xlu1 %2988 }
 0x8c0   : >> { %v2284_v25 = vpop.xlane.xlu0 %2283 }
 0x8c1   : >> { %5551 = vrcp.f32 %v2284_v25  ;;  %v7003_v47 = vpop.xlane.xlu1 %3004 }
 0x8c2   : >> { %5553 = vrcp.f32 %v2286_v43 }
 0x8c4   : >> { %v2300_v28 = vpop.xlane.xlu0 %2299 }
 0x8c5   : >> { %5555 = vrcp.f32 %v2300_v28  ;;  %v7005_v24 = vpop.xlane.xlu1 %2992  ;;  %v7441_v28 = vld [vmem:[#allocation73_spill] sm:$0xff] }
 0x8c6   : >> { %5557 = vrcp.f32 %v2302_v19  ;;  %v7438_v19 = vld [vmem:[#allocation58_spill] sm:$0xff] }
 0x8c8   : >> { %v2288_v15 = vpop.xlane.xlu0 %2287 }
 0x8c9   : >> { %5559 = vrcp.f32 %v2288_v15  ;;  %v7007_v23 = vpop.xlane.xlu1 %3008 }
 0x8ca   : >> { %5561 = vrcp.f32 %v2981_v10 }
 0x8cc   : >> { %v2304_v58 = vpop.xlane.xlu0 %2303 }
 0x8cd   : >> { %5563 = vrcp.f32 %v2304_v58  ;;  %v1664_v36 = vpop.xlane.xlu1 %1663 }
 0x8ce   : >> { %v5552_v57 = vpop.eup %5551  ;;  %5565 = vrcp.f32 %v1664_v36  ;;  %v7442_v36 = vld [vmem:[#allocation43_spill] sm:$0xff] }
 0x8cf   : >> { %5567 = vrcp.f32 %v2997_v27  ;;  %v2499_v51 = vmul.f32 %v5552_v57, %v7434_v39  ;;  %v5554_v61 = vpop.eup %5553 }
 0x8d0   : >> { %v2983_v29 = vpop.xlane.xlu0 %2982  ;;  %v2500_v54 = vmul.f32 %v5554_v61, %v7436_v60  ;;  %v7445_v60 = vld [vmem:[#allocation34_spill] sm:$0xff] }
 0x8d1   : >> { %5569 = vrcp.f32 %v2983_v29  ;;  %2532 = vrot.lane.b32.xlu0 %v2499_v51, %s5843_s6  ;;  %v1680_v22 = vpop.xlane.xlu1 %1679  ;;  %v7443_v29 = vld [vmem:[#allocation75_spill] sm:$0xff] }
 0x8d2   : >> { %v5556_v8 = vpop.eup %5555  ;;  %5571 = vrcp.f32 %v1680_v22 }
 0x8d3   : >> { %5573 = vrcp.f32 %v2985_v0  ;;  %v2507_v20 = vmul.f32 %v5556_v8, %v7435_v37  ;;  %v5558_v59 = vpop.eup %5557 }
 0x8d4   : >> { %v2999_v63 = vpop.xlane.xlu0 %2998  ;;  %v2508_v5 = vmul.f32 %v5558_v59, %v7438_v19 }
 0x8d5   : >> { %5575 = vrcp.f32 %v2999_v63  ;;  %2548 = vrot.lane.b32.xlu1 %v2507_v20, %s5843_s6  ;;  %2534 = vrot.lane.b32.xlu0 %v2500_v54, %s5843_s6  ;;  %v1668_v38 = vpop.xlane.xlu1 %1667 }
 0x8d6   : >> { %v5560_v43 = vpop.eup %5559  ;;  %5577 = vrcp.f32 %v1668_v38 }
 0x8d7   : >> { %5579 = vrcp.f32 %v3001_v55  ;;  %v2501_v45 = vmul.f32 %v5560_v43, %v7437_v46  ;;  %v5562_v49 = vpop.eup %5561  ;;  %v7446_v43 = vld [vmem:[#allocation67_spill] sm:$0xff] }
 0x8d8   : >> { %v2987_v11 = vpop.xlane.xlu0 %2986  ;;  %v3197_v35 = vmul.f32 %v5562_v49, %v6799_v17 }
 0x8d9   : >> { %5581 = vrcp.f32 %v2987_v11  ;;  %2536 = vrot.lane.b32.xlu1 %v2501_v45, %s5843_s6  ;;  %2550 = vrot.lane.b32.xlu0 %v2508_v5, %s5843_s6  ;;  %v1684_v10 = vpop.xlane.xlu1 %1683  ;;  %v7447_v45 = vld [vmem:[#allocation72_spill] sm:$0xff]  ;;  %v7448_v11 = vld [vmem:[#allocation42_spill] sm:$0xff] }
 0x8da   : >> { %v5564_v12 = vpop.eup %5563  ;;  %5583 = vrcp.f32 %v1684_v10 }
 0x8db   : >> { %v5566_v6 = vpop.eup %5565  ;;  %5585 = vrcp.f32 %v2290_v50  ;;  %v2509_v2 = vmul.f32 %v5564_v12, %v7439_v13 }
 0x8dc   : >> { %v5568_v27 = vpop.eup %5567  ;;  %v3003_v42 = vpop.xlane.xlu0 %3002  ;;  %v1864_v0 = vmul.f32 %v5566_v6, %v7440_v41 }
 0x8dd   : >> { %5587 = vrcp.f32 %v3003_v42  ;;  %2552 = vrot.lane.b32.xlu1 %v2509_v2, %s5843_s6  ;;  %3229 = vrot.lane.b32.xlu0 %v3197_v35, %s5842_s30  ;;  %v1672_v55 = vpop.xlane.xlu1 %1671  ;;  %v3205_v15 = vmul.f32 %v5568_v27, %v7441_v28  ;;  %v7449_v2 = vld [vmem:[#allocation74_spill] sm:$0xff]  ;;  %v7450_v27 = vld [vmem:[#allocation55_spill] sm:$0xff] }
 0x8de   : >> { %v5570_v40 = vpop.eup %5569  ;;  %5589 = vrcp.f32 %v1672_v55  ;;  %1880 = vst.msk [vmem:[#allocation3] sm:$0xff] %vm1437_vm0, %v1864_v0  ;;  %v7451_v0 = vld [vmem:[#allocation39_spill] sm:$0xff] }
 0x8df   : >> { %v5572_v25 = vpop.eup %5571  ;;  %v3198_v50 = vmul.f32 %v5570_v40, %v6803_v48  ;;  %v7444_v48 = vld [vmem:[#allocation66_spill] sm:$0xff] }
 0x8e0   : >> { %v5574_v17 = vpop.eup %5573  ;;  %v2292_v58 = vpop.xlane.xlu0 %2291  ;;  %v1872_v57 = vmul.f32 %v5572_v25, %v7442_v36 }
 0x8e1   : >> { %5591 = vrcp.f32 %v2292_v58  ;;  %3231 = vrot.lane.b32.xlu1 %v3198_v50, %s5842_s30  ;;  %3245 = vrot.lane.b32.xlu0 %v3205_v15, %s5842_s30  ;;  %v1688_v39 = vpop.xlane.xlu1 %1687  ;;  %v3199_v8 = vmul.f32 %v5574_v17, %v7444_v48  ;;  %v7452_v50 = vld [vmem:[#allocation57_spill] sm:$0xff]  ;;  %v7453_v17 = vld [vmem:[#allocation47_spill] sm:$0xff] }
 0x8e2   : >> { %v5576_v51 = vpop.eup %5575  ;;  %5593 = vrcp.f32 %v1688_v39  ;;  %1888 = vst.msk [vmem:[#allocation3 + $0x40] sm:$0xff] %vm1437_vm0, %v1872_v57  ;;  %v7454_v39 = vld [vmem:[#allocation38_spill] sm:$0xff] }
 0x8e3   : >> { %v5578_v61 = vpop.eup %5577  ;;  %v3206_v22 = vmul.f32 %v5576_v51, %v7443_v29 }
 0x8e4   : >> { %v5580_v37 = vpop.eup %5579  ;;  %v7033_v20 = vpop.xlane.xlu0 %2307  ;;  %v1866_v54 = vmul.f32 %v5578_v61, %v7445_v60 }
 0x8e5   : >> { %3247 = vrot.lane.b32.xlu1 %v3206_v22, %s5842_s30  ;;  %3233 = vrot.lane.b32.xlu0 %v3199_v8, %s5842_s30  ;;  %v1676_v59 = vpop.xlane.xlu1 %1675  ;;  %v3207_v19 = vmul.f32 %v5580_v37, %v7447_v45  ;;  %v7455_v22 = vld [vmem:[#allocation46_spill] sm:$0xff] }
 0x8e6   : >> { %v5582_v63 = vpop.eup %5581  ;;  %5595 = vrcp.f32 %v1676_v59  ;;  %1882 = vst.msk [vmem:[#allocation3 + $0x10] sm:$0xff] %vm1437_vm0, %v1866_v54 }
 0x8e7   : >> { %v5584_v38 = vpop.eup %5583  ;;  %v3200_v46 = vmul.f32 %v5582_v63, %v7446_v43 }
 0x8e8   : >> { %v5586_v5 = vpop.eup %5585  ;;  %v7041_v49 = vpop.xlane.xlu0 %2295  ;;  %v1874_v10 = vmul.f32 %v5584_v38, %v7448_v11  ;;  %v7456_v38 = vld [vmem:[#allocation37_spill] sm:$0xff] }
 0x8e9   : >> { %3235 = vrot.lane.b32.xlu1 %v3200_v46, %s5842_s30  ;;  %3249 = vrot.lane.b32.xlu0 %v3207_v19, %s5842_s30  ;;  %v1692_v12 = vpop.xlane.xlu1 %1691  ;;  %v2502_v42 = vmul.f32 %v5586_v5, %v7450_v27  ;;  %v7457_v5 = vld [vmem:[#allocation45_spill] sm:$0xff] }
 0x8ea   : >> { %v5588_v6 = vpop.eup %5587  ;;  %5597 = vrcp.f32 %v1692_v12  ;;  %1890 = vst.msk [vmem:[#allocation3 + $0x50] sm:$0xff] %vm1437_vm0, %v1874_v10 }
 0x8eb   : >> { %v5590_v13 = vpop.eup %5589  ;;  %v3208_v35 = vmul.f32 %v5588_v6, %v7449_v2  ;;  %v7459_v2 = vld [vmem:[#allocation44_spill] sm:$0xff] }
 0x8ec   : >> { %v7049_v41 = vpop.xlane.xlu0 %2311  ;;  %v1868_v55 = vmul.f32 %v5590_v13, %v7451_v0 }
 0x8ed   : >> { %3251 = vrot.lane.b32.xlu1 %v3208_v35, %s5842_s30  ;;  %2538 = vrot.lane.b32.xlu0 %v2502_v42, %s5843_s6  ;;  %v7460_v42 = vld [vmem:[#allocation41_spill] sm:$0xff] }
 0x8ee   : >> { %v5592_v40 = vpop.eup %5591  ;;  %1884 = vst.msk [vmem:[#allocation3 + $0x20] sm:$0xff] %vm1437_vm0, %v1868_v55 }
 0x8ef   : >> { %v5594_v25 = vpop.eup %5593  ;;  %v2503_v28 = vmul.f32 %v5592_v40, %v7452_v50  ;;  %v7468_v50 = vld [vmem:[#allocation62_spill] sm:$0xff] }
 0x8f0   : >> { %v7056_v15 = vpop.xlane.xlu0 %2990  ;;  %v1876_v58 = vmul.f32 %v5594_v25, %v7453_v17 }
 0x8f1   : >> { %2540 = vrot.lane.b32.xlu1 %v2503_v28, %s5843_s6 }
 0x8f2   : >> { %1892 = vst.msk [vmem:[#allocation3 + $0x60] sm:$0xff] %vm1437_vm0, %v1876_v58 }
 0x8f3   : >> { %v5596_v36 = vpop.eup %5595 }
 0x8f4   : >> { %v7061_v57 = vpop.xlane.xlu0 %3006  ;;  %v1870_v51 = vmul.f32 %v5596_v36, %v7454_v39  ;;  %v7470_v39 = vld [vmem:[#allocation69_spill] sm:$0xff] }
 0x8f6   : >> { %1886 = vst.msk [vmem:[#allocation3 + $0x30] sm:$0xff] %vm1437_vm0, %v1870_v51 }
 0x8f7   : >> { %v5598_v61 = vpop.eup %5597 }
 0x8f8   : >> { %v7065_v29 = vpop.xlane.xlu0 %2994  ;;  %v1878_v48 = vmul.f32 %v5598_v61, %v7455_v22 }
 0x8fa   : >> { %1894 = vst.msk [vmem:[#allocation3 + $0x70] sm:$0xff] %vm1437_vm0, %v1878_v48 }
 0x8fc   : >> { %v7069_v8 = vpop.xlane.xlu0 %3010 }
 0x900   : >> { %v1666_v37 = vpop.xlane.xlu0 %1665 }
 0x901   : >> { %5599 = vrcp.f32 %v1666_v37 }
 0x904   : >> { %v1682_v60 = vpop.xlane.xlu0 %1681 }
 0x905   : >> { %5601 = vrcp.f32 %v1682_v60  ;;  %v7472_v60 = vld [vmem:[#allocation77_spill] sm:$0xff] }
 0x908   : >> { %v1670_v54 = vpop.xlane.xlu0 %1669 }
 0x909   : >> { %5603 = vrcp.f32 %v1670_v54 }
 0x90c   : >> { %v1686_v59 = vpop.xlane.xlu0 %1685  ;;  %3685 = vadd.xlane.f32.xlu0 %v6945_v34 }
 0x90d   : >> { %5605 = vrcp.f32 %v1686_v59 }
 0x90e   : >> { %v5600_v63 = vpop.eup %5599 }
 0x90f   : >> { %v1865_v43 = vmul.f32 %v5600_v63, %v7456_v38 }
 0x910   : >> { %v1674_v46 = vpop.xlane.xlu0 %1673  ;;  %3681 = vadd.xlane.f32.xlu0 %v6931_v53  ;;  %v2531_v45 = vpop.permute.xlu1 %2530  ;;  %v7458_v53 = vld [vmem:[#allocation36_spill] sm:$0xff] }
 0x911   : >> { %5607 = vrcp.f32 %v1674_v46  ;;  %1881 = vst.msk [vmem:[#allocation3 + $0x8] sm:$0xff] %vm1437_vm0, %v1865_v43  ;;  %v7473_v46 = vld [vmem:[#allocation79_spill] sm:$0xff] }
 0x912   : >> { %v5602_v19 = vpop.eup %5601  ;;  %2579 = vst.msk [vmem:[#allocation3] sm:$0xff] %vm2578_vm1, %v2531_v45 }
 0x913   : >> { %v1873_v11 = vmul.f32 %v5602_v19, %v7457_v5  ;;  %v7474_v19 = vld [vmem:[#allocation68_spill] sm:$0xff] }
 0x914   : >> { %v1690_v10 = vpop.xlane.xlu0 %1689  ;;  %3693 = vadd.xlane.f32.xlu0 %v6961_v32  ;;  %v2547_v34 = vpop.permute.xlu1 %2546 }
 0x915   : >> { %5609 = vrcp.f32 %v1690_v10  ;;  %3683 = vadd.xlane.f32.xlu1 %v6950_v62  ;;  %1889 = vst.msk [vmem:[#allocation3 + $0x48] sm:$0xff] %vm1437_vm0, %v1873_v11 }
 0x916   : >> { %v5604_v12 = vpop.eup %5603  ;;  %2587 = vst.msk [vmem:[#allocation3 + $0x40] sm:$0xff] %vm2578_vm1, %v2547_v34 }
 0x917   : >> { %v1867_v6 = vmul.f32 %v5604_v12, %v7458_v53  ;;  %v7475_v12 = vld [vmem:[#allocation70_spill] sm:$0xff] }
 0x918   : >> { %v1678_v13 = vpop.xlane.xlu0 %1677  ;;  %3689 = vadd.xlane.f32.xlu0 %v6948_v18  ;;  %v7461_v18 = vld [vmem:[#allocation49_spill] sm:$0xff] }
 0x919   : >> { %5611 = vrcp.f32 %v1678_v13  ;;  %3679 = vadd.xlane.f32.xlu1 %v6928_v9  ;;  %1883 = vst.msk [vmem:[#allocation3 + $0x18] sm:$0xff] %vm1437_vm0, %v1867_v6  ;;  %v7476_v6 = vld [vmem:[#allocation76_spill] sm:$0xff] }
 0x91a   : >> { %v5606_v32 = vpop.eup %5605 }
 0x91b   : >> { %v1875_v35 = vmul.f32 %v5606_v32, %v7459_v2 }
 0x91c   : >> { %v1694_v27 = vpop.xlane.xlu0 %1693  ;;  %3701 = vadd.xlane.f32.xlu0 %v6974_v4  ;;  %v7462_v4 = vld [vmem:[#allocation40_spill] sm:$0xff] }
 0x91d   : >> { %5613 = vrcp.f32 %v1694_v27  ;;  %3691 = vadd.xlane.f32.xlu1 %v6965_v52  ;;  %1891 = vst.msk [vmem:[#allocation3 + $0x58] sm:$0xff] %vm1437_vm0, %v1875_v35  ;;  %v7477_v27 = vld [vmem:[#allocation29_spill] sm:$0xff] }
 0x91e   : >> { %v5608_v62 = vpop.eup %5607  ;;  %5615 = vrcp.f32 %v6995_v21  ;;  %v7465_v21 = vld [vmem:[#allocation65_spill] sm:$0xff] }
 0x91f   : >> { %v1869_v0 = vmul.f32 %v5608_v62, %v7460_v42  ;;  %5617 = vrcp.f32 %v6997_v26  ;;  %v7478_v62 = vld [vmem:[#allocation28_spill] sm:$0xff] }
 0x920   : >> { %3697 = vadd.xlane.f32.xlu0 %v6963_v33  ;;  %v7463_v33 = vld [vmem:[#allocation48_spill] sm:$0xff]  ;;  %5619 = vrcp.f32 %v7033_v20  ;;  %v4549_v42 = vcombine.low %v7478_v62, %v7477_v27 }
 0x921   : >> { %3687 = vadd.xlane.f32.xlu1 %v6952_v3  ;;  %1885 = vst.msk [vmem:[#allocation3 + $0x28] sm:$0xff] %vm1437_vm0, %v1869_v0  ;;  %5621 = vrcp.f32 %v6999_v31  ;;  %v7466_v31 = vld [vmem:[#allocation54_spill] sm:$0xff]  ;;  %v7479_v0 = vld [vmem:[#allocation27_spill] sm:$0xff] }
 0x922   : >> { %v5610_v9 = vpop.eup %5609  ;;  %5623 = vrcp.f32 %v7041_v49  ;;  %5094 = vmatprep.subr.bf16.mxu0 %v4549_v42  ;;  %5142 = vmatprep.subr.bf16.mxu1 %v4549_v42 }
 0x923   : >> { %v1877_v55 = vmul.f32 %v5610_v9, %v7461_v18  ;;  %5625 = vrcp.f32 %v7001_v14  ;;  %v7480_v9 = vld [vmem:[#allocation26_spill] sm:$0xff]  ;;  %5095 = vmatpush3.bf16.msra.mxu0 %v4549_v42  ;;  %5150 = vmatpush3.bf16.msra.mxu1 %v4549_v42 }
 0x924   : >> { %3709 = vadd.xlane.f32.xlu0 %v6989_v1  ;;  %5627 = vrcp.f32 %v7049_v41  ;;  %v4548_v18 = vcombine.low %v7480_v9, %v7479_v0 }
 0x925   : >> { %3699 = vadd.xlane.f32.xlu1 %v6980_v7  ;;  %1893 = vst.msk [vmem:[#allocation3 + $0x68] sm:$0xff] %vm1437_vm0, %v1877_v55  ;;  %5629 = vrcp.f32 %v7003_v47  ;;  %v7464_v7 = vld [vmem:[#allocation63_spill] sm:$0xff]  ;;  %v7481_v55 = vld [vmem:[#allocation78_spill] sm:$0xff] }
 0x926   : >> { %v5612_v52 = vpop.eup %5611  ;;  %5631 = vrcp.f32 %v7056_v15  ;;  %5096 = vmatprep.subr.bf16.mxu0 %v4548_v18  ;;  %5143 = vmatprep.subr.bf16.mxu1 %v4548_v18 }
 0x927   : >> { %v1871_v40 = vmul.f32 %v5612_v52, %v7462_v4  ;;  %5633 = vrcp.f32 %v7005_v24  ;;  %v7467_v24 = vld [vmem:[#allocation56_spill] sm:$0xff]  ;;  %5097 = vmatpush3.bf16.msra.mxu0 %v4548_v18  ;;  %5151 = vmatpush3.bf16.msra.mxu1 %v4548_v18 }
 0x928   : >> { %3705 = vadd.xlane.f32.xlu0 %v6977_v16  ;;  %5635 = vrcp.f32 %v7061_v57 }
 0x929   : >> { %3695 = vadd.xlane.f32.xlu1 %v6967_v56  ;;  %1887 = vst.msk [vmem:[#allocation3 + $0x38] sm:$0xff] %vm1437_vm0, %v1871_v40  ;;  %5637 = vrcp.f32 %v7007_v23  ;;  %v7469_v23 = vld [vmem:[#allocation64_spill] sm:$0xff] }
 0x92a   : >> { %v5614_v3 = vpop.eup %5613  ;;  %5639 = vrcp.f32 %v7065_v29 }
 0x92b   : >> { %v1879_v25 = vmul.f32 %v5614_v3, %v7463_v33  ;;  %v5616_v56 = vpop.eup %5615  ;;  %5641 = vrcp.f32 %v7069_v8  ;;  %v7471_v8 = vld [vmem:[#allocation71_spill] sm:$0xff] }
 0x92c   : >> { %v5618_v16 = vpop.eup %5617  ;;  %v2510_v1 = vmul.f32 %v5616_v56, %v7464_v7 }
 0x92d   : >> { %3707 = vadd.xlane.f32.xlu1 %v6991_v44  ;;  %1895 = vst.msk [vmem:[#allocation3 + $0x78] sm:$0xff] %vm1437_vm0, %v1879_v25  ;;  %v5620_v44 = vpop.eup %5619  ;;  %v2504_v14 = vmul.f32 %v5618_v16, %v7466_v31  ;;  %v7482_v31 = vld [vmem:[#allocation25_spill] sm:$0xff] }
 0x92e   : >> { %v2511_v26 = vmul.f32 %v5620_v44, %v7465_v21 }
 0x931   : >> { %3703 = vadd.xlane.f32.xlu1 %v6982_v30  ;;  %v5622_v30 = vpop.eup %5621 }
 0x932   : >> { %v5624_v20 = vpop.eup %5623  ;;  %v2512_v28 = vmul.f32 %v5622_v30, %v7468_v50 }
 0x933   : >> { %v5626_v49 = vpop.eup %5625  ;;  %v2505_v41 = vmul.f32 %v5624_v20, %v7467_v24  ;;  %v7484_v24 = vld [vmem:[#allocation23_spill] sm:$0xff] }
 0x934   : >> { %v5628_v15 = vpop.eup %5627  ;;  %v3201_v51 = vmul.f32 %v5626_v49, %v7470_v39 }
 0x935   : >> { %v5630_v36 = vpop.eup %5629  ;;  %v2513_v57 = vmul.f32 %v5628_v15, %v7469_v23  ;;  %v7487_v15 = vld [vmem:[#allocation20_spill] sm:$0xff] }
 0x936   : >> { %v5632_v61 = vpop.eup %5631  ;;  %v3209_v54 = vmul.f32 %v5630_v36, %v7472_v60 }
 0x937   : >> { %v5634_v48 = vpop.eup %5633  ;;  %v3202_v37 = vmul.f32 %v5632_v61, %v7471_v8 }
 0x938   : >> { %v5636_v59 = vpop.eup %5635  ;;  %v3203_v5 = vmul.f32 %v5634_v48, %v7474_v19  ;;  %v7489_v48 = vld [vmem:[#allocation18_spill] sm:$0xff] }
 0x939   : >> { %v5638_v43 = vpop.eup %5637  ;;  %v3210_v45 = vmul.f32 %v5636_v59, %v7473_v46 }
 0x93a   : >> { %v5640_v11 = vpop.eup %5639  ;;  %v3211_v13 = vmul.f32 %v5638_v43, %v7476_v6  ;;  %v7491_v43 = vld [vmem:[#allocation16_spill] sm:$0xff] }
 0x93b   : >> { %v3204_v53 = vmul.f32 %v5640_v11, %v7475_v12  ;;  %v5642_v32 = vpop.eup %5641  ;;  %v7493_v12 = vld [vmem:[#allocation14_spill] sm:$0xff] }
 0x93c   : >> { %v3212_v52 = vmul.f32 %v5642_v32, %v7481_v55 }
 0x93e   : >> { %2554 = vrot.lane.b32.xlu0 %v2510_v1, %s5843_s6 }
 0x942   : >> { %2556 = vrot.lane.b32.xlu1 %v2511_v26, %s5843_s6  ;;  %2542 = vrot.lane.b32.xlu0 %v2504_v14, %s5843_s6  ;;  %v7483_v14 = vld [vmem:[#allocation24_spill] sm:$0xff] }
 0x943   : >> { %v2533_v47 = vpop.permute.xlu0 %2532  ;;  %v4547_v20 = vcombine.low %v7483_v14, %v7482_v31 }
 0x944   : >> { %2580 = vst.msk [vmem:[#allocation3 + $0x8] sm:$0xff] %vm2578_vm1, %v2533_v47 }
 0x945   : >> { %5098 = vmatprep.subr.bf16.mxu0 %v4547_v20  ;;  %5144 = vmatprep.subr.bf16.mxu1 %v4547_v20 }
 0x946   : >> { %2544 = vrot.lane.b32.xlu1 %v2505_v41, %s5843_s6  ;;  %2558 = vrot.lane.b32.xlu0 %v2512_v28, %s5843_s6  ;;  %v7485_v41 = vld [vmem:[#allocation22_spill] sm:$0xff]  ;;  %v7486_v28 = vld [vmem:[#allocation21_spill] sm:$0xff] }
 0x947   : >> { %v2535_v17 = vpop.permute.xlu0 %2534  ;;  %v2549_v58 = vpop.permute.xlu1 %2548  ;;  %5099 = vmatpush3.bf16.msra.mxu0 %v4547_v20  ;;  %5152 = vmatpush3.bf16.msra.mxu1 %v4547_v20  ;;  %v4546_v50 = vcombine.low %v7485_v41, %v7484_v24 }
 0x948   : >> { %2581 = vst.msk [vmem:[#allocation3 + $0x10] sm:$0xff] %vm2578_vm1, %v2535_v17  ;;  %2588 = vst.msk [vmem:[#allocation3 + $0x48] sm:$0xff] %vm2578_vm1, %v2549_v58  ;;  %v4545_v17 = vcombine.low %v7487_v15, %v7486_v28 }
 0x949   : >> { %5100 = vmatprep.subr.bf16.mxu0 %v4546_v50  ;;  %5145 = vmatprep.subr.bf16.mxu1 %v4546_v50 }
 0x94a   : >> { %2560 = vrot.lane.b32.xlu1 %v2513_v57, %s5843_s6  ;;  %3237 = vrot.lane.b32.xlu0 %v3201_v51, %s5842_s30 }
 0x94b   : >> { %v2551_v29 = vpop.permute.xlu0 %2550  ;;  %v2537_v22 = vpop.permute.xlu1 %2536  ;;  %5101 = vmatpush3.bf16.msra.mxu0 %v4546_v50  ;;  %5153 = vmatpush3.bf16.msra.mxu1 %v4546_v50 }
 0x94c   : >> { %2589 = vst.msk [vmem:[#allocation3 + $0x50] sm:$0xff] %vm2578_vm1, %v2551_v29  ;;  %2582 = vst.msk [vmem:[#allocation3 + $0x18] sm:$0xff] %vm2578_vm1, %v2537_v22  ;;  %5102 = vmatprep.subr.bf16.mxu0 %v4545_v17  ;;  %5146 = vmatprep.subr.bf16.mxu1 %v4545_v17  ;;  %v7488_v22 = vld [vmem:[#allocation19_spill] sm:$0xff] }
 0x94d   : >> { %v4544_v8 = vcombine.low %v7489_v48, %v7488_v22 }
 0x94e   : >> { %3239 = vrot.lane.b32.xlu1 %v3202_v37, %s5842_s30  ;;  %3253 = vrot.lane.b32.xlu0 %v3209_v54, %s5842_s30 }
 0x94f   : >> { %v3230_v63 = vpop.permute.xlu0 %3229  ;;  %v2553_v38 = vpop.permute.xlu1 %2552  ;;  %5103 = vmatpush3.bf16.msra.mxu0 %v4545_v17  ;;  %5154 = vmatpush3.bf16.msra.mxu1 %v4545_v17 }
 0x950   : >> { %3278 = vst.msk [vmem:[#allocation3] sm:$0xff] %vm3277_vm2, %v3230_v63  ;;  %5104 = vmatprep.subr.bf16.mxu0 %v4544_v8  ;;  %5147 = vmatprep.subr.bf16.mxu1 %v4544_v8 }
 0x951   : >> { %2590 = vst.msk [vmem:[#allocation3 + $0x58] sm:$0xff] %vm2578_vm1, %v2553_v38  ;;  %v7490_v38 = vld [vmem:[#allocation17_spill] sm:$0xff] }
 0x952   : >> { %3255 = vrot.lane.b32.xlu1 %v3210_v45, %s5842_s30  ;;  %3241 = vrot.lane.b32.xlu0 %v3203_v5, %s5842_s30  ;;  %v4543_v46 = vcombine.low %v7491_v43, %v7490_v38 }
 0x953   : >> { %v3246_v10 = vpop.permute.xlu0 %3245  ;;  %v3232_v34 = vpop.permute.xlu1 %3231  ;;  %5105 = vmatpush3.bf16.msra.mxu0 %v4544_v8  ;;  %5155 = vmatpush3.bf16.msra.mxu1 %v4544_v8 }
 0x954   : >> { %3286 = vst.msk [vmem:[#allocation3 + $0x40] sm:$0xff] %vm3277_vm2, %v3246_v10  ;;  %3279 = vst.msk [vmem:[#allocation3 + $0x8] sm:$0xff] %vm3277_vm2, %v3232_v34  ;;  %v7167_v56 = vpop.f32.mrf.mxu0  ;;  %5106 = vmatprep.subr.bf16.mxu0 %v4543_v46  ;;  %5148 = vmatprep.subr.bf16.mxu1 %v4543_v46  ;;  %v7492_v34 = vld [vmem:[#allocation15_spill] sm:$0xff] }
 0x956   : >> { %3243 = vrot.lane.b32.xlu1 %v3204_v53, %s5842_s30  ;;  %3257 = vrot.lane.b32.xlu0 %v3211_v13, %s5842_s30  ;;  %v7169_v16 = vpop.f32.mrf.mxu0  ;;  %v4542_v53 = vcombine.low %v7493_v12, %v7492_v34 }
 0x957   : >> { %v3234_v2 = vpop.permute.xlu0 %3233  ;;  %v3248_v35 = vpop.permute.xlu1 %3247  ;;  %5107 = vmatpush3.bf16.msra.mxu0 %v4543_v46  ;;  %5156 = vmatpush3.bf16.msra.mxu1 %v4543_v46 }
 0x958   : >> { %3280 = vst.msk [vmem:[#allocation3 + $0x10] sm:$0xff] %vm3277_vm2, %v3234_v2  ;;  %3287 = vst.msk [vmem:[#allocation3 + $0x48] sm:$0xff] %vm3277_vm2, %v3248_v35  ;;  %v5081_v7 = vpop.f32.mrf.mxu0  ;;  %5108 = vmatprep.subr.bf16.mxu0 %v4542_v53  ;;  %5149 = vmatprep.subr.bf16.mxu1 %v4542_v53 }
 0x95a   : >> { %3259 = vrot.lane.b32.xlu1 %v3212_v52, %s5842_s30  ;;  %v3836_v1 = vpop.f32.mrf.mxu0 }
 0x95b   : >> { %v3250_v4 = vpop.permute.xlu0 %3249  ;;  %v3236_v40 = vpop.permute.xlu1 %3235  ;;  %5109 = vmatpush3.bf16.msra.mxu0 %v4542_v53  ;;  %5157 = vmatpush3.bf16.msra.mxu1 %v4542_v53 }
 0x95c   : >> { %3288 = vst.msk [vmem:[#allocation3 + $0x50] sm:$0xff] %vm3277_vm2, %v3250_v4  ;;  %3281 = vst.msk [vmem:[#allocation3 + $0x18] sm:$0xff] %vm3277_vm2, %v3236_v40  ;;  %v7171_v44 = vpop.f32.mrf.mxu0 }
 0x95e   : >> { %v7173_v21 = vpop.f32.mrf.mxu0 }
 0x95f   : >> { %v2539_v3 = vpop.permute.xlu0 %2538  ;;  %v3252_v33 = vpop.permute.xlu1 %3251 }
 0x960   : >> { %2583 = vst.msk [vmem:[#allocation3 + $0x20] sm:$0xff] %vm2578_vm1, %v2539_v3  ;;  %v7177_v47 = vpop.f32.mrf.mxu0 }
 0x961   : >> { %3289 = vst.msk [vmem:[#allocation3 + $0x58] sm:$0xff] %vm3277_vm2, %v3252_v33 }
 0x962   : >> { %v3852_v36 = vpop.f32.mrf.mxu0 }
 0x963   : >> { %v2541_v25 = vpop.permute.xlu1 %2540 }
 0x964   : >> { %2584 = vst.msk [vmem:[#allocation3 + $0x28] sm:$0xff] %vm2578_vm1, %v2541_v25  ;;  %v7183_v51 = vpop.f32.mrf.mxu0 }
 0x966   : >> { %v7188_v54 = vpop.f32.mrf.mxu0 }
 0x968   : >> { %v5089_v19 = vpop.f32.mrf.mxu0 }
 0x96a   : >> { %v3868_v32 = vpop.f32.mrf.mxu0 }
 0x96c   : >> { %v7199_v9 = vpop.f32.mrf.mxu0 }
 0x96e   : >> { %v3881_v40 = vpop.f32.mrf.mxu0 }
 0x995   : >> { %v3686_v30 = vpop.xlane.xlu0 %3685 }
 0x996   : >> { %5643 = vrcp.f32 %v3686_v30 }
 0x999   : >> { %v3682_v26 = vpop.xlane.xlu0 %3681 }
 0x99a   : >> { %5645 = vrcp.f32 %v3682_v26 }
 0x99d   : >> { %v3694_v49 = vpop.xlane.xlu0 %3693 }
 0x99e   : >> { %v3684_v58 = vpop.xlane.xlu1 %3683 }
 0x99f   : >> { %5647 = vrcp.f32 %v3684_v58 }
 0x9a1   : >> { %v3690_v23 = vpop.xlane.xlu0 %3689 }
 0x9a2   : >> { %5649 = vrcp.f32 %v3690_v23  ;;  %v3680_v57 = vpop.xlane.xlu1 %3679 }
 0x9a3   : >> { %v5644_v39 = vpop.eup %5643  ;;  %5651 = vrcp.f32 %v3680_v57 }
 0x9a4   : >> { %v3899_v61 = vmul.f32 %v5644_v39, %v5081_v7 }
 0x9a5   : >> { %v3702_v29 = vpop.xlane.xlu0 %3701 }
 0x9a6   : >> { %5653 = vrcp.f32 %v3702_v29  ;;  %3934 = vrot.lane.b32.xlu1 %v3899_v61, %s5841_s26  ;;  %v3692_v37 = vpop.xlane.xlu1 %3691 }
 0x9a7   : >> { %v5646_v60 = vpop.eup %5645 }
 0x9a8   : >> { %v3897_v59 = vmul.f32 %v5646_v60, %v3836_v1  ;;  %v5093_v1 = vpop.f32.mrf.mxu0 }
 0x9a9   : >> { %v3698_v63 = vpop.xlane.xlu0 %3697 }
 0x9aa   : >> { %5655 = vrcp.f32 %v3698_v63  ;;  %3930 = vrot.lane.b32.xlu1 %v3897_v59, %s5841_s26  ;;  %v3688_v45 = vpop.xlane.xlu1 %3687 }
 0x9ab   : >> { %5657 = vrcp.f32 %v3688_v45 }
 0x9ac   : >> { %v5648_v5 = vpop.eup %5647  ;;  %5659 = vrcp.f32 %v3694_v49  ;;  %v3884_v49 = vpop.f32.mrf.mxu0 }
 0x9ad   : >> { %v3710_v11 = vpop.xlane.xlu0 %3709  ;;  %v3898_v10 = vmul.f32 %v5648_v5, %v7167_v56 }
 0x9ae   : >> { %v3700_v6 = vpop.xlane.xlu1 %3699 }
 0x9af   : >> { %v5650_v13 = vpop.eup %5649  ;;  %5661 = vrcp.f32 %v3700_v6  ;;  %3932 = vrot.lane.b32.xlu0 %v3898_v10, %s5841_s26 }
 0x9b0   : >> { %v5652_v2 = vpop.eup %5651  ;;  %v3901_v35 = vmul.f32 %v5650_v13, %v3852_v36 }
 0x9b1   : >> { %v3706_v27 = vpop.xlane.xlu0 %3705  ;;  %v3896_v62 = vmul.f32 %v5652_v2, %v7169_v16 }
 0x9b2   : >> { %5663 = vrcp.f32 %v3706_v27  ;;  %3938 = vrot.lane.b32.xlu1 %v3901_v35, %s5841_s26  ;;  %v3696_v42 = vpop.xlane.xlu1 %3695 }
 0x9b3   : >> { %v5654_v0 = vpop.eup %5653  ;;  %5665 = vrcp.f32 %v3696_v42  ;;  %3928 = vrot.lane.b32.xlu0 %v3896_v62, %s5841_s26 }
 0x9b4   : >> { %5667 = vrcp.f32 %v3710_v11  ;;  %v3907_v18 = vmul.f32 %v5654_v0, %v5089_v19 }
 0x9b5   : >> { %5669 = vrcp.f32 %v3692_v37  ;;  %v2555_v55 = vpop.permute.xlu0 %2554 }
 0x9b6   : >> { %2591 = vst.msk [vmem:[#allocation3 + $0x60] sm:$0xff] %vm2578_vm1, %v2555_v55  ;;  %3950 = vrot.lane.b32.xlu1 %v3907_v18, %s5841_s26  ;;  %v3708_v52 = vpop.xlane.xlu1 %3707 }
 0x9b7   : >> { %v5656_v4 = vpop.eup %5655 }
 0x9b8   : >> { %v5658_v3 = vpop.eup %5657  ;;  %v3905_v33 = vmul.f32 %v5656_v4, %v3868_v32 }
 0x9b9   : >> { %v5660_v25 = vpop.eup %5659  ;;  %v2543_v56 = vpop.permute.xlu0 %2542  ;;  %v3900_v16 = vmul.f32 %v5658_v3, %v7173_v21 }
 0x9ba   : >> { %2585 = vst.msk [vmem:[#allocation3 + $0x30] sm:$0xff] %vm2578_vm1, %v2543_v56  ;;  %3946 = vrot.lane.b32.xlu1 %v3905_v33, %s5841_s26  ;;  %v3704_v7 = vpop.xlane.xlu1 %3703  ;;  %v3903_v26 = vmul.f32 %v5660_v25, %v7177_v47 }
 0x9bb   : >> { %5671 = vrcp.f32 %v3704_v7  ;;  %3936 = vrot.lane.b32.xlu0 %v3900_v16, %s5841_s26 }
 0x9bc   : >> { %v5662_v30 = vpop.eup %5661  ;;  %5673 = vrcp.f32 %v3708_v52 }
 0x9bd   : >> { %v2559_v31 = vpop.permute.xlu0 %2558  ;;  %v3906_v14 = vmul.f32 %v5662_v30, %v7183_v51 }
 0x9be   : >> { %2593 = vst.msk [vmem:[#allocation3 + $0x70] sm:$0xff] %vm2578_vm1, %v2559_v31  ;;  %3942 = vrot.lane.b32.xlu1 %v3903_v26, %s5841_s26  ;;  %v2557_v21 = vpop.permute.xlu1 %2556 }
 0x9bf   : >> { %v5664_v20 = vpop.eup %5663  ;;  %2592 = vst.msk [vmem:[#allocation3 + $0x68] sm:$0xff] %vm2578_vm1, %v2557_v21  ;;  %3948 = vrot.lane.b32.xlu0 %v3906_v14, %s5841_s26 }
 0x9c0   : >> { %v5666_v24 = vpop.eup %5665  ;;  %v3909_v41 = vmul.f32 %v5664_v20, %v3884_v49  ;;  %v7494_v20 = vld [vmem:[#allocation30_spill] sm:$0xff] }
 0x9c1   : >> { %v5668_v50 = vpop.eup %5667  ;;  %v3238_v28 = vpop.permute.xlu0 %3237  ;;  %v3904_v47 = vmul.f32 %v5666_v24, %v7188_v54 }
 0x9c2   : >> { %v5670_v15 = vpop.eup %5669  ;;  %3282 = vst.msk [vmem:[#allocation3 + $0x20] sm:$0xff] %vm3277_vm2, %v3238_v28  ;;  %3954 = vrot.lane.b32.xlu1 %v3909_v41, %s5841_s26  ;;  %v2545_v17 = vpop.permute.xlu1 %2544  ;;  %v3911_v58 = vmul.f32 %v5668_v50, %v5093_v1 }
 0x9c3   : >> { %2586 = vst.msk [vmem:[#allocation3 + $0x38] sm:$0xff] %vm2578_vm1, %v2545_v17  ;;  %3944 = vrot.lane.b32.xlu0 %v3904_v47, %s5841_s26  ;;  %v3902_v23 = vmul.f32 %v5670_v15, %v7171_v44 }
 0x9c5   : >> { %v3254_v36 = vpop.permute.xlu0 %3253 }
 0x9c6   : >> { %3290 = vst.msk [vmem:[#allocation3 + $0x60] sm:$0xff] %vm3277_vm2, %v3254_v36  ;;  %3958 = vrot.lane.b32.xlu1 %v3911_v58, %s5841_s26  ;;  %v2561_v57 = vpop.permute.xlu1 %2560 }
 0x9c7   : >> { %2594 = vst.msk [vmem:[#allocation3 + $0x78] sm:$0xff] %vm2578_vm1, %v2561_v57  ;;  %3940 = vrot.lane.b32.xlu0 %v3902_v23, %s5841_s26 }
 0x9c8   : >> { %v5672_v39 = vpop.eup %5671 }
 0x9c9   : >> { %v3242_v51 = vpop.permute.xlu0 %3241  ;;  %v3908_v61 = vmul.f32 %v5672_v39, %v3881_v40  ;;  %v5674_v29 = vpop.eup %5673 }
 0x9ca   : >> { %3284 = vst.msk [vmem:[#allocation3 + $0x30] sm:$0xff] %vm3277_vm2, %v3242_v51  ;;  %v3240_v22 = vpop.permute.xlu1 %3239  ;;  %v3910_v48 = vmul.f32 %v5674_v29, %v7199_v9 }
 0x9cb   : >> { %3283 = vst.msk [vmem:[#allocation3 + $0x28] sm:$0xff] %vm3277_vm2, %v3240_v22  ;;  %3952 = vrot.lane.b32.xlu0 %v3908_v61, %s5841_s26 }
 0x9cd   : >> { %v3258_v44 = vpop.permute.xlu0 %3257 }
 0x9ce   : >> { %3292 = vst.msk [vmem:[#allocation3 + $0x70] sm:$0xff] %vm3277_vm2, %v3258_v44  ;;  %v3256_v8 = vpop.permute.xlu1 %3255 }
 0x9cf   : >> { %3291 = vst.msk [vmem:[#allocation3 + $0x68] sm:$0xff] %vm3277_vm2, %v3256_v8  ;;  %3956 = vrot.lane.b32.xlu0 %v3910_v48, %s5841_s26 }
 0x9d2   : >> { %v3244_v37 = vpop.permute.xlu1 %3243 }
 0x9d3   : >> { %3285 = vst.msk [vmem:[#allocation3 + $0x38] sm:$0xff] %vm3277_vm2, %v3244_v37 }
 0x9d6   : >> { %v3260_v60 = vpop.permute.xlu1 %3259 }
 0x9d7   : >> { %3293 = vst.msk [vmem:[#allocation3 + $0x78] sm:$0xff] %vm3277_vm2, %v3260_v60 }
 0xa18   : >> { %v3935_v54 = vpop.permute.xlu1 %3934 }
 0xa19   : >> { %3980 = vst.msk [vmem:[#allocation3 + $0x18] sm:$0xff] %vm3976_vm3, %v3935_v54 }
 0xa1c   : >> { %v3931_v59 = vpop.permute.xlu1 %3930 }
 0xa1d   : >> { %3978 = vst.msk [vmem:[#allocation3 + $0x8] sm:$0xff] %vm3976_vm3, %v3931_v59 }
 0xa20   : >> { %v3996_v12 = vld [vmem:[#allocation3 + $0x18] sm:$0xff] }
 0xa21   : >> { %v3933_v63 = vpop.permute.xlu0 %3932 }
 0xa22   : >> { %3979 = vst.msk [vmem:[#allocation3 + $0x10] sm:$0xff] %vm3976_vm3, %v3933_v63 }
 0xa24   : >> { %v3939_v38 = vpop.permute.xlu1 %3938  ;;  %v3994_v10 = vld [vmem:[#allocation3 + $0x8] sm:$0xff] }
 0xa25   : >> { %3982 = vst.msk [vmem:[#allocation3 + $0x28] sm:$0xff] %vm3976_vm3, %v3939_v38  ;;  %v3929_v43 = vpop.permute.xlu0 %3928 }
 0xa26   : >> { %3977 = vst.msk [vmem:[#allocation3] sm:$0xff] %vm3976_vm3, %v3929_v43 }
 0xa28   : >> { %v3951_v46 = vpop.permute.xlu1 %3950 }
 0xa29   : >> { %3988 = vst.msk [vmem:[#allocation3 + $0x58] sm:$0xff] %vm3976_vm3, %v3951_v46  ;;  %v3995_v19 = vld [vmem:[#allocation3 + $0x10] sm:$0xff] }
 0xa2a   : >> { %v4010_v53 = vpack.c.bf16 %v3996_v12, %v3995_v19 }
 0xa2c   : >> { %v3947_v45 = vpop.permute.xlu1 %3946  ;;  %v3998_v27 = vld [vmem:[#allocation3 + $0x28] sm:$0xff] }
 0xa2d   : >> { %3986 = vst.msk [vmem:[#allocation3 + $0x48] sm:$0xff] %vm3976_vm3, %v3947_v45  ;;  %v3937_v5 = vpop.permute.xlu0 %3936  ;;  %v3993_v11 = vld [vmem:[#allocation3] sm:$0xff] }
 0xa2e   : >> { %3981 = vst.msk [vmem:[#allocation3 + $0x20] sm:$0xff] %vm3976_vm3, %v3937_v5  ;;  %v4009_v34 = vpack.c.bf16 %v3994_v10, %v3993_v11 }
 0xa30   : >> { %5110 = vmatprep.mubr.bf16.mxu0 %v4009_v34  ;;  %v3943_v6 = vpop.permute.xlu1 %3942  ;;  %v4004_v40 = vld [vmem:[#allocation3 + $0x58] sm:$0xff] }
 0xa31   : >> { %3984 = vst.msk [vmem:[#allocation3 + $0x38] sm:$0xff] %vm3976_vm3, %v3943_v6  ;;  %v3949_v13 = vpop.permute.xlu0 %3948  ;;  %5111 = vmatmul.mubr.bf16.vlgmr.msra.gmra.mxu0 %v4010_v53 }
 0xa32   : >> { %3987 = vst.msk [vmem:[#allocation3 + $0x50] sm:$0xff] %vm3976_vm3, %v3949_v13 }
 0xa34   : >> { %v3955_v32 = vpop.permute.xlu1 %3954  ;;  %v4002_v52 = vld [vmem:[#allocation3 + $0x48] sm:$0xff] }
 0xa35   : >> { %3990 = vst.msk [vmem:[#allocation3 + $0x68] sm:$0xff] %vm3976_vm3, %v3955_v32  ;;  %v3945_v2 = vpop.permute.xlu0 %3944  ;;  %v3997_v35 = vld [vmem:[#allocation3 + $0x20] sm:$0xff] }
 0xa36   : >> { %3985 = vst.msk [vmem:[#allocation3 + $0x40] sm:$0xff] %vm3976_vm3, %v3945_v2  ;;  %v4011_v62 = vpack.c.bf16 %v3998_v27, %v3997_v35 }
 0xa38   : >> { %5114 = vmatprep.mubr.bf16.mxu0 %v4011_v62  ;;  %v3959_v42 = vpop.permute.xlu1 %3958  ;;  %v4000_v56 = vld [vmem:[#allocation3 + $0x38] sm:$0xff] }
 0xa39   : >> { %3992 = vst.msk [vmem:[#allocation3 + $0x78] sm:$0xff] %vm3976_vm3, %v3959_v42  ;;  %v3941_v0 = vpop.permute.xlu0 %3940  ;;  %v4003_v9 = vld [vmem:[#allocation3 + $0x50] sm:$0xff] }
 0xa3a   : >> { %3983 = vst.msk [vmem:[#allocation3 + $0x30] sm:$0xff] %vm3976_vm3, %v3941_v0  ;;  %v4014_v3 = vpack.c.bf16 %v4004_v40, %v4003_v9 }
 0xa3c   : >> { %v4006_v1 = vld [vmem:[#allocation3 + $0x68] sm:$0xff] }
 0xa3d   : >> { %v3953_v18 = vpop.permute.xlu0 %3952  ;;  %v4001_v55 = vld [vmem:[#allocation3 + $0x40] sm:$0xff] }
 0xa3e   : >> { %3989 = vst.msk [vmem:[#allocation3 + $0x60] sm:$0xff] %vm3976_vm3, %v3953_v18  ;;  %v4013_v4 = vpack.c.bf16 %v4002_v52, %v4001_v55 }
 0xa40   : >> { %5118 = vmatprep.mubr.bf16.mxu1 %v4013_v4  ;;  %v4008_v31 = vld [vmem:[#allocation3 + $0x78] sm:$0xff] }
 0xa41   : >> { %v3957_v33 = vpop.permute.xlu0 %3956  ;;  %5119 = vmatmul.mubr.bf16.vlgmr.msra.gmra.mxu1 %v4014_v3  ;;  %v3999_v25 = vld [vmem:[#allocation3 + $0x30] sm:$0xff] }
 0xa42   : >> { %3991 = vst.msk [vmem:[#allocation3 + $0x70] sm:$0xff] %vm3976_vm3, %v3957_v33  ;;  %v4012_v16 = vpack.c.bf16 %v4000_v56, %v3999_v25 }
 0xa44   : >> { %5115 = vmatmul.mubr.bf16.gmra.mxu0 %v4012_v16 }
 0xa45   : >> { %v4005_v7 = vld [vmem:[#allocation3 + $0x60] sm:$0xff] }
 0xa46   : >> { %v4015_v30 = vpack.c.bf16 %v4006_v1, %v4005_v7 }
 0xa48   : >> { %5122 = vmatprep.mubr.bf16.mxu1 %v4015_v30 }
 0xa49   : >> { %v4007_v26 = vld [vmem:[#allocation3 + $0x70] sm:$0xff] }
 0xa4a   : >> { %v4016_v14 = vpack.c.bf16 %v4008_v31, %v4007_v26 }
 0xa4c   : >> { %5123 = vmatmul.mubr.bf16.gmra.mxu1 %v4016_v14 }
 0xaf1   : >> { %v5112_v21 = vpop.f32.mrf.mxu0 }
 0xaf2   : >> { %v4108_v49 = vadd.f32 %v5112_v21, %v7494_v20 }
 0xaf3   : >> { %v4099_v24 = vpop.f32.mrf.mxu0 }
 0xaf4   : >> { %4165 = vst [vmem:[%s7252_s14 + $0x10] sm:$0xff] %v4108_v49  ;;  %v4100_v41 = vadd.f32 %v7494_v20, %v4099_v24 }
 0xaf5   : >> { %v5113_v50 = vpop.f32.mrf.mxu0 }
 0xaf6   : >> { %4163 = vst [vmem:[%s7252_s14] sm:$0xff] %v4100_v41  ;;  %v4111_v28 = vadd.f32 %v5113_v50, %v7494_v20 }
 0xaf7   : >> { %v4102_v47 = vpop.f32.mrf.mxu0 }
 0xaf8   : >> { %4166 = vst [vmem:[%s7252_s14 + $0x18] sm:$0xff] %v4111_v28  ;;  %v4103_v15 = vadd.f32 %v7494_v20, %v4102_v47 }
 0xafa   : >> { %4164 = vst [vmem:[%s7252_s14 + $0x8] sm:$0xff] %v4103_v15 }
 0xb01   : >> { %v5120_v17 = vpop.f32.mrf.mxu1 }
 0xb02   : >> { %v4140_v58 = vadd.f32 %v5120_v17, %v7494_v20 }
 0xb03   : >> { %v4131_v36 = vpop.f32.mrf.mxu1 }
 0xb04   : >> { %4173 = vst [vmem:[%s7252_s14 + $0x50] sm:$0xff] %v4140_v58  ;;  %v4132_v23 = vadd.f32 %v7494_v20, %v4131_v36  ;;  %v5116_v57 = vpop.f32.mrf.mxu0 }
 0xb05   : >> { %v4124_v39 = vadd.f32 %v5116_v57, %v7494_v20  ;;  %v5121_v51 = vpop.f32.mrf.mxu1 }
 0xb06   : >> { %4171 = vst [vmem:[%s7252_s14 + $0x40] sm:$0xff] %v4132_v23  ;;  %v4143_v61 = vadd.f32 %v5121_v51, %v7494_v20  ;;  %v4115_v29 = vpop.f32.mrf.mxu0 }
 0xb07   : >> { %4169 = vst [vmem:[%s7252_s14 + $0x30] sm:$0xff] %v4124_v39  ;;  %v4116_v22 = vadd.f32 %v7494_v20, %v4115_v29  ;;  %v4134_v44 = vpop.f32.mrf.mxu1 }
 0xb08   : >> { %4174 = vst [vmem:[%s7252_s14 + $0x58] sm:$0xff] %v4143_v61  ;;  %v4135_v48 = vadd.f32 %v7494_v20, %v4134_v44  ;;  %v5117_v8 = vpop.f32.mrf.mxu0 }
 0xb09   : >> { %4167 = vst [vmem:[%s7252_s14 + $0x20] sm:$0xff] %v4116_v22  ;;  %v4127_v37 = vadd.f32 %v5117_v8, %v7494_v20 }
 0xb0a   : >> { %4172 = vst [vmem:[%s7252_s14 + $0x48] sm:$0xff] %v4135_v48  ;;  %v4118_v60 = vpop.f32.mrf.mxu0 }
 0xb0b   : >> { %4170 = vst [vmem:[%s7252_s14 + $0x38] sm:$0xff] %v4127_v37  ;;  %v4119_v54 = vadd.f32 %v7494_v20, %v4118_v60 }
 0xb0c   : >> { %v5124_v59 = vpop.f32.mrf.mxu1 }
 0xb0d   : >> { %4168 = vst [vmem:[%s7252_s14 + $0x28] sm:$0xff] %v4119_v54  ;;  %v4156_v63 = vadd.f32 %v5124_v59, %v7494_v20 }
 0xb0e   : >> { %v4147_v38 = vpop.f32.mrf.mxu1 }
 0xb0f   : >> { %4177 = vst [vmem:[%s7252_s14 + $0x70] sm:$0xff] %v4156_v63  ;;  %v4148_v43 = vadd.f32 %v7494_v20, %v4147_v38 }
 0xb10   : >> { %v5125_v46 = vpop.f32.mrf.mxu1 }
 0xb11   : >> { %4175 = vst [vmem:[%s7252_s14 + $0x60] sm:$0xff] %v4148_v43  ;;  %v4159_v45 = vadd.f32 %v5125_v46, %v7494_v20  ;;  %1301 = sbr.rel (!%p1299_p11) target bundleno = 421 (0x1a5), region = 98 }
 0xb12   : >> { %v4150_v19 = vpop.f32.mrf.mxu1 }
 0xb13   : >> { %4178 = vst [vmem:[%s7252_s14 + $0x78] sm:$0xff] %v4159_v45  ;;  %v4151_v5 = vadd.f32 %v7494_v20, %v4150_v19 }
 0xb15   : >> { %4176 = vst [vmem:[%s7252_s14 + $0x68] sm:$0xff] %v4151_v5 }
 0xb16   : > { %5768 = shalt.err (!%p5765_p13)
}
 0xb17   : > { %s5769_s10 = scalar_lea.hbm %s7293_s23, 4096  ;;  %s5773_s26 = scalar_lea.hbm %s7343_s4, 8192 }
 0xb18   : > { %p5770_p5 = scmp.ne.s32.totalorder %s7293_s23, %s5769_s10  ;;  %p5774_p8 = scmp.lt.s32.totalorder %s7293_s23, %s7343_s4 }
 0xb19   : > { %p5775_p7 = scmp.lt.s32.totalorder %s5773_s26, %s5769_s10 }
 0xb1a   : > { %p5771_p0 = pnand %p5770_p5, %p7495_p1 }
 0xb1b   : > { %p5776_p11 = por %p5775_p7, %p5774_p8 }
 0xb1c   : > { %p5772_p4 = pneg %p5771_p0 }
 0xb1e   : > { %p5777_p10 = pnand %p5776_p11, %p5772_p4 }
 0xb20   : > { %5780 = shalt.err (!%p5777_p10)
}
 0xb21   : > { %s5845_s14 = smov 128   ;;  %s5846_s20 = smov 8  }
 0xb22   : > { %5200 = dma.vmem_to_hbm [thread:$0]  (%p7495_p1), %s7296_s21, 4096, %s7293_s23, %s4180_s9, %s5845_s14, %s5845_s14, %s5846_s20  }
 0xb23 PF: > { %s4208_s27 = sand.u32 1, %s5815_s15   ;;  %p7496_p2 = scmp.ne.s32.totalorder %s7353_s22, 0 }
 0xb24   : > { %p7497_p6 = scmp.ge.s32.totalorder %s5827_s18, 2  ;;  %s4209_s28 = scalar_lea.sflag [#allocation6], %s4208_s27 }
 0xb26   : > { %p5214_p12 = pnand %p7497_p6, %p7496_p2 }
 0xb28   : > { %p5215_p3 = pneg %p5214_p12 }
 0xb2a   : > { %5810 = dma.done.wait (%p5215_p3), %s4209_s28, 4096  }
 0xb2b   : > { %5812 = vsyncadd (%p5215_p3), %s4209_s28, 4294963200  ;;  %p18_p9 = scmp.ge.s32.totalorder %s5947_s13, 4   ;;  %s7498_s15 = smov %s5819_s16 }
 0xb2c   : > { %s7499_s16 = smov %s5823_s17  ;;  %s7500_s17 = smov %s5956_s24 }
 0xb2d   : > { %s7501_s18 = smov %s5947_s13  ;;  %20 = sbr.rel (!%p18_p9) target bundleno = 6 (0x6), region = 109 }
 0xb32   :  { %4214 = vsyncpa [#allocation5], 1 }
 0xb33   :  { %4216 = vsyncpa [#allocation5 + $0x1], 1 }
 0xb34   :  { %4217 = vsyncpa [#allocation8], 1 }
 0xb35   :  { %4218 = vsyncpa [#allocation6], 1 }
 0xb36   :  { %4220 = vsyncpa [#allocation6 + $0x1], 1 }

</bundles_post_ra>
